<compile_context>
chip_gen: v6e
topology: v6e:2x2x1
jax: 0.10.0
libtpu: 0.0.40
codegen_flags: <defaults>
</compile_context>

<pallas_src>
import functools

import jax
import jax.numpy as jnp
from jax.experimental import pallas as pl
from jax.experimental.pallas import tpu as pltpu


LANE = 128               # lane width: output feature dims padded to this
ROW_TILE = 512           # node-row tile (sweep 512/1024 on v5e/v6e)
VMEM_LIMIT = 32 * 1024 * 1024
FUSE_MAX_NP = 4096       # fuse pool+head into kernel 2 below this node count
M_RESIDENT_MAX_BYTES = 8 * 1024 * 1024   # cap on resident-M (x2 buffers)


def _rup(v, m):
    return ((v + m - 1) // m) * m


# --------------------------- kernel 1: node MLP -----------------------------
# m_scaled = d_inv_sqrt * ( relu(X @ W1 + b1) @ W2 )            [TN, Hp] bf16
def _pre_mlp_kernel(x_ref, w1_ref, b1_ref, w2_ref, d_ref, m_ref):
    h = jnp.dot(x_ref[...], w1_ref[...], preferred_element_type=jnp.float32)
    h = jnp.maximum(h + b1_ref[...], 0.0)
    m = jnp.dot(h.astype(jnp.bfloat16), w2_ref[...],
                preferred_element_type=jnp.float32)
    m_ref[...] = (d_ref[...] * m).astype(jnp.bfloat16)


# ----------------- shared GCN aggregation body (A @ M, k-reduction) ---------
def _gcn_agg_body(a_ref, m_ref, acc_ref, *, tn, m_resident):
    k = pl.program_id(1)

    @pl.when(k == 0)
    def _():
        acc_ref[...] = jnp.zeros_like(acc_ref)

    if m_resident:
        off = pl.multiple_of(k * tn, tn)
        m_tile = m_ref[pl.ds(off, tn), :]          # slice of VMEM-resident M
    else:
        m_tile = m_ref[...]                        # streamed (TN, Hp) tile

    acc_ref[...] += jnp.dot(a_ref[...], m_tile,
                            preferred_element_type=jnp.float32)


# --------------- kernel 2a (large N): GCN aggregation -> h2 -----------------
def _gcn_h2_kernel(a_ref, m_ref, d_ref, b2_ref, h2_ref, acc_ref,
                   *, tn, m_resident):
    _gcn_agg_body(a_ref, m_ref, acc_ref, tn=tn, m_resident=m_resident)

    @pl.when(pl.program_id(1) == pl.num_programs(1) - 1)
    def _():
        h2 = jnp.maximum(d_ref[...] * acc_ref[...] + b2_ref[...], 0.0)
        h2_ref[...] = h2.astype(h2_ref.dtype)


# ------------- kernel 2b (small N): GCN agg + mean-pool + head (fused) ------
def _gcn_fused_kernel(a_ref, m_ref, d_ref, b2_ref, p_ref, inv_ref,
                      w3_ref, b3_ref, out_ref, acc_ref, pool_ref,
                      *, tn, m_resident):
    i = pl.program_id(0)
    k = pl.program_id(1)
    nk = pl.num_programs(1)

    @pl.when((i == 0) & (k == 0))
    def _():
        pool_ref[...] = jnp.zeros_like(pool_ref)

    _gcn_agg_body(a_ref, m_ref, acc_ref, tn=tn, m_resident=m_resident)

    @pl.when(k == nk - 1)
    def _():
        h2 = jnp.maximum(d_ref[...] * acc_ref[...] + b2_ref[...], 0.0)
        # bf16 one-hot pool matmul, f32 accumulation
        pool_ref[...] += jnp.dot(p_ref[...], h2.astype(jnp.bfloat16),
                                 preferred_element_type=jnp.float32)

    @pl.when((k == nk - 1) & (i == pl.num_programs(0) - 1))
    def _():
        pooled = pool_ref[...] * inv_ref[...]          # 1/|g| scaling in f32
        out_ref[...] = (jnp.dot(pooled, w3_ref[...],   # f32 head matmul
                                preferred_element_type=jnp.float32)
                        + b3_ref[...])


# --------------- kernel 3 (large N): mean-pool + classifier -----------------
def _pool_head_kernel(p_ref, h2_ref, inv_ref, w3_ref, b3_ref, out_ref, acc_ref):
    k = pl.program_id(0)

    @pl.when(k == 0)
    def _():
        acc_ref[...] = jnp.zeros_like(acc_ref)

    acc_ref[...] += jnp.dot(p_ref[...], h2_ref[...],
                            preferred_element_type=jnp.float32)

    @pl.when(k == pl.num_programs(0) - 1)
    def _():
        pooled = acc_ref[...] * inv_ref[...]
        out_ref[...] = (jnp.dot(pooled, w3_ref[...],
                                preferred_element_type=jnp.float32)
                        + b3_ref[...])


@functools.partial(jax.jit, static_argnames=("num_graphs", "n_classes"))
def gnn_forward(x, edge_index, batch, params, num_graphs, n_classes):
    """x: [N, F] f32, edge_index: [2, E] i32, batch: [N] i32 -> [G, C] f32."""
    w1, b1, w2, b2, w3, b3 = params
    N, F = x.shape
    H = w1.shape[1]
    C = w3.shape[1]

    TN = ROW_TILE
    Np = _rup(N, TN)
    Hp = _rup(H, LANE)
    Cp = _rup(C, LANE)
    Gp = _rup(num_graphs, 8)
    n_row = Np // TN

    f32, bf16 = jnp.float32, jnp.bfloat16

    # ---- glue: row-pad X only (feature dim stays at native F), lane-pad the
    # output side of every weight so stores are unmasked 128-wide vst ----
    xp = jnp.zeros((Np, F), bf16).at[:N, :].set(x.astype(bf16))
    w1p = jnp.zeros((F, Hp), f32).at[:, :H].set(w1).astype(bf16)
    b1p = jnp.zeros((1, Hp), f32).at[:, :H].set(b1.reshape(1, H))
    w2p = jnp.zeros((Hp, Hp), f32).at[:H, :H].set(w2).astype(bf16)
    b2p = jnp.zeros((1, Hp), f32).at[:, :H].set(b2.reshape(1, H))
    w3p = jnp.zeros((Hp, Cp), f32).at[:H, :C].set(w3)     # f32 head weight
    b3p = jnp.zeros((1, Cp), f32).at[:, :C].set(b3.reshape(1, C))

    # ---- glue: adjacency built directly as bf16 (0/1/2 entries exact), one
    # scatter write + one f32-accumulated row-sum; GCN normalization stays
    # folded into the kernels through d_inv_sqrt ----
    src, dst = edge_index[0], edge_index[1]
    adj = jnp.zeros((Np, Np), bf16).at[dst, src].set(1.0)
    idx = jnp.arange(N)
    adj = adj.at[idx, idx].add(1.0)                       # self loops (real nodes)
    deg = jnp.sum(adj, axis=1, dtype=f32)
    d_inv_sqrt = jnp.where(deg > 0, 1.0 / jnp.sqrt(deg), 0.0)
    d_col = d_inv_sqrt.reshape(Np, 1)                     # [Np, 1] f32

    # ---- glue: bf16 0/1 one-hot pool matrix + f32 per-graph 1/|g| scale ----
    batch_p = jnp.full((Np,), Gp, jnp.int32).at[:N].set(batch)
    onehot = batch_p[None, :] == jnp.arange(Gp, dtype=jnp.int32)[:, None]
    counts = jnp.sum(onehot, axis=1, keepdims=True).astype(f32)
    inv_cnt = 1.0 / jnp.maximum(counts, 1.0)              # [Gp, 1] f32
    pool_oh = onehot.astype(bf16)                         # [Gp, Np] bf16

    const2 = lambda *_: (0, 0)                            # resident operands

    # ---- kernel 1: per-node MLP + W2 transform + D^{-1/2} column scaling ----
    m_scaled = pl.pallas_call(
        _pre_mlp_kernel,
        out_shape=jax.ShapeDtypeStruct((Np, Hp), bf16),
        grid_spec=pltpu.PrefetchScalarGridSpec(
            num_scalar_prefetch=0,
            grid=(n_row,),
            in_specs=[
                pl.BlockSpec((TN, F), lambda i: (i, 0)),
                pl.BlockSpec((F, Hp), const2),
                pl.BlockSpec((1, Hp), const2),
                pl.BlockSpec((Hp, Hp), const2),
                pl.BlockSpec((TN, 1), lambda i: (i, 0)),
            ],
            out_specs=pl.BlockSpec((TN, Hp), lambda i: (i, 0)),
        ),
        compiler_params=pltpu.CompilerParams(
            dimension_semantics=("parallel",),
            vmem_limit_bytes=VMEM_LIMIT),
    )(xp, w1p, b1p, w2p, d_col)

    # ---- static sizing decisions (shapes are static under jit) ----
    m_resident = (Np * Hp * 2 * 2) <= M_RESIDENT_MAX_BYTES   # x2 pipeline bufs
    fuse = Np <= FUSE_MAX_NP

    if m_resident:
        m_spec = pl.BlockSpec((Np, Hp), lambda i, k: (0, 0))   # DMA'd once
    else:
        m_spec = pl.BlockSpec((TN, Hp), lambda i, k: (k, 0))   # streamed

    if fuse:
        # ---- kernel 2 (fused): A @ M reduction + pool + head; h2 never hits
        # HBM and there is no third launch (small-N latency-bound regime) ----
        out_p = pl.pallas_call(
            functools.partial(_gcn_fused_kernel, tn=TN, m_resident=m_resident),
            out_shape=jax.ShapeDtypeStruct((Gp, Cp), f32),
            grid_spec=pltpu.PrefetchScalarGridSpec(
                num_scalar_prefetch=0,
                grid=(n_row, n_row),
                in_specs=[
                    pl.BlockSpec((TN, TN), lambda i, k: (i, k)),
                    m_spec,
                    pl.BlockSpec((TN, 1), lambda i, k: (i, 0)),
                    pl.BlockSpec((1, Hp), const2),
                    pl.BlockSpec((Gp, TN), lambda i, k: (0, i)),
                    pl.BlockSpec((Gp, 1), const2),
                    pl.BlockSpec((Hp, Cp), const2),
                    pl.BlockSpec((1, Cp), const2),
                ],
                out_specs=pl.BlockSpec((Gp, Cp), const2),
                scratch_shapes=[pltpu.VMEM((TN, Hp), jnp.float32),
                                pltpu.VMEM((Gp, Hp), jnp.float32)],
            ),
            compiler_params=pltpu.CompilerParams(
                dimension_semantics=("arbitrary", "arbitrary"),
                vmem_limit_bytes=VMEM_LIMIT),
        )(adj, m_scaled, d_col, b2p, pool_oh, inv_cnt, w3p, b3p)
    else:
        # ---- kernel 2: tiled A @ M with k-reduction accumulator ----
        h2 = pl.pallas_call(
            functools.partial(_gcn_h2_kernel, tn=TN, m_resident=m_resident),
            out_shape=jax.ShapeDtypeStruct((Np, Hp), bf16),
            grid_spec=pltpu.PrefetchScalarGridSpec(
                num_scalar_prefetch=0,
                grid=(n_row, n_row),
                in_specs=[
                    pl.BlockSpec((TN, TN), lambda i, k: (i, k)),
                    m_spec,
                    pl.BlockSpec((TN, 1), lambda i, k: (i, 0)),
                    pl.BlockSpec((1, Hp), const2),
                ],
                out_specs=pl.BlockSpec((TN, Hp), lambda i, k: (i, 0)),
                scratch_shapes=[pltpu.VMEM((TN, Hp), jnp.float32)],
            ),
            compiler_params=pltpu.CompilerParams(
                dimension_semantics=("parallel", "arbitrary"),
                vmem_limit_bytes=VMEM_LIMIT),
        )(adj, m_scaled, d_col, b2p)

        # ---- kernel 3: global mean pool (node-tile reduction) + f32 head ----
        out_p = pl.pallas_call(
            _pool_head_kernel,
            out_shape=jax.ShapeDtypeStruct((Gp, Cp), f32),
            grid_spec=pltpu.PrefetchScalarGridSpec(
                num_scalar_prefetch=0,
                grid=(n_row,),
                in_specs=[
                    pl.BlockSpec((Gp, TN), lambda k: (0, k)),
                    pl.BlockSpec((TN, Hp), lambda k: (k, 0)),
                    pl.BlockSpec((Gp, 1), const2),
                    pl.BlockSpec((Hp, Cp), const2),
                    pl.BlockSpec((1, Cp), const2),
                ],
                out_specs=pl.BlockSpec((Gp, Cp), const2),
                scratch_shapes=[pltpu.VMEM((Gp, Hp), jnp.float32)],
            ),
            compiler_params=pltpu.CompilerParams(
                dimension_semantics=("arbitrary",),
                vmem_limit_bytes=VMEM_LIMIT),
        )(pool_oh, h2, inv_cnt, w3p, b3p)

    return out_p[:num_graphs, :n_classes]


if __name__ == "__main__":
    # small config consistent with the module's __init__/config
    n_node_features = 8      # self.n_node_features
    hidden_features = 32     # config['hidden_features']
    n_classes = 4            # self.n_classes (post_gnn appends this)
    N = 512                  # total nodes
    E = 2048                 # total edges
    num_graphs = 2           # batch of 2 graphs

    key = jax.random.PRNGKey(0)
    kx, ke, kw1, kw2, kw3 = jax.random.split(key, 5)

    x = jax.random.normal(kx, (N, n_node_features), dtype=jnp.float32)
    edge_index = jax.random.randint(ke, (2, E), 0, N, dtype=jnp.int32)
    batch = jnp.concatenate([jnp.zeros(N // 2, jnp.int32),
                             jnp.ones(N - N // 2, jnp.int32)])

    w1 = jax.random.normal(kw1, (n_node_features, hidden_features), jnp.float32) * 0.1
    b1 = jnp.zeros((1, hidden_features), jnp.float32)
    w2 = jax.random.normal(kw2, (hidden_features, hidden_features), jnp.float32) * 0.1
    b2 = jnp.zeros((1, hidden_features), jnp.float32)
    w3 = jax.random.normal(kw3, (hidden_features, n_classes), jnp.float32) * 0.1
    b3 = jnp.zeros((1, n_classes), jnp.float32)
    params = (w1, b1, w2, b2, w3, b3)

    logits = gnn_forward(x, edge_index, batch, params, num_graphs, n_classes)
    jax.block_until_ready(logits)

    # pure-JAX f32 reference (same implied pipeline)
    src, dst = edge_index[0], edge_index[1]
    adj_ref = jnp.zeros((N, N), jnp.float32).at[dst, src].set(1.0) + jnp.eye(N)
    d = jnp.sum(adj_ref, 1)
    dis = jnp.where(d > 0, 1.0 / jnp.sqrt(d), 0.0)
    adjn = adj_ref * dis[:, None] * dis[None, :]
    h = jnp.maximum(x @ w1 + b1, 0.0)
    h = jnp.maximum(adjn @ (h @ w2) + b2, 0.0)
    onehot = (batch[None, :] == jnp.arange(num_graphs)[:, None]).astype(jnp.float32)
    pm = onehot / jnp.maximum(onehot.sum(1, keepdims=True), 1.0)
    ref = pm @ h @ w3 + b3

    assert logits.shape == (num_graphs, n_classes)
    err = float(jnp.max(jnp.abs(logits - ref)))
    assert jnp.allclose(logits, ref, atol=5e-3, rtol=5e-2), err

    print("KERNEL_OK")
</pallas_src>

<mosaic_0001>
module attributes {stable_mosaic.version = 11 : i64} {
  func.func @_pre_mlp_kernel(%arg0: i32, %arg1: memref<512x8xbf16, #tpu.memory_space<vmem>>, %arg2: memref<8x128xbf16, #tpu.memory_space<vmem>>, %arg3: memref<1x128xf32, #tpu.memory_space<vmem>>, %arg4: memref<128x128xbf16, #tpu.memory_space<vmem>>, %arg5: memref<512x1xf32, #tpu.memory_space<vmem>>, %arg6: memref<512x128xbf16, #tpu.memory_space<vmem>>) attributes {dimension_semantics = [#tpu.dimension_semantics<parallel>], iteration_bounds = array<i64: 1>, scalar_prefetch = 0 : i64, scratch_operands = 0 : i64, tpu.core_type = #tpu.core_type<tc>, window_params = [{transform_indices = @transform_0, window_bounds = array<i64: 512, 8>}, {pipeline_mode = #tpu.pipeline_mode<synchronous>, transform_indices = @transform_1, window_bounds = array<i64: 8, 128>}, {pipeline_mode = #tpu.pipeline_mode<synchronous>, transform_indices = @transform_2, window_bounds = array<i64: 1, 128>}, {pipeline_mode = #tpu.pipeline_mode<synchronous>, transform_indices = @transform_3, window_bounds = array<i64: 128, 128>}, {transform_indices = @transform_4, window_bounds = array<i64: 512, 1>}, {transform_indices = @transform_5, window_bounds = array<i64: 512, 128>}]} {
    %c0 = arith.constant 0 : index
    %c0_0 = arith.constant 0 : index
    %0 = vector.load %arg1[%c0, %c0_0] : memref<512x8xbf16, #tpu.memory_space<vmem>>, vector<512x8xbf16>
    %c0_1 = arith.constant 0 : index
    %c0_2 = arith.constant 0 : index
    %1 = vector.load %arg2[%c0_1, %c0_2] : memref<8x128xbf16, #tpu.memory_space<vmem>>, vector<8x128xbf16>
    %cst = arith.constant dense<0.000000e+00> : vector<512x128xf32>
    %2 = tpu.matmul %0, %1, %cst {dimension_numbers = #tpu.dot_dimension_numbers<[1], [0], [0], [1], [0, 0, 1, 1], [], []>} : vector<512x8xbf16>, vector<8x128xbf16>, vector<512x128xf32> -> vector<512x128xf32>
    %c0_3 = arith.constant 0 : index
    %c0_4 = arith.constant 0 : index
    %3 = vector.load %arg3[%c0_3, %c0_4] : memref<1x128xf32, #tpu.memory_space<vmem>>, vector<1x128xf32>
    %4 = vector.broadcast %3 : vector<1x128xf32> to vector<512x128xf32>
    %5 = arith.addf %2, %4 : vector<512x128xf32>
    %cst_5 = arith.constant 0.000000e+00 : f32
    %6 = vector.broadcast %cst_5 : f32 to vector<512x128xf32>
    %7 = arith.maximumf %5, %6 : vector<512x128xf32>
    %8 = arith.truncf %7 : vector<512x128xf32> to vector<512x128xbf16>
    %c0_6 = arith.constant 0 : index
    %c0_7 = arith.constant 0 : index
    %9 = vector.load %arg4[%c0_6, %c0_7] : memref<128x128xbf16, #tpu.memory_space<vmem>>, vector<128x128xbf16>
    %cst_8 = arith.constant dense<0.000000e+00> : vector<512x128xf32>
    %10 = tpu.matmul %8, %9, %cst_8 {dimension_numbers = #tpu.dot_dimension_numbers<[1], [0], [0], [1], [0, 0, 1, 1], [], []>} : vector<512x128xbf16>, vector<128x128xbf16>, vector<512x128xf32> -> vector<512x128xf32>
    %c0_9 = arith.constant 0 : index
    %c0_10 = arith.constant 0 : index
    %11 = vector.load %arg5[%c0_9, %c0_10] : memref<512x1xf32, #tpu.memory_space<vmem>>, vector<512x1xf32>
    %12 = vector.broadcast %11 : vector<512x1xf32> to vector<512x128xf32>
    %13 = arith.mulf %12, %10 : vector<512x128xf32>
    %14 = arith.truncf %13 : vector<512x128xf32> to vector<512x128xbf16>
    %c0_11 = arith.constant 0 : index
    %c0_12 = arith.constant 0 : index
    %15 = vector.load %arg6[%c0_11, %c0_12] : memref<512x128xbf16, #tpu.memory_space<vmem>>, vector<512x128xbf16>
    tpu.vector_store %arg6[%c0_11, %c0_12], %14 {strides = array<i32>} : memref<512x128xbf16, #tpu.memory_space<vmem>>, vector<512x128xbf16>,
    return
  }
  func.func @transform_0(%arg0: i32) -> (i32, i32) {
    %c0_i32 = arith.constant 0 : i32
    %c0_i32_0 = arith.constant 0 : i32
    return %arg0, %c0_i32 : i32, i32
  }
  func.func @transform_1(%arg0: i32) -> (i32, i32) {
    %c0_i32 = arith.constant 0 : i32
    %c0_i32_0 = arith.constant 0 : i32
    %c0_i32_1 = arith.constant 0 : i32
    return %c0_i32, %c0_i32_0 : i32, i32
  }
  func.func @transform_2(%arg0: i32) -> (i32, i32) {
    %c0_i32 = arith.constant 0 : i32
    %c0_i32_0 = arith.constant 0 : i32
    %c0_i32_1 = arith.constant 0 : i32
    return %c0_i32, %c0_i32_0 : i32, i32
  }
  func.func @transform_3(%arg0: i32) -> (i32, i32) {
    %c0_i32 = arith.constant 0 : i32
    %c0_i32_0 = arith.constant 0 : i32
    %c0_i32_1 = arith.constant 0 : i32
    return %c0_i32, %c0_i32_0 : i32, i32
  }
  func.func @transform_4(%arg0: i32) -> (i32, i32) {
    %c0_i32 = arith.constant 0 : i32
    %c0_i32_0 = arith.constant 0 : i32
    return %arg0, %c0_i32 : i32, i32
  }
  func.func @transform_5(%arg0: i32) -> (i32, i32) {
    %c0_i32 = arith.constant 0 : i32
    %c0_i32_0 = arith.constant 0 : i32
    return %arg0, %c0_i32 : i32, i32
  }
}

module attributes {stable_mosaic.version = 11 : i64} {
  func.func @_gcn_fused_kernel(%arg0: i32, %arg1: i32, %arg2: memref<512x512xbf16, #tpu.memory_space<vmem>>, %arg3: memref<512x128xbf16, #tpu.memory_space<vmem>>, %arg4: memref<512x1xf32, #tpu.memory_space<vmem>>, %arg5: memref<1x128xf32, #tpu.memory_space<vmem>>, %arg6: memref<8x512xbf16, #tpu.memory_space<vmem>>, %arg7: memref<8x1xf32, #tpu.memory_space<vmem>>, %arg8: memref<128x128xf32, #tpu.memory_space<vmem>>, %arg9: memref<1x128xf32, #tpu.memory_space<vmem>>, %arg10: memref<8x128xf32, #tpu.memory_space<vmem>>, %arg11: memref<512x128xf32, #tpu.memory_space<vmem>>, %arg12: memref<8x128xf32, #tpu.memory_space<vmem>>) attributes {dimension_semantics = [#tpu.dimension_semantics<arbitrary>, #tpu.dimension_semantics<arbitrary>], iteration_bounds = array<i64: 1, 1>, scalar_prefetch = 0 : i64, scratch_operands = 2 : i64, tpu.core_type = #tpu.core_type<tc>, window_params = [{transform_indices = @transform_0, window_bounds = array<i64: 512, 512>}, {pipeline_mode = #tpu.pipeline_mode<synchronous>, transform_indices = @transform_1, window_bounds = array<i64: 512, 128>}, {transform_indices = @transform_2, window_bounds = array<i64: 512, 1>}, {pipeline_mode = #tpu.pipeline_mode<synchronous>, transform_indices = @transform_3, window_bounds = array<i64: 1, 128>}, {transform_indices = @transform_4, window_bounds = array<i64: 8, 512>}, {pipeline_mode = #tpu.pipeline_mode<synchronous>, transform_indices = @transform_5, window_bounds = array<i64: 8, 1>}, {pipeline_mode = #tpu.pipeline_mode<synchronous>, transform_indices = @transform_6, window_bounds = array<i64: 128, 128>}, {pipeline_mode = #tpu.pipeline_mode<synchronous>, transform_indices = @transform_7, window_bounds = array<i64: 1, 128>}, {pipeline_mode = #tpu.pipeline_mode<synchronous>, transform_indices = @transform_8, window_bounds = array<i64: 8, 128>}]} {
    %c0_i32 = arith.constant 0 : i32
    %0 = arith.cmpi eq, %arg0, %c0_i32 : i32
    %c0_i32_0 = arith.constant 0 : i32
    %1 = arith.cmpi eq, %arg1, %c0_i32_0 : i32
    %2 = arith.andi %0, %1 : i1
    %3 = arith.extui %2 : i1 to i32
    %c0_i32_1 = arith.constant 0 : i32
    %4 = arith.cmpi ne, %3, %c0_i32_1 : i32
    scf.if %4 {
      %cst_15 = arith.constant 0.000000e+00 : f32
      %25 = vector.broadcast %cst_15 : f32 to vector<8x128xf32>
      %c0_16 = arith.constant 0 : index
      %c0_17 = arith.constant 0 : index
      %26 = vector.load %arg12[%c0_16, %c0_17] : memref<8x128xf32, #tpu.memory_space<vmem>>, vector<8x128xf32>
      tpu.vector_store %arg12[%c0_16, %c0_17], %25 {strides = array<i32>} : memref<8x128xf32, #tpu.memory_space<vmem>>, vector<8x128xf32>,
    } else {
    }
    %c0_i32_2 = arith.constant 0 : i32
    %5 = arith.cmpi eq, %arg1, %c0_i32_2 : i32
    %6 = arith.extui %5 : i1 to i32
    %c0_i32_3 = arith.constant 0 : i32
    %7 = arith.cmpi ne, %6, %c0_i32_3 : i32
    scf.if %7 {
      %cst_15 = arith.constant 0.000000e+00 : f32
      %25 = vector.broadcast %cst_15 : f32 to vector<512x128xf32>
      %c0_16 = arith.constant 0 : index
      %c0_17 = arith.constant 0 : index
      %26 = vector.load %arg11[%c0_16, %c0_17] : memref<512x128xf32, #tpu.memory_space<vmem>>, vector<512x128xf32>
      tpu.vector_store %arg11[%c0_16, %c0_17], %25 {strides = array<i32>} : memref<512x128xf32, #tpu.memory_space<vmem>>, vector<512x128xf32>,
    } else {
    }
    %c512_i32 = arith.constant 512 : i32
    %8 = arith.muli %arg1, %c512_i32 : i32
    %9 = tpu.assume_multiple %8, 512 : i32
    %10 = arith.index_cast %9 : i32 to index
    %c0 = arith.constant 0 : index
    %11 = vector.load %arg3[%10, %c0] : memref<512x128xbf16, #tpu.memory_space<vmem>>, vector<512x128xbf16>
    %c0_4 = arith.constant 0 : index
    %c0_5 = arith.constant 0 : index
    %12 = vector.load %arg11[%c0_4, %c0_5] : memref<512x128xf32, #tpu.memory_space<vmem>>, vector<512x128xf32>
    %c0_6 = arith.constant 0 : index
    %c0_7 = arith.constant 0 : index
    %13 = vector.load %arg2[%c0_6, %c0_7] : memref<512x512xbf16, #tpu.memory_space<vmem>>, vector<512x512xbf16>
    %cst = arith.constant dense<0.000000e+00> : vector<512x128xf32>
    %14 = tpu.matmul %13, %11, %cst {dimension_numbers = #tpu.dot_dimension_numbers<[1], [0], [0], [1], [0, 0, 1, 1], [], []>} : vector<512x512xbf16>, vector<512x128xbf16>, vector<512x128xf32> -> vector<512x128xf32>
    %15 = arith.addf %12, %14 : vector<512x128xf32>
    %c0_8 = arith.constant 0 : index
    %c0_9 = arith.constant 0 : index
    %16 = vector.load %arg11[%c0_8, %c0_9] : memref<512x128xf32, #tpu.memory_space<vmem>>, vector<512x128xf32>
    tpu.vector_store %arg11[%c0_8, %c0_9], %15 {strides = array<i32>} : memref<512x128xf32, #tpu.memory_space<vmem>>, vector<512x128xf32>,
    %c0_i32_10 = arith.constant 0 : i32
    %17 = arith.cmpi eq, %arg1, %c0_i32_10 : i32
    %18 = arith.extui %17 : i1 to i32
    %c0_i32_11 = arith.constant 0 : i32
    %19 = arith.cmpi ne, %18, %c0_i32_11 : i32
    scf.if %19 {
      %c0_15 = arith.constant 0 : index
      %c0_16 = arith.constant 0 : index
      %25 = vector.load %arg4[%c0_15, %c0_16] : memref<512x1xf32, #tpu.memory_space<vmem>>, vector<512x1xf32>
      %c0_17 = arith.constant 0 : index
      %c0_18 = arith.constant 0 : index
      %26 = vector.load %arg11[%c0_17, %c0_18] : memref<512x128xf32, #tpu.memory_space<vmem>>, vector<512x128xf32>
      %27 = vector.broadcast %25 : vector<512x1xf32> to vector<512x128xf32>
      %28 = arith.mulf %27, %26 : vector<512x128xf32>
      %c0_19 = arith.constant 0 : index
      %c0_20 = arith.constant 0 : index
      %29 = vector.load %arg5[%c0_19, %c0_20] : memref<1x128xf32, #tpu.memory_space<vmem>>, vector<1x128xf32>
      %30 = vector.broadcast %29 : vector<1x128xf32> to vector<512x128xf32>
      %31 = arith.addf %28, %30 : vector<512x128xf32>
      %cst_21 = arith.constant 0.000000e+00 : f32
      %32 = vector.broadcast %cst_21 : f32 to vector<512x128xf32>
      %33 = arith.maximumf %31, %32 : vector<512x128xf32>
      %c0_22 = arith.constant 0 : index
      %c0_23 = arith.constant 0 : index
      %34 = vector.load %arg12[%c0_22, %c0_23] : memref<8x128xf32, #tpu.memory_space<vmem>>, vector<8x128xf32>
      %c0_24 = arith.constant 0 : index
      %c0_25 = arith.constant 0 : index
      %35 = vector.load %arg6[%c0_24, %c0_25] : memref<8x512xbf16, #tpu.memory_space<vmem>>, vector<8x512xbf16>
      %36 = arith.truncf %33 : vector<512x128xf32> to vector<512x128xbf16>
      %cst_26 = arith.constant dense<0.000000e+00> : vector<8x128xf32>
      %37 = tpu.matmul %35, %36, %cst_26 {dimension_numbers = #tpu.dot_dimension_numbers<[1], [0], [0], [1], [0, 0, 1, 1], [], []>} : vector<8x512xbf16>, vector<512x128xbf16>, vector<8x128xf32> -> vector<8x128xf32>
      %38 = arith.addf %34, %37 : vector<8x128xf32>
      %c0_27 = arith.constant 0 : index
      %c0_28 = arith.constant 0 : index
      %39 = vector.load %arg12[%c0_27, %c0_28] : memref<8x128xf32, #tpu.memory_space<vmem>>, vector<8x128xf32>
      tpu.vector_store %arg12[%c0_27, %c0_28], %38 {strides = array<i32>} : memref<8x128xf32, #tpu.memory_space<vmem>>, vector<8x128xf32>,
    } else {
    }
    %c0_i32_12 = arith.constant 0 : i32
    %20 = arith.cmpi eq, %arg1, %c0_i32_12 : i32
    %c0_i32_13 = arith.constant 0 : i32
    %21 = arith.cmpi eq, %arg0, %c0_i32_13 : i32
    %22 = arith.andi %20, %21 : i1
    %23 = arith.extui %22 : i1 to i32
    %c0_i32_14 = arith.constant 0 : i32
    %24 = arith.cmpi ne, %23, %c0_i32_14 : i32
    scf.if %24 {
      %c0_15 = arith.constant 0 : index
      %c0_16 = arith.constant 0 : index
      %25 = vector.load %arg12[%c0_15, %c0_16] : memref<8x128xf32, #tpu.memory_space<vmem>>, vector<8x128xf32>
      %c0_17 = arith.constant 0 : index
      %c0_18 = arith.constant 0 : index
      %26 = vector.load %arg7[%c0_17, %c0_18] : memref<8x1xf32, #tpu.memory_space<vmem>>, vector<8x1xf32>
      %27 = vector.broadcast %26 : vector<8x1xf32> to vector<8x128xf32>
      %28 = arith.mulf %25, %27 : vector<8x128xf32>
      %c0_19 = arith.constant 0 : index
      %c0_20 = arith.constant 0 : index
      %29 = vector.load %arg8[%c0_19, %c0_20] : memref<128x128xf32, #tpu.memory_space<vmem>>, vector<128x128xf32>
      %cst_21 = arith.constant dense<0.000000e+00> : vector<8x128xf32>
      %30 = tpu.matmul %28, %29, %cst_21 {dimension_numbers = #tpu.dot_dimension_numbers<[1], [0], [0], [1], [0, 0, 1, 1], [], []>} : vector<8x128xf32>, vector<128x128xf32>, vector<8x128xf32> -> vector<8x128xf32>
      %c0_22 = arith.constant 0 : index
      %c0_23 = arith.constant 0 : index
      %31 = vector.load %arg9[%c0_22, %c0_23] : memref<1x128xf32, #tpu.memory_space<vmem>>, vector<1x128xf32>
      %32 = vector.broadcast %31 : vector<1x128xf32> to vector<8x128xf32>
      %33 = arith.addf %30, %32 : vector<8x128xf32>
      %c0_24 = arith.constant 0 : index
      %c0_25 = arith.constant 0 : index
      %34 = vector.load %arg10[%c0_24, %c0_25] : memref<8x128xf32, #tpu.memory_space<vmem>>, vector<8x128xf32>
      tpu.vector_store %arg10[%c0_24, %c0_25], %33 {strides = array<i32>} : memref<8x128xf32, #tpu.memory_space<vmem>>, vector<8x128xf32>,
    } else {
    }
    return
  }
  func.func @transform_0(%arg0: i32, %arg1: i32) -> (i32, i32) {
    %c0_i32 = arith.constant 0 : i32
    return %arg0, %arg1 : i32, i32
  }
  func.func @transform_1(%arg0: i32, %arg1: i32) -> (i32, i32) {
    %c0_i32 = arith.constant 0 : i32
    %c0_i32_0 = arith.constant 0 : i32
    %c0_i32_1 = arith.constant 0 : i32
    return %c0_i32, %c0_i32_0 : i32, i32
  }
  func.func @transform_2(%arg0: i32, %arg1: i32) -> (i32, i32) {
    %c0_i32 = arith.constant 0 : i32
    %c0_i32_0 = arith.constant 0 : i32
    return %arg0, %c0_i32 : i32, i32
  }
  func.func @transform_3(%arg0: i32, %arg1: i32) -> (i32, i32) {
    %c0_i32 = arith.constant 0 : i32
    %c0_i32_0 = arith.constant 0 : i32
    %c0_i32_1 = arith.constant 0 : i32
    return %c0_i32, %c0_i32_0 : i32, i32
  }
  func.func @transform_4(%arg0: i32, %arg1: i32) -> (i32, i32) {
    %c0_i32 = arith.constant 0 : i32
    %c0_i32_0 = arith.constant 0 : i32
    return %c0_i32, %arg0 : i32, i32
  }
  func.func @transform_5(%arg0: i32, %arg1: i32) -> (i32, i32) {
    %c0_i32 = arith.constant 0 : i32
    %c0_i32_0 = arith.constant 0 : i32
    %c0_i32_1 = arith.constant 0 : i32
    return %c0_i32, %c0_i32_0 : i32, i32
  }
  func.func @transform_6(%arg0: i32, %arg1: i32) -> (i32, i32) {
    %c0_i32 = arith.constant 0 : i32
    %c0_i32_0 = arith.constant 0 : i32
    %c0_i32_1 = arith.constant 0 : i32
    return %c0_i32, %c0_i32_0 : i32, i32
  }
  func.func @transform_7(%arg0: i32, %arg1: i32) -> (i32, i32) {
    %c0_i32 = arith.constant 0 : i32
    %c0_i32_0 = arith.constant 0 : i32
    %c0_i32_1 = arith.constant 0 : i32
    return %c0_i32, %c0_i32_0 : i32, i32
  }
  func.func @transform_8(%arg0: i32, %arg1: i32) -> (i32, i32) {
    %c0_i32 = arith.constant 0 : i32
    %c0_i32_0 = arith.constant 0 : i32
    %c0_i32_1 = arith.constant 0 : i32
    return %c0_i32, %c0_i32_0 : i32, i32
  }
}

</mosaic_0001>

<bundles_post_ra>
// kernel: gnn_forward.2
= control target key start
LH: loop header
LB: loop body
LE: loop exit
PB: predicated region body
PF: predicated region fallthrough
CT: control target
= control target key end

     0   :  { %vm350_vm0 = vcmask 1043456   ;;  %vm253_vm1 = vcmask 64512   ;;  %v2535_v1 = vmov 0   ;;  %s3135_s1 = inlined_call_operand.vmem [shape: bf16[8,128], index: 1, kind: input, shape index: {}]   ;;  %s3136_s0 = inlined_call_operand.vmem [shape: bf16[512,8], index: 0, kind: input, shape index: {}]   ;;  %s3137_s4 = inlined_call_operand.vmem [shape: f32[512,1], index: 4, kind: input, shape index: {}]   ;;  %s3138_s3 = inlined_call_operand.vmem [shape: bf16[128,128], index: 3, kind: input, shape index: {}]   ;;  %s3139_s2 = inlined_call_operand.vmem [shape: f32[1,128], index: 2, kind: input, shape index: {}]   ;;  %s3140_s5 = inlined_call_operand.vmem [shape: bf16[512,128], index: 5, kind: output, shape index: {}]  }
   0x1   :  { %v85_v0 = vld [vmem:[%s3135_s1] sm:$0xf]  ;;  %2494 = vset.pattern.permute.xlu1 %v2535_v1  ;;  %2493 = vset.pattern.permute.xlu0 %v2535_v1  ;;  %v2496_v4 = vld [vmem:[%s3136_s0 + $0x8] sm:$0xff]   ;;  %v2497_v5 = vld [vmem:[%s3136_s0 + $0x10] sm:$0xff]  }
   0x2   :  { %2491 = vmatprep.subr.msk.bf16.mxu0 %vm350_vm0, %v85_v0  ;;  %v352_v2 = vsel %vm350_vm0, %v85_v0, 0  ;;  %v2495_v3 = vld [vmem:[%s3136_s0] sm:$0xff]   ;;  %v2498_v6 = vld [vmem:[%s3136_s0 + $0x18] sm:$0xff]   ;;  %v2500_v8 = vld [vmem:[%s3136_s0 + $0x28] sm:$0xff]  }
   0x3   :  { %2330 = vmatpush3.bf16.msra.mxu0 %v352_v2  ;;  %2331 = vmatprep.mubr.msk.bf16.mxu0 %vm253_vm1, %v2495_v3  ;;  %v2499_v7 = vld [vmem:[%s3136_s0 + $0x20] sm:$0xff]   ;;  %v2501_v9 = vld [vmem:[%s3136_s0 + $0x30] sm:$0xff]   ;;  %v2502_v10 = vld [vmem:[%s3136_s0 + $0x38] sm:$0xff]  }
   0x4   :  { %v2503_v11 = vld [vmem:[%s3136_s0 + $0x40] sm:$0xff]   ;;  %v1094_v12 = vld [vmem:[%s3137_s4 + $0x10] sm:$0xff]  ;;  %v2504_v14 = vld [vmem:[%s3136_s0 + $0x48] sm:$0xff]  }
   0x5   :  { %v1092_v13 = vld [vmem:[%s3137_s4] sm:$0xff]  ;;  %1168 = vperm.xlu1 %2494, %v1094_v12   ;;  %v2505_v15 = vld [vmem:[%s3136_s0 + $0x50] sm:$0xff]   ;;  %v1095_v16 = vld [vmem:[%s3137_s4 + $0x18] sm:$0xff] }
   0x6   :  { %2332 = vmatmul.mubr.msk.bf16.vlgmr.msra.gmra.mxu0 %vm253_vm1, %v2496_v4  ;;  %1158 = vperm.xlu0 %2493, %v1092_v13   ;;  %v1093_v17 = vld [vmem:[%s3137_s4 + $0x8] sm:$0xff]  ;;  %v2527_v19 = vld [vmem:[%s3138_s3 + $0x38] sm:$0xff]   ;;  %v2528_v20 = vld [vmem:[%s3138_s3 + $0x30] sm:$0xff]  }
   0x7   :  { %2335 = vmatprep.mubr.msk.bf16.mxu0 %vm253_vm1, %v2497_v5  ;;  %v1097_v18 = vld [vmem:[%s3137_s4 + $0x28] sm:$0xff]  ;;  %v1096_v21 = vld [vmem:[%s3137_s4 + $0x20] sm:$0xff]  ;;  %2395 = vmatprep.subr.bf16.mxu0 %v2527_v19  ;;  %v2506_v22 = vld [vmem:[%s3136_s0 + $0x58] sm:$0xff]  }
   0x8   :  { %2475 = vmatprep.subr.bf16.mxu1 %v2527_v19  ;;  %2396 = vmatpush3.bf16.msra.mxu0 %v2527_v19  ;;  %v2507_v23 = vld [vmem:[%s3136_s0 + $0x60] sm:$0xff]   ;;  %v1099_v24 = vld [vmem:[%s3137_s4 + $0x38] sm:$0xff]  ;;  %v1098_v25 = vld [vmem:[%s3137_s4 + $0x30] sm:$0xff] }
   0x9   :  { %1173 = vperm.xlu1 %2494, %v1095_v16   ;;  %2483 = vmatpush3.bf16.msra.mxu1 %v2527_v19  ;;  %v2529_v26 = vld [vmem:[%s3138_s3 + $0x28] sm:$0xff]   ;;  %v2530_v27 = vld [vmem:[%s3138_s3 + $0x20] sm:$0xff]   ;;  %v2509_v31 = vld [vmem:[%s3136_s0 + $0x70] sm:$0xff]  }
   0xa   :  { %1163 = vperm.xlu0 %2493, %v1093_v17   ;;  %2397 = vmatprep.subr.bf16.mxu0 %v2528_v20  ;;  %v1101_v28 = vld [vmem:[%s3137_s4 + $0x48] sm:$0xff]  ;;  %v1100_v29 = vld [vmem:[%s3137_s4 + $0x40] sm:$0xff]  ;;  %v1103_v32 = vld [vmem:[%s3137_s4 + $0x58] sm:$0xff] }
   0xb   :  { %2476 = vmatprep.subr.bf16.mxu1 %v2528_v20  ;;  %v2508_v30 = vld [vmem:[%s3136_s0 + $0x68] sm:$0xff]   ;;  %v1102_v33 = vld [vmem:[%s3137_s4 + $0x50] sm:$0xff]  ;;  %v2531_v34 = vld [vmem:[%s3138_s3 + $0x18] sm:$0xff]  }
   0xc   :  { %2398 = vmatpush3.bf16.msra.mxu0 %v2528_v20  ;;  %v1105_v35 = vld [vmem:[%s3137_s4 + $0x68] sm:$0xff]  ;;  %v1104_v36 = vld [vmem:[%s3137_s4 + $0x60] sm:$0xff]  ;;  %v2510_v37 = vld [vmem:[%s3136_s0 + $0x78] sm:$0xff]  }
   0xd   :  { %1183 = vperm.xlu1 %2494, %v1097_v18   ;;  %2484 = vmatpush3.bf16.msra.mxu1 %v2528_v20  ;;  %v2511_v38 = vld [vmem:[%s3136_s0 + $0x80] sm:$0xff]   ;;  %v1107_v39 = vld [vmem:[%s3137_s4 + $0x78] sm:$0xff]  ;;  %v1106_v40 = vld [vmem:[%s3137_s4 + $0x70] sm:$0xff] }
   0xe   :  { %2336 = vmatmul.mubr.msk.bf16.gmra.mxu0 %vm253_vm1, %v2498_v6  ;;  %1178 = vperm.xlu0 %2493, %v1096_v21   ;;  %v1109_v41 = vld [vmem:[%s3137_s4 + $0x88] sm:$0xff]  ;;  %v1108_v42 = vld [vmem:[%s3137_s4 + $0x80] sm:$0xff]  ;;  %v2513_v44 = vld [vmem:[%s3136_s0 + $0x90] sm:$0xff]  }
   0xf   :  { %2339 = vmatprep.mubr.msk.bf16.mxu0 %vm253_vm1, %v2499_v7  ;;  %2399 = vmatprep.subr.bf16.mxu0 %v2529_v26  ;;  %v2512_v43 = vld [vmem:[%s3136_s0 + $0x88] sm:$0xff]   ;;  %v1111_v45 = vld [vmem:[%s3137_s4 + $0x98] sm:$0xff]  ;;  %v1110_v46 = vld [vmem:[%s3137_s4 + $0x90] sm:$0xff] }
  0x10   :  { %2477 = vmatprep.subr.bf16.mxu1 %v2529_v26  ;;  %2400 = vmatpush3.bf16.msra.mxu0 %v2529_v26  ;;  %v1113_v47 = vld [vmem:[%s3137_s4 + $0xa8] sm:$0xff]  ;;  %v2532_v48 = vld [vmem:[%s3138_s3 + $0x10] sm:$0xff]   ;;  %v1112_v49 = vld [vmem:[%s3137_s4 + $0xa0] sm:$0xff] }
  0x11   :  { %1193 = vperm.xlu1 %2494, %v1099_v24   ;;  %2485 = vmatpush3.bf16.msra.mxu1 %v2529_v26  ;;  %v2514_v50 = vld [vmem:[%s3136_s0 + $0x98] sm:$0xff]   ;;  %v2533_v51 = vld [vmem:[%s3138_s3 + $0x8] sm:$0xff]   ;;  %v2515_v52 = vld [vmem:[%s3136_s0 + $0xa0] sm:$0xff]  }
  0x12   :  { %1188 = vperm.xlu0 %2493, %v1098_v25   ;;  %2401 = vmatprep.subr.bf16.mxu0 %v2530_v27  ;;  %v1115_v53 = vld [vmem:[%s3137_s4 + $0xb8] sm:$0xff]  ;;  %v1114_v54 = vld [vmem:[%s3137_s4 + $0xb0] sm:$0xff]  ;;  %v2534_v55 = vld [vmem:[%s3138_s3] sm:$0xff]  }
  0x13   :  { %2478 = vmatprep.subr.bf16.mxu1 %v2530_v27  ;;  %v1117_v56 = vld [vmem:[%s3137_s4 + $0xc8] sm:$0xff]  ;;  %v1116_v57 = vld [vmem:[%s3137_s4 + $0xc0] sm:$0xff]  ;;  %v2517_v59 = vld [vmem:[%s3136_s0 + $0xb0] sm:$0xff]  }
  0x14   :  { %2402 = vmatpush3.bf16.msra.mxu0 %v2530_v27  ;;  %v2516_v58 = vld [vmem:[%s3136_s0 + $0xa8] sm:$0xff]   ;;  %v1119_v60 = vld [vmem:[%s3137_s4 + $0xd8] sm:$0xff]  ;;  %v1118_v61 = vld [vmem:[%s3137_s4 + $0xd0] sm:$0xff] }
  0x15   :  { %1203 = vperm.xlu1 %2494, %v1101_v28   ;;  %2486 = vmatpush3.bf16.msra.mxu1 %v2530_v27  ;;  %v1121_v62 = vld [vmem:[%s3137_s4 + $0xe8] sm:$0xff]  ;;  %v1120_v63 = vld [vmem:[%s3137_s4 + $0xe0] sm:$0xff]  ;;  %v2518_v0 = vld [vmem:[%s3136_s0 + $0xb8] sm:$0xff]  }
  0x16   :  { %2340 = vmatmul.mubr.msk.bf16.gmra.mxu0 %vm253_vm1, %v2500_v8  ;;  %1198 = vperm.xlu0 %2493, %v1100_v29   ;;  %v2519_v1 = vld [vmem:[%s3136_s0 + $0xc0] sm:$0xff]   ;;  %v1123_v2 = vld [vmem:[%s3137_s4 + $0xf8] sm:$0xff]  ;;  %v1122_v3 = vld [vmem:[%s3137_s4 + $0xf0] sm:$0xff] }
  0x17   :  { %2343 = vmatprep.mubr.msk.bf16.mxu0 %vm253_vm1, %v2501_v9  ;;  %2403 = vmatprep.subr.bf16.mxu0 %v2531_v34  ;;  %v1125_v4 = vld [vmem:[%s3137_s4 + $0x108] sm:$0xff]  ;;  %v1124_v5 = vld [vmem:[%s3137_s4 + $0x100] sm:$0xff]  ;;  %v2521_v7 = vld [vmem:[%s3136_s0 + $0xd0] sm:$0xff]  }
  0x18   :  { %2479 = vmatprep.subr.bf16.mxu1 %v2531_v34  ;;  %2404 = vmatpush3.bf16.msra.mxu0 %v2531_v34  ;;  %v2520_v6 = vld [vmem:[%s3136_s0 + $0xc8] sm:$0xff]   ;;  %v1127_v8 = vld [vmem:[%s3137_s4 + $0x118] sm:$0xff]  ;;  %v1126_v9 = vld [vmem:[%s3137_s4 + $0x110] sm:$0xff] }
  0x19   :  { %1213 = vperm.xlu1 %2494, %v1103_v32   ;;  %2487 = vmatpush3.bf16.msra.mxu1 %v2531_v34  ;;  %v2522_v12 = vld [vmem:[%s3136_s0 + $0xd8] sm:$0xff]   ;;  %v2523_v13 = vld [vmem:[%s3136_s0 + $0xe0] sm:$0xff]   ;;  %v1133_v16 = vld [vmem:[%s3137_s4 + $0x148] sm:$0xff] }
  0x1a   :  { %1208 = vperm.xlu0 %2493, %v1102_v33   ;;  %2405 = vmatprep.subr.bf16.mxu0 %v2532_v48  ;;  %v1132_v17 = vld [vmem:[%s3137_s4 + $0x140] sm:$0xff]  ;;  %v2524_v18 = vld [vmem:[%s3136_s0 + $0xe8] sm:$0xff]   ;;  %v2525_v19 = vld [vmem:[%s3136_s0 + $0xf0] sm:$0xff]  }
  0x1b   :  { %2480 = vmatprep.subr.bf16.mxu1 %v2532_v48  ;;  %v1135_v20 = vld [vmem:[%s3137_s4 + $0x158] sm:$0xff]  ;;  %v1134_v21 = vld [vmem:[%s3137_s4 + $0x150] sm:$0xff]  ;;  %v1141_v27 = vld [vmem:[%s3137_s4 + $0x188] sm:$0xff] }
  0x1c   :  { %2406 = vmatpush3.bf16.msra.mxu0 %v2532_v48  ;;  %v2526_v24 = vld [vmem:[%s3136_s0 + $0xf8] sm:$0xff]   ;;  %v1138_v26 = vld [vmem:[%s3137_s4 + $0x170] sm:$0xff]  ;;  %v1140_v28 = vld [vmem:[%s3137_s4 + $0x180] sm:$0xff] }
  0x1d   :  { %1223 = vperm.xlu1 %2494, %v1105_v35   ;;  %2488 = vmatpush3.bf16.msra.mxu1 %v2532_v48  ;;  %v1139_v25 = vld [vmem:[%s3137_s4 + $0x178] sm:$0xff]  ;;  %v1144_v32 = vld [vmem:[%s3137_s4 + $0x1a0] sm:$0xff]  ;;  %v1146_v34 = vld [vmem:[%s3137_s4 + $0x1b0] sm:$0xff] }
  0x1e   :  { %2344 = vmatmul.mubr.msk.bf16.gmra.mxu0 %vm253_vm1, %v2502_v10  ;;  %1218 = vperm.xlu0 %2493, %v1104_v36   ;;  %v1129_v10 = vld [vmem:[%s3137_s4 + $0x128] sm:$0xff]  ;;  %v1143_v29 = vld [vmem:[%s3137_s4 + $0x198] sm:$0xff]  ;;  %v1148_v36 = vld [vmem:[%s3137_s4 + $0x1c0] sm:$0xff] }
  0x1f   :  { %2347 = vmatprep.mubr.msk.bf16.mxu0 %vm253_vm1, %v2503_v11  ;;  %2407 = vmatprep.subr.bf16.mxu0 %v2533_v51  ;;  %v1128_v11 = vld [vmem:[%s3137_s4 + $0x120] sm:$0xff]  ;;  %v1147_v33 = vld [vmem:[%s3137_s4 + $0x1b8] sm:$0xff]  ;;  %v1149_v35 = vld [vmem:[%s3137_s4 + $0x1c8] sm:$0xff] }
  0x20   :  { %2481 = vmatprep.subr.bf16.mxu1 %v2533_v51  ;;  %2408 = vmatpush3.bf16.msra.mxu0 %v2533_v51 }
  0x21   :  { %1233 = vperm.xlu1 %2494, %v1107_v39   ;;  %2489 = vmatpush3.bf16.msra.mxu1 %v2533_v51  ;;  %v1153_v39 = vld [vmem:[%s3137_s4 + $0x1e8] sm:$0xff] }
  0x22   :  { %1228 = vperm.xlu0 %2493, %v1106_v40   ;;  %2409 = vmatprep.subr.bf16.mxu0 %v2534_v55  ;;  %v1152_v40 = vld [vmem:[%s3137_s4 + $0x1e0] sm:$0xff] }
  0x23   :  { %2482 = vmatprep.subr.bf16.mxu1 %v2534_v55 }
  0x24   :  { %2410 = vmatpush3.bf16.msra.mxu0 %v2534_v55 }
  0x25   :  { %1243 = vperm.xlu1 %2494, %v1109_v41   ;;  %2490 = vmatpush3.bf16.msra.mxu1 %v2534_v55  ;;  %v1155_v41 = vld [vmem:[%s3137_s4 + $0x1f8] sm:$0xff] }
  0x26   :  { %2348 = vmatmul.mubr.msk.bf16.gmra.mxu0 %vm253_vm1, %v2504_v14  ;;  %1238 = vperm.xlu0 %2493, %v1108_v42   ;;  %v1131_v14 = vld [vmem:[%s3137_s4 + $0x138] sm:$0xff]  ;;  %v1154_v42 = vld [vmem:[%s3137_s4 + $0x1f0] sm:$0xff] }
  0x27   :  { %2351 = vmatprep.mubr.msk.bf16.mxu0 %vm253_vm1, %v2505_v15  ;;  %v1130_v15 = vld [vmem:[%s3137_s4 + $0x130] sm:$0xff] }
  0x29   :  { %1253 = vperm.xlu1 %2494, %v1111_v45   ;;  %v2916_v45 = vld [vmem:[%s3139_s2] ss:$0 sm:$0xff] }
  0x2a   :  { %1248 = vperm.xlu0 %2493, %v1110_v46  }
  0x2d   :  { %1263 = vperm.xlu1 %2494, %v1113_v47  }
  0x2e   :  { %2352 = vmatmul.mubr.msk.bf16.gmra.mxu0 %vm253_vm1, %v2506_v22  ;;  %1258 = vperm.xlu0 %2493, %v1112_v49   ;;  %v1137_v22 = vld [vmem:[%s3137_s4 + $0x168] sm:$0xff] }
  0x2f   :  { %2355 = vmatprep.mubr.msk.bf16.mxu0 %vm253_vm1, %v2507_v23  ;;  %v1136_v23 = vld [vmem:[%s3137_s4 + $0x160] sm:$0xff] }
  0x31   :  { %1273 = vperm.xlu1 %2494, %v1115_v53  }
  0x32   :  { %1268 = vperm.xlu0 %2493, %v1114_v54  }
  0x35   :  { %1283 = vperm.xlu1 %2494, %v1117_v56  }
  0x36   :  { %2356 = vmatmul.mubr.msk.bf16.gmra.mxu0 %vm253_vm1, %v2508_v30  ;;  %1278 = vperm.xlu0 %2493, %v1116_v57   ;;  %v1142_v30 = vld [vmem:[%s3137_s4 + $0x190] sm:$0xff] }
  0x37   :  { %2359 = vmatprep.mubr.msk.bf16.mxu0 %vm253_vm1, %v2509_v31  ;;  %v1145_v31 = vld [vmem:[%s3137_s4 + $0x1a8] sm:$0xff] }
  0x39   :  { %1293 = vperm.xlu1 %2494, %v1119_v60  }
  0x3a   :  { %1288 = vperm.xlu0 %2493, %v1118_v61  }
  0x3d   :  { %1303 = vperm.xlu1 %2494, %v1121_v62  }
  0x3e   :  { %2360 = vmatmul.mubr.msk.bf16.gmra.mxu0 %vm253_vm1, %v2510_v37  ;;  %1298 = vperm.xlu0 %2493, %v1120_v63   ;;  %v1151_v37 = vld [vmem:[%s3137_s4 + $0x1d8] sm:$0xff] }
  0x3f   :  { %2363 = vmatprep.mubr.msk.bf16.mxu0 %vm253_vm1, %v2511_v38  ;;  %v1150_v38 = vld [vmem:[%s3137_s4 + $0x1d0] sm:$0xff] }
  0x41   :  { %1313 = vperm.xlu1 %2494, %v1123_v2  }
  0x42   :  { %1308 = vperm.xlu0 %2493, %v1122_v3  }
  0x45   :  { %1323 = vperm.xlu1 %2494, %v1125_v4  }
  0x46   :  { %2364 = vmatmul.mubr.msk.bf16.gmra.mxu0 %vm253_vm1, %v2512_v43  ;;  %1318 = vperm.xlu0 %2493, %v1124_v5  }
  0x47   :  { %2367 = vmatprep.mubr.msk.bf16.mxu0 %vm253_vm1, %v2513_v44 }
  0x49   :  { %1333 = vperm.xlu1 %2494, %v1127_v8  }
  0x4a   :  { %1328 = vperm.xlu0 %2493, %v1126_v9  }
  0x4d   :  { %1343 = vperm.xlu1 %2494, %v1129_v10  }
  0x4e   :  { %2368 = vmatmul.mubr.msk.bf16.gmra.mxu0 %vm253_vm1, %v2514_v50  ;;  %1338 = vperm.xlu0 %2493, %v1128_v11  }
  0x4f   :  { %2371 = vmatprep.mubr.msk.bf16.mxu0 %vm253_vm1, %v2515_v52 }
  0x51   :  { %1353 = vperm.xlu1 %2494, %v1131_v14  }
  0x52   :  { %1348 = vperm.xlu0 %2493, %v1130_v15  }
  0x55   :  { %1363 = vperm.xlu1 %2494, %v1133_v16  }
  0x56   :  { %2372 = vmatmul.mubr.msk.bf16.gmra.mxu0 %vm253_vm1, %v2516_v58  ;;  %1358 = vperm.xlu0 %2493, %v1132_v17  }
  0x57   :  { %2375 = vmatprep.mubr.msk.bf16.mxu0 %vm253_vm1, %v2517_v59 }
  0x59   :  { %1373 = vperm.xlu1 %2494, %v1135_v20  }
  0x5a   :  { %1368 = vperm.xlu0 %2493, %v1134_v21  }
  0x5d   :  { %1383 = vperm.xlu1 %2494, %v1137_v22  }
  0x5e   :  { %2376 = vmatmul.mubr.msk.bf16.gmra.mxu0 %vm253_vm1, %v2518_v0  ;;  %1378 = vperm.xlu0 %2493, %v1136_v23  }
  0x5f   :  { %2379 = vmatprep.mubr.msk.bf16.mxu0 %vm253_vm1, %v2519_v1 }
  0x61   :  { %1393 = vperm.xlu1 %2494, %v1139_v25  }
  0x62   :  { %1388 = vperm.xlu0 %2493, %v1138_v26  }
  0x65   :  { %1403 = vperm.xlu1 %2494, %v1141_v27  }
  0x66   :  { %2380 = vmatmul.mubr.msk.bf16.gmra.mxu0 %vm253_vm1, %v2520_v6  ;;  %1398 = vperm.xlu0 %2493, %v1140_v28  }
  0x67   :  { %2383 = vmatprep.mubr.msk.bf16.mxu0 %vm253_vm1, %v2521_v7 }
  0x69   :  { %1413 = vperm.xlu1 %2494, %v1143_v29  }
  0x6a   :  { %1408 = vperm.xlu0 %2493, %v1142_v30  }
  0x6d   :  { %1423 = vperm.xlu1 %2494, %v1145_v31  }
  0x6e   :  { %2384 = vmatmul.mubr.msk.bf16.gmra.mxu0 %vm253_vm1, %v2522_v12  ;;  %1418 = vperm.xlu0 %2493, %v1144_v32  }
  0x6f   :  { %2387 = vmatprep.mubr.msk.bf16.mxu0 %vm253_vm1, %v2523_v13 }
  0x71   :  { %1433 = vperm.xlu1 %2494, %v1147_v33  }
  0x72   :  { %1428 = vperm.xlu0 %2493, %v1146_v34  }
  0x75   :  { %1443 = vperm.xlu1 %2494, %v1149_v35  }
  0x76   :  { %2388 = vmatmul.mubr.msk.bf16.gmra.mxu0 %vm253_vm1, %v2524_v18  ;;  %1438 = vperm.xlu0 %2493, %v1148_v36  }
  0x77   :  { %2391 = vmatprep.mubr.msk.bf16.mxu0 %vm253_vm1, %v2525_v19 }
  0x79   :  { %1453 = vperm.xlu1 %2494, %v1151_v37  }
  0x7a   :  { %1448 = vperm.xlu0 %2493, %v1150_v38  }
  0x7d   :  { %1463 = vperm.xlu1 %2494, %v1153_v39  }
  0x7e   :  { %2392 = vmatmul.mubr.msk.bf16.gmra.mxu0 %vm253_vm1, %v2526_v24  ;;  %1458 = vperm.xlu0 %2493, %v1152_v40  }
  0x81   :  { %1473 = vperm.xlu1 %2494, %v1155_v41  }
  0x82   :  { %1468 = vperm.xlu0 %2493, %v1154_v42  }
  0xc6   :  { %v2333_v43 = vpop.f32.mrf.mxu0 }
  0xc7   :  { %v397_v49 = vadd.f32 %v2333_v43, %v2916_v45 }
  0xc8   :  { %v388_v44 = vpop.f32.mrf.mxu0 }
  0xc9   :  { %v389_v47 = vadd.f32 %v2916_v45, %v388_v44  ;;  %v645_v56 = vmax.f32 %v397_v49, 0.0 }
  0xca   :  { %v2334_v46 = vpop.f32.mrf.mxu0 }
  0xcb   :  { %v400_v48 = vadd.f32 %v2334_v46, %v2916_v45  ;;  %v643_v54 = vmax.f32 %v389_v47, 0.0 }
  0xcc   :  { %v391_v50 = vpop.f32.mrf.mxu0 }
  0xcd   :  { %v392_v51 = vadd.f32 %v2916_v45, %v391_v50  ;;  %v646_v52 = vmax.f32 %v400_v48, 0.0 }
  0xce   :  { %v2337_v53 = vpop.f32.mrf.mxu0 }
  0xcf   :  { %v644_v55 = vmax.f32 %v392_v51, 0.0  ;;  %v708_v59 = vpack.c.bf16 %v646_v52, %v645_v56  ;;  %v413_v63 = vadd.f32 %v2337_v53, %v2916_v45 }
  0xd0   :  { %v404_v57 = vpop.f32.mrf.mxu0 }
  0xd1   :  { %v707_v58 = vpack.c.bf16 %v644_v55, %v643_v54  ;;  %v405_v61 = vadd.f32 %v2916_v45, %v404_v57  ;;  %v649_v6 = vmax.f32 %v413_v63, 0.0 }
  0xd2   :  { %v2338_v60 = vpop.f32.mrf.mxu0 }
  0xd3   :  { %v416_v62 = vadd.f32 %v2338_v60, %v2916_v45  ;;  %2411 = vmatprep.mubr.bf16.mxu0 %v707_v58  ;;  %v647_v4 = vmax.f32 %v405_v61, 0.0 }
  0xd4   :  { %v407_v0 = vpop.f32.mrf.mxu0  ;;  %2412 = vmatmul.mubr.bf16.vlgmr.msra.gmra.mxu0 %v708_v59 }
  0xd5   :  { %v408_v1 = vadd.f32 %v2916_v45, %v407_v0  ;;  %v650_v2 = vmax.f32 %v416_v62, 0.0 }
  0xd6   :  { %v2341_v3 = vpop.f32.mrf.mxu0 }
  0xd7   :  { %v648_v5 = vmax.f32 %v408_v1, 0.0  ;;  %v710_v9 = vpack.c.bf16 %v650_v2, %v649_v6  ;;  %v429_v13 = vadd.f32 %v2341_v3, %v2916_v45 }
  0xd8   :  { %v420_v7 = vpop.f32.mrf.mxu0 }
  0xd9   :  { %v709_v8 = vpack.c.bf16 %v648_v5, %v647_v4  ;;  %v421_v11 = vadd.f32 %v2916_v45, %v420_v7  ;;  %v653_v20 = vmax.f32 %v429_v13, 0.0 }
  0xda   :  { %v2342_v10 = vpop.f32.mrf.mxu0 }
  0xdb   :  { %v432_v12 = vadd.f32 %v2342_v10, %v2916_v45  ;;  %2415 = vmatprep.mubr.bf16.mxu1 %v709_v8  ;;  %v651_v18 = vmax.f32 %v421_v11, 0.0 }
  0xdc   :  { %v423_v14 = vpop.f32.mrf.mxu0  ;;  %2416 = vmatmul.mubr.bf16.vlgmr.msra.gmra.mxu1 %v710_v9 }
  0xdd   :  { %v424_v15 = vadd.f32 %v2916_v45, %v423_v14  ;;  %v654_v16 = vmax.f32 %v432_v12, 0.0 }
  0xde   :  { %v2345_v17 = vpop.f32.mrf.mxu0 }
  0xdf   :  { %v652_v19 = vmax.f32 %v424_v15, 0.0  ;;  %v712_v23 = vpack.c.bf16 %v654_v16, %v653_v20  ;;  %v445_v27 = vadd.f32 %v2345_v17, %v2916_v45 }
  0xe0   :  { %v436_v21 = vpop.f32.mrf.mxu0 }
  0xe1   :  { %v711_v22 = vpack.c.bf16 %v652_v19, %v651_v18  ;;  %v437_v25 = vadd.f32 %v2916_v45, %v436_v21  ;;  %v657_v34 = vmax.f32 %v445_v27, 0.0 }
  0xe2   :  { %v2346_v24 = vpop.f32.mrf.mxu0 }
  0xe3   :  { %v448_v26 = vadd.f32 %v2346_v24, %v2916_v45  ;;  %2419 = vmatprep.mubr.bf16.mxu1 %v711_v22  ;;  %v655_v32 = vmax.f32 %v437_v25, 0.0 }
  0xe4   :  { %v439_v28 = vpop.f32.mrf.mxu0  ;;  %2420 = vmatmul.mubr.bf16.gmra.mxu1 %v712_v23 }
  0xe5   :  { %v440_v29 = vadd.f32 %v2916_v45, %v439_v28  ;;  %v658_v30 = vmax.f32 %v448_v26, 0.0 }
  0xe6   :  { %v2349_v31 = vpop.f32.mrf.mxu0 }
  0xe7   :  { %v656_v33 = vmax.f32 %v440_v29, 0.0  ;;  %v714_v37 = vpack.c.bf16 %v658_v30, %v657_v34  ;;  %v461_v41 = vadd.f32 %v2349_v31, %v2916_v45 }
  0xe8   :  { %v452_v35 = vpop.f32.mrf.mxu0 }
  0xe9   :  { %v713_v36 = vpack.c.bf16 %v656_v33, %v655_v32  ;;  %v453_v39 = vadd.f32 %v2916_v45, %v452_v35  ;;  %v661_v49 = vmax.f32 %v461_v41, 0.0 }
  0xea   :  { %v2350_v38 = vpop.f32.mrf.mxu0 }
  0xeb   :  { %v464_v40 = vadd.f32 %v2350_v38, %v2916_v45  ;;  %2423 = vmatprep.mubr.bf16.mxu1 %v713_v36  ;;  %v659_v47 = vmax.f32 %v453_v39, 0.0 }
  0xec   :  { %v455_v42 = vpop.f32.mrf.mxu0  ;;  %2424 = vmatmul.mubr.bf16.gmra.mxu1 %v714_v37 }
  0xed   :  { %v456_v43 = vadd.f32 %v2916_v45, %v455_v42  ;;  %v662_v44 = vmax.f32 %v464_v40, 0.0 }
  0xee   :  { %v2353_v46 = vpop.f32.mrf.mxu0 }
  0xef   :  { %v660_v48 = vmax.f32 %v456_v43, 0.0  ;;  %v716_v52 = vpack.c.bf16 %v662_v44, %v661_v49  ;;  %v477_v56 = vadd.f32 %v2353_v46, %v2916_v45 }
  0xf0   :  { %v468_v50 = vpop.f32.mrf.mxu0 }
  0xf1   :  { %v715_v51 = vpack.c.bf16 %v660_v48, %v659_v47  ;;  %v469_v54 = vadd.f32 %v2916_v45, %v468_v50  ;;  %v665_v63 = vmax.f32 %v477_v56, 0.0 }
  0xf2   :  { %v2354_v53 = vpop.f32.mrf.mxu0 }
  0xf3   :  { %v480_v55 = vadd.f32 %v2354_v53, %v2916_v45  ;;  %2427 = vmatprep.mubr.bf16.mxu1 %v715_v51  ;;  %v663_v61 = vmax.f32 %v469_v54, 0.0 }
  0xf4   :  { %v471_v57 = vpop.f32.mrf.mxu0  ;;  %2428 = vmatmul.mubr.bf16.gmra.mxu1 %v716_v52 }
  0xf5   :  { %v472_v58 = vadd.f32 %v2916_v45, %v471_v57  ;;  %v666_v59 = vmax.f32 %v480_v55, 0.0 }
  0xf6   :  { %v2357_v60 = vpop.f32.mrf.mxu0 }
  0xf7   :  { %v664_v62 = vmax.f32 %v472_v58, 0.0  ;;  %v718_v2 = vpack.c.bf16 %v666_v59, %v665_v63  ;;  %v493_v6 = vadd.f32 %v2357_v60, %v2916_v45 }
  0xf8   :  { %v484_v0 = vpop.f32.mrf.mxu0 }
  0xf9   :  { %v717_v1 = vpack.c.bf16 %v664_v62, %v663_v61  ;;  %v485_v4 = vadd.f32 %v2916_v45, %v484_v0  ;;  %v669_v13 = vmax.f32 %v493_v6, 0.0 }
  0xfa   :  { %v2358_v3 = vpop.f32.mrf.mxu0 }
  0xfb   :  { %v496_v5 = vadd.f32 %v2358_v3, %v2916_v45  ;;  %2431 = vmatprep.mubr.bf16.mxu1 %v717_v1  ;;  %v667_v11 = vmax.f32 %v485_v4, 0.0 }
  0xfc   :  { %v487_v7 = vpop.f32.mrf.mxu0  ;;  %2432 = vmatmul.mubr.bf16.gmra.mxu1 %v718_v2 }
  0xfd   :  { %v488_v8 = vadd.f32 %v2916_v45, %v487_v7  ;;  %v670_v9 = vmax.f32 %v496_v5, 0.0 }
  0xfe   :  { %v2361_v10 = vpop.f32.mrf.mxu0 }
  0xff   :  { %v668_v12 = vmax.f32 %v488_v8, 0.0  ;;  %v720_v16 = vpack.c.bf16 %v670_v9, %v669_v13  ;;  %v509_v20 = vadd.f32 %v2361_v10, %v2916_v45 }
 0x100   :  { %v500_v14 = vpop.f32.mrf.mxu0 }
 0x101   :  { %v719_v15 = vpack.c.bf16 %v668_v12, %v667_v11  ;;  %v501_v18 = vadd.f32 %v2916_v45, %v500_v14  ;;  %v673_v27 = vmax.f32 %v509_v20, 0.0 }
 0x102   :  { %v2362_v17 = vpop.f32.mrf.mxu0 }
 0x103   :  { %v512_v19 = vadd.f32 %v2362_v17, %v2916_v45  ;;  %2435 = vmatprep.mubr.bf16.mxu1 %v719_v15  ;;  %v671_v25 = vmax.f32 %v501_v18, 0.0 }
 0x104   :  { %v503_v21 = vpop.f32.mrf.mxu0  ;;  %2436 = vmatmul.mubr.bf16.gmra.mxu1 %v720_v16 }
 0x105   :  { %v504_v22 = vadd.f32 %v2916_v45, %v503_v21  ;;  %v674_v23 = vmax.f32 %v512_v19, 0.0 }
 0x106   :  { %v2365_v24 = vpop.f32.mrf.mxu0 }
 0x107   :  { %v672_v26 = vmax.f32 %v504_v22, 0.0  ;;  %v722_v30 = vpack.c.bf16 %v674_v23, %v673_v27  ;;  %v525_v34 = vadd.f32 %v2365_v24, %v2916_v45 }
 0x108   :  { %v516_v28 = vpop.f32.mrf.mxu0 }
 0x109   :  { %v721_v29 = vpack.c.bf16 %v672_v26, %v671_v25  ;;  %v517_v32 = vadd.f32 %v2916_v45, %v516_v28  ;;  %v677_v41 = vmax.f32 %v525_v34, 0.0 }
 0x10a   :  { %v2366_v31 = vpop.f32.mrf.mxu0 }
 0x10b   :  { %v528_v33 = vadd.f32 %v2366_v31, %v2916_v45  ;;  %2439 = vmatprep.mubr.bf16.mxu1 %v721_v29  ;;  %v675_v39 = vmax.f32 %v517_v32, 0.0 }
 0x10c   :  { %v519_v35 = vpop.f32.mrf.mxu0  ;;  %2440 = vmatmul.mubr.bf16.gmra.mxu1 %v722_v30 }
 0x10d   :  { %v520_v36 = vadd.f32 %v2916_v45, %v519_v35  ;;  %v678_v37 = vmax.f32 %v528_v33, 0.0 }
 0x10e   :  { %v2369_v38 = vpop.f32.mrf.mxu0 }
 0x10f   :  { %v676_v40 = vmax.f32 %v520_v36, 0.0  ;;  %v724_v44 = vpack.c.bf16 %v678_v37, %v677_v41  ;;  %v541_v49 = vadd.f32 %v2369_v38, %v2916_v45 }
 0x110   :  { %v532_v42 = vpop.f32.mrf.mxu0 }
 0x111   :  { %v723_v43 = vpack.c.bf16 %v676_v40, %v675_v39  ;;  %v533_v47 = vadd.f32 %v2916_v45, %v532_v42  ;;  %v681_v56 = vmax.f32 %v541_v49, 0.0 }
 0x112   :  { %v2370_v46 = vpop.f32.mrf.mxu0 }
 0x113   :  { %v544_v48 = vadd.f32 %v2370_v46, %v2916_v45  ;;  %2443 = vmatprep.mubr.bf16.mxu1 %v723_v43  ;;  %v679_v54 = vmax.f32 %v533_v47, 0.0 }
 0x114   :  { %v535_v50 = vpop.f32.mrf.mxu0  ;;  %2444 = vmatmul.mubr.bf16.gmra.mxu1 %v724_v44 }
 0x115   :  { %v536_v51 = vadd.f32 %v2916_v45, %v535_v50  ;;  %v682_v52 = vmax.f32 %v544_v48, 0.0 }
 0x116   :  { %v2373_v53 = vpop.f32.mrf.mxu0 }
 0x117   :  { %v680_v55 = vmax.f32 %v536_v51, 0.0  ;;  %v726_v59 = vpack.c.bf16 %v682_v52, %v681_v56  ;;  %v557_v63 = vadd.f32 %v2373_v53, %v2916_v45 }
 0x118   :  { %v548_v57 = vpop.f32.mrf.mxu0 }
 0x119   :  { %v725_v58 = vpack.c.bf16 %v680_v55, %v679_v54  ;;  %v549_v61 = vadd.f32 %v2916_v45, %v548_v57  ;;  %v685_v6 = vmax.f32 %v557_v63, 0.0 }
 0x11a   :  { %v2374_v60 = vpop.f32.mrf.mxu0 }
 0x11b   :  { %v560_v62 = vadd.f32 %v2374_v60, %v2916_v45  ;;  %2447 = vmatprep.mubr.bf16.mxu1 %v725_v58  ;;  %v683_v4 = vmax.f32 %v549_v61, 0.0 }
 0x11c   :  { %v551_v0 = vpop.f32.mrf.mxu0  ;;  %2448 = vmatmul.mubr.bf16.gmra.mxu1 %v726_v59 }
 0x11d   :  { %v552_v1 = vadd.f32 %v2916_v45, %v551_v0  ;;  %v686_v2 = vmax.f32 %v560_v62, 0.0 }
 0x11e   :  { %v2377_v3 = vpop.f32.mrf.mxu0 }
 0x11f   :  { %v684_v5 = vmax.f32 %v552_v1, 0.0  ;;  %v728_v9 = vpack.c.bf16 %v686_v2, %v685_v6  ;;  %v573_v13 = vadd.f32 %v2377_v3, %v2916_v45 }
 0x120   :  { %v564_v7 = vpop.f32.mrf.mxu0 }
 0x121   :  { %v727_v8 = vpack.c.bf16 %v684_v5, %v683_v4  ;;  %v565_v11 = vadd.f32 %v2916_v45, %v564_v7  ;;  %v689_v20 = vmax.f32 %v573_v13, 0.0 }
 0x122   :  { %v2378_v10 = vpop.f32.mrf.mxu0 }
 0x123   :  { %v576_v12 = vadd.f32 %v2378_v10, %v2916_v45  ;;  %2451 = vmatprep.mubr.bf16.mxu1 %v727_v8  ;;  %v687_v18 = vmax.f32 %v565_v11, 0.0 }
 0x124   :  { %v567_v14 = vpop.f32.mrf.mxu0  ;;  %2452 = vmatmul.mubr.bf16.gmra.mxu1 %v728_v9 }
 0x125   :  { %v568_v15 = vadd.f32 %v2916_v45, %v567_v14  ;;  %v690_v16 = vmax.f32 %v576_v12, 0.0 }
 0x126   :  { %v2381_v17 = vpop.f32.mrf.mxu0 }
 0x127   :  { %v688_v19 = vmax.f32 %v568_v15, 0.0  ;;  %v730_v23 = vpack.c.bf16 %v690_v16, %v689_v20  ;;  %v589_v27 = vadd.f32 %v2381_v17, %v2916_v45  ;;  %v1169_v15 = vpop.permute.xlu1 %1168  ;;  %v1159_v16 = vpop.permute.xlu0 %1158 }
 0x128   :  { %v580_v21 = vpop.f32.mrf.mxu0 }
 0x129   :  { %v729_v22 = vpack.c.bf16 %v688_v19, %v687_v18  ;;  %v581_v25 = vadd.f32 %v2916_v45, %v580_v21  ;;  %v693_v34 = vmax.f32 %v589_v27, 0.0 }
 0x12a   :  { %v2382_v24 = vpop.f32.mrf.mxu0 }
 0x12b   :  { %v592_v26 = vadd.f32 %v2382_v24, %v2916_v45  ;;  %2455 = vmatprep.mubr.bf16.mxu1 %v729_v22  ;;  %v691_v32 = vmax.f32 %v581_v25, 0.0  ;;  %v1174_v17 = vpop.permute.xlu1 %1173  ;;  %v1164_v18 = vpop.permute.xlu0 %1163 }
 0x12c   :  { %v583_v28 = vpop.f32.mrf.mxu0  ;;  %2456 = vmatmul.mubr.bf16.gmra.mxu1 %v730_v23 }
 0x12d   :  { %v584_v29 = vadd.f32 %v2916_v45, %v583_v28  ;;  %v694_v30 = vmax.f32 %v592_v26, 0.0 }
 0x12e   :  { %v2385_v31 = vpop.f32.mrf.mxu0 }
 0x12f   :  { %v692_v33 = vmax.f32 %v584_v29, 0.0  ;;  %v732_v37 = vpack.c.bf16 %v694_v30, %v693_v34  ;;  %v605_v41 = vadd.f32 %v2385_v31, %v2916_v45  ;;  %v1184_v19 = vpop.permute.xlu1 %1183  ;;  %v1179_v20 = vpop.permute.xlu0 %1178 }
 0x130   :  { %v596_v35 = vpop.f32.mrf.mxu0 }
 0x131   :  { %v731_v36 = vpack.c.bf16 %v692_v33, %v691_v32  ;;  %v597_v39 = vadd.f32 %v2916_v45, %v596_v35  ;;  %v697_v49 = vmax.f32 %v605_v41, 0.0 }
 0x132   :  { %v2386_v38 = vpop.f32.mrf.mxu0 }
 0x133   :  { %v608_v40 = vadd.f32 %v2386_v38, %v2916_v45  ;;  %2459 = vmatprep.mubr.bf16.mxu1 %v731_v36  ;;  %v695_v47 = vmax.f32 %v597_v39, 0.0  ;;  %v1194_v21 = vpop.permute.xlu1 %1193  ;;  %v1189_v22 = vpop.permute.xlu0 %1188 }
 0x134   :  { %v599_v42 = vpop.f32.mrf.mxu0  ;;  %2460 = vmatmul.mubr.bf16.gmra.mxu1 %v732_v37 }
 0x135   :  { %v600_v43 = vadd.f32 %v2916_v45, %v599_v42  ;;  %v698_v44 = vmax.f32 %v608_v40, 0.0 }
 0x136   :  { %v2389_v46 = vpop.f32.mrf.mxu0 }
 0x137   :  { %v696_v48 = vmax.f32 %v600_v43, 0.0  ;;  %v734_v52 = vpack.c.bf16 %v698_v44, %v697_v49  ;;  %v621_v56 = vadd.f32 %v2389_v46, %v2916_v45  ;;  %v1204_v23 = vpop.permute.xlu1 %1203  ;;  %v1199_v24 = vpop.permute.xlu0 %1198 }
 0x138   :  { %v612_v50 = vpop.f32.mrf.mxu0 }
 0x139   :  { %v733_v51 = vpack.c.bf16 %v696_v48, %v695_v47  ;;  %v613_v54 = vadd.f32 %v2916_v45, %v612_v50  ;;  %v701_v63 = vmax.f32 %v621_v56, 0.0 }
 0x13a   :  { %v2390_v53 = vpop.f32.mrf.mxu0 }
 0x13b   :  { %v624_v55 = vadd.f32 %v2390_v53, %v2916_v45  ;;  %2463 = vmatprep.mubr.bf16.mxu1 %v733_v51  ;;  %v699_v61 = vmax.f32 %v613_v54, 0.0  ;;  %v1214_v25 = vpop.permute.xlu1 %1213 }
 0x13c   :  { %v615_v57 = vpop.f32.mrf.mxu0  ;;  %2464 = vmatmul.mubr.bf16.gmra.mxu1 %v734_v52 }
 0x13d   :  { %v616_v58 = vadd.f32 %v2916_v45, %v615_v57  ;;  %v702_v59 = vmax.f32 %v624_v55, 0.0 }
 0x13e   :  { %v2393_v60 = vpop.f32.mrf.mxu0 }
 0x13f   :  { %v700_v62 = vmax.f32 %v616_v58, 0.0  ;;  %v736_v2 = vpack.c.bf16 %v702_v59, %v701_v63  ;;  %v637_v6 = vadd.f32 %v2393_v60, %v2916_v45  ;;  %v2982_v26 = vpop.permute.xlu1 %1223 }
 0x140   :  { %v628_v0 = vpop.f32.mrf.mxu0 }
 0x141   :  { %v735_v1 = vpack.c.bf16 %v700_v62, %v699_v61  ;;  %v629_v4 = vadd.f32 %v2916_v45, %v628_v0  ;;  %v705_v12 = vmax.f32 %v637_v6, 0.0 }
 0x142   :  { %v2394_v3 = vpop.f32.mrf.mxu0 }
 0x143   :  { %v640_v5 = vadd.f32 %v2394_v3, %v2916_v45  ;;  %2467 = vmatprep.mubr.bf16.mxu1 %v735_v1  ;;  %v703_v10 = vmax.f32 %v629_v4, 0.0  ;;  %v1234_v28 = vpop.permute.xlu1 %1233 }
 0x144   :  { %v631_v7 = vpop.f32.mrf.mxu0  ;;  %2468 = vmatmul.mubr.bf16.gmra.mxu1 %v736_v2 }
 0x145   :  { %v632_v8 = vadd.f32 %v2916_v45, %v631_v7  ;;  %v706_v9 = vmax.f32 %v640_v5, 0.0  ;;  %v1209_v45 = vpop.permute.xlu0 %1208 }
 0x147   :  { %v704_v11 = vmax.f32 %v632_v8, 0.0  ;;  %v738_v14 = vpack.c.bf16 %v706_v9, %v705_v12  ;;  %v2984_v30 = vpop.permute.xlu1 %1243 }
 0x149   :  { %v737_v13 = vpack.c.bf16 %v704_v11, %v703_v10  ;;  %v1219_v27 = vpop.permute.xlu0 %1218 }
 0x14b   :  { %2471 = vmatprep.mubr.bf16.mxu1 %v737_v13  ;;  %v2988_v32 = vpop.permute.xlu1 %1253 }
 0x14c   :  { %2472 = vmatmul.mubr.bf16.gmra.mxu1 %v738_v14 }
 0x14d   :  { %v1229_v29 = vpop.permute.xlu0 %1228 }
 0x14f   :  { %v2992_v34 = vpop.permute.xlu1 %1263 }
 0x151   :  { %v2986_v31 = vpop.permute.xlu0 %1238 }
 0x153   :  { %v2996_v38 = vpop.permute.xlu1 %1273 }
 0x155   :  { %v2990_v33 = vpop.permute.xlu0 %1248 }
 0x157   :  { %v3000_v49 = vpop.permute.xlu1 %1283 }
 0x159   :  { %v2994_v35 = vpop.permute.xlu0 %1258 }
 0x15b   :  { %v3010_v57 = vpop.permute.xlu1 %1293 }
 0x15d   :  { %v2998_v39 = vpop.permute.xlu0 %1268 }
 0x15f   :  { %v3020_v2 = vpop.permute.xlu1 %1303 }
 0x161   :  { %v3005_v51 = vpop.permute.xlu0 %1278 }
 0x163   :  { %v3027_v13 = vpop.permute.xlu1 %1313 }
 0x165   :  { %v3012_v61 = vpop.permute.xlu0 %1288 }
 0x169   :  { %v3022_v5 = vpop.permute.xlu0 %1298 }
 0x16d   :  { %v1309_v14 = vpop.permute.xlu0 %1308 }
 0x194   :  { %v2413_v36 = vpop.f32.mrf.mxu0 }
 0x195   :  { %v1478_v41 = vmul.f32 %v2413_v36, %v1169_v15 }
 0x196   :  { %v837_v37 = vpop.f32.mrf.mxu0 }
 0x197   :  { %v1476_v44 = vmul.f32 %v1159_v16, %v837_v37 }
 0x198   :  { %v2414_v40 = vpop.f32.mrf.mxu0 }
 0x199   :  { %v1479_v42 = vmul.f32 %v2414_v40, %v1174_v17 }
 0x19a   :  { %v840_v43 = vpop.f32.mrf.mxu0 }
 0x19b   :  { %v2073_v46 = vpack.c.bf16 %v1479_v42, %v1478_v41  ;;  %v1477_v47 = vmul.f32 %v1164_v18, %v840_v43 }
 0x19c   :  { %v2417_v48 = vpop.f32.mrf.mxu1 }
 0x19d   :  { %2225 = vst [vmem:[%s3140_s5 + $0x8] sm:$0xff] %v2073_v46   ;;  %v2068_v50 = vpack.c.bf16 %v1477_v47, %v1476_v44  ;;  %v1482_v54 = vmul.f32 %v2417_v48, %v1189_v22 }
 0x19e   :  { %v853_v52 = vpop.f32.mrf.mxu1 }
 0x19f   :  { %2069 = vst [vmem:[%s3140_s5] sm:$0xff] %v2068_v50   ;;  %v1480_v58 = vmul.f32 %v1179_v20, %v853_v52 }
 0x1a0   :  { %v2418_v53 = vpop.f32.mrf.mxu1 }
 0x1a1   :  { %v1483_v55 = vmul.f32 %v2418_v53, %v1194_v21 }
 0x1a2   :  { %v856_v56 = vpop.f32.mrf.mxu1 }
 0x1a3   :  { %v2083_v59 = vpack.c.bf16 %v1483_v55, %v1482_v54  ;;  %v1481_v60 = vmul.f32 %v1184_v19, %v856_v56 }
 0x1a4   :  { %v2421_v62 = vpop.f32.mrf.mxu1 }
 0x1a5   :  { %2227 = vst [vmem:[%s3140_s5 + $0x18] sm:$0xff] %v2083_v59   ;;  %v2078_v63 = vpack.c.bf16 %v1481_v60, %v1480_v58  ;;  %v1486_v3 = vmul.f32 %v2421_v62, %v1209_v45 }
 0x1a6   :  { %v869_v0 = vpop.f32.mrf.mxu1 }
 0x1a7   :  { %2226 = vst [vmem:[%s3140_s5 + $0x10] sm:$0xff] %v2078_v63   ;;  %v1484_v7 = vmul.f32 %v1199_v24, %v869_v0 }
 0x1a8   :  { %v2422_v1 = vpop.f32.mrf.mxu1 }
 0x1a9   :  { %v1487_v4 = vmul.f32 %v2422_v1, %v1214_v25  ;;  %v3038_v25 = vpop.permute.xlu0 %1318 }
 0x1aa   :  { %v872_v6 = vpop.f32.mrf.mxu1 }
 0x1ab   :  { %v2093_v8 = vpack.c.bf16 %v1487_v4, %v1486_v3  ;;  %v1485_v9 = vmul.f32 %v1204_v23, %v872_v6  ;;  %v3033_v23 = vpop.permute.xlu1 %1323 }
 0x1ac   :  { %v2425_v10 = vpop.f32.mrf.mxu1 }
 0x1ad   :  { %2229 = vst [vmem:[%s3140_s5 + $0x28] sm:$0xff] %v2093_v8   ;;  %v2088_v11 = vpack.c.bf16 %v1485_v9, %v1484_v7  ;;  %v1490_v16 = vmul.f32 %v2425_v10, %v1229_v29  ;;  %v1329_v42 = vpop.permute.xlu0 %1328 }
 0x1ae   :  { %v885_v12 = vpop.f32.mrf.mxu1 }
 0x1af   :  { %2228 = vst [vmem:[%s3140_s5 + $0x20] sm:$0xff] %v2088_v11   ;;  %v1488_v19 = vmul.f32 %v1219_v27, %v885_v12  ;;  %v1334_v36 = vpop.permute.xlu1 %1333 }
 0x1b0   :  { %v2426_v15 = vpop.f32.mrf.mxu1 }
 0x1b1   :  { %v1491_v17 = vmul.f32 %v2426_v15, %v1234_v28 }
 0x1b2   :  { %v888_v18 = vpop.f32.mrf.mxu1 }
 0x1b3   :  { %v2103_v20 = vpack.c.bf16 %v1491_v17, %v1490_v16  ;;  %v1489_v21 = vmul.f32 %v2982_v26, %v888_v18 }
 0x1b4   :  { %v2429_v22 = vpop.f32.mrf.mxu1 }
 0x1b5   :  { %2231 = vst [vmem:[%s3140_s5 + $0x38] sm:$0xff] %v2103_v20   ;;  %v2098_v24 = vpack.c.bf16 %v1489_v21, %v1488_v19  ;;  %v1494_v27 = vmul.f32 %v2429_v22, %v2990_v33  ;;  %v3053_v33 = vpop.permute.xlu1 %1343 }
 0x1b6   :  { %v901_v45 = vpop.f32.mrf.mxu1 }
 0x1b7   :  { %2230 = vst [vmem:[%s3140_s5 + $0x30] sm:$0xff] %v2098_v24   ;;  %v1492_v37 = vmul.f32 %v2986_v31, %v901_v45 }
 0x1b8   :  { %v2430_v28 = vpop.f32.mrf.mxu1 }
 0x1b9   :  { %v1495_v26 = vmul.f32 %v2430_v28, %v2988_v32  ;;  %v1354_v58 = vpop.permute.xlu1 %1353 }
 0x1ba   :  { %v904_v29 = vpop.f32.mrf.mxu1 }
 0x1bb   :  { %v2113_v40 = vpack.c.bf16 %v1495_v26, %v1494_v27  ;;  %v1493_v41 = vmul.f32 %v2984_v30, %v904_v29  ;;  %v1339_v30 = vpop.permute.xlu0 %1338 }
 0x1bc   :  { %v2433_v43 = vpop.f32.mrf.mxu1 }
 0x1bd   :  { %2233 = vst [vmem:[%s3140_s5 + $0x48] sm:$0xff] %v2113_v40   ;;  %v2108_v44 = vpack.c.bf16 %v1493_v41, %v1492_v37  ;;  %v1498_v31 = vmul.f32 %v2433_v43, %v2998_v39  ;;  %v1364_v1 = vpop.permute.xlu1 %1363 }
 0x1be   :  { %v917_v46 = vpop.f32.mrf.mxu1 }
 0x1bf   :  { %2232 = vst [vmem:[%s3140_s5 + $0x40] sm:$0xff] %v2108_v44   ;;  %v1496_v50 = vmul.f32 %v2994_v35, %v917_v46 }
 0x1c0   :  { %v2434_v32 = vpop.f32.mrf.mxu1 }
 0x1c1   :  { %v1499_v47 = vmul.f32 %v2434_v32, %v2996_v38  ;;  %v1349_v38 = vpop.permute.xlu0 %1348  ;;  %v1374_v8 = vpop.permute.xlu1 %1373 }
 0x1c2   :  { %v920_v48 = vpop.f32.mrf.mxu1 }
 0x1c3   :  { %v2123_v52 = vpack.c.bf16 %v1499_v47, %v1498_v31  ;;  %v1497_v53 = vmul.f32 %v2992_v34, %v920_v48 }
 0x1c4   :  { %v2437_v54 = vpop.f32.mrf.mxu1 }
 0x1c5   :  { %2235 = vst [vmem:[%s3140_s5 + $0x58] sm:$0xff] %v2123_v52   ;;  %v2118_v55 = vpack.c.bf16 %v1497_v53, %v1496_v50  ;;  %v1502_v59 = vmul.f32 %v2437_v54, %v3012_v61  ;;  %v1359_v4 = vpop.permute.xlu0 %1358 }
 0x1c6   :  { %v933_v56 = vpop.f32.mrf.mxu1 }
 0x1c7   :  { %2234 = vst [vmem:[%s3140_s5 + $0x50] sm:$0xff] %v2118_v55   ;;  %v1500_v34 = vmul.f32 %v3005_v51, %v933_v56 }
 0x1c8   :  { %v2438_v39 = vpop.f32.mrf.mxu1 }
 0x1c9   :  { %v1503_v35 = vmul.f32 %v2438_v39, %v3010_v57  ;;  %v1369_v11 = vpop.permute.xlu0 %1368 }
 0x1ca   :  { %v936_v60 = vpop.f32.mrf.mxu1 }
 0x1cb   :  { %v2133_v62 = vpack.c.bf16 %v1503_v35, %v1502_v59  ;;  %v1501_v63 = vmul.f32 %v3000_v49, %v936_v60 }
 0x1cc   :  { %v2441_v0 = vpop.f32.mrf.mxu1 }
 0x1cd   :  { %2237 = vst [vmem:[%s3140_s5 + $0x68] sm:$0xff] %v2133_v62   ;;  %v2128_v3 = vpack.c.bf16 %v1501_v63, %v1500_v34  ;;  %v1506_v61 = vmul.f32 %v2441_v0, %v1309_v14  ;;  %v1384_v14 = vpop.permute.xlu1 %1383 }
 0x1ce   :  { %v949_v6 = vpop.f32.mrf.mxu1 }
 0x1cf   :  { %2236 = vst [vmem:[%s3140_s5 + $0x60] sm:$0xff] %v2128_v3   ;;  %v1504_v49 = vmul.f32 %v3022_v5, %v949_v6  ;;  %v1379_v5 = vpop.permute.xlu0 %1378 }
 0x1d0   :  { %v2442_v57 = vpop.f32.mrf.mxu1 }
 0x1d1   :  { %v1507_v51 = vmul.f32 %v2442_v57, %v3027_v13  ;;  %v1394_v28 = vpop.permute.xlu1 %1393 }
 0x1d2   :  { %v952_v7 = vpop.f32.mrf.mxu1 }
 0x1d3   :  { %v2143_v9 = vpack.c.bf16 %v1507_v51, %v1506_v61  ;;  %v1505_v10 = vmul.f32 %v3020_v2, %v952_v7  ;;  %v1389_v27 = vpop.permute.xlu0 %1388 }
 0x1d4   :  { %v2445_v12 = vpop.f32.mrf.mxu1 }
 0x1d5   :  { %2239 = vst [vmem:[%s3140_s5 + $0x78] sm:$0xff] %v2143_v9   ;;  %v2138_v15 = vpack.c.bf16 %v1505_v10, %v1504_v49  ;;  %v1510_v17 = vmul.f32 %v2445_v12, %v1329_v42  ;;  %v1404_v42 = vpop.permute.xlu1 %1403 }
 0x1d6   :  { %v965_v16 = vpop.f32.mrf.mxu1 }
 0x1d7   :  { %2238 = vst [vmem:[%s3140_s5 + $0x70] sm:$0xff] %v2138_v15   ;;  %v1508_v2 = vmul.f32 %v3038_v25, %v965_v16  ;;  %v1399_v44 = vpop.permute.xlu0 %1398 }
 0x1d8   :  { %v2446_v13 = vpop.f32.mrf.mxu1 }
 0x1d9   :  { %v1511_v18 = vmul.f32 %v2446_v13, %v1334_v36  ;;  %v1414_v48 = vpop.permute.xlu1 %1413 }
 0x1da   :  { %v968_v19 = vpop.f32.mrf.mxu1 }
 0x1db   :  { %v2153_v20 = vpack.c.bf16 %v1511_v18, %v1510_v17  ;;  %v1509_v21 = vmul.f32 %v3033_v23, %v968_v19  ;;  %v1409_v53 = vpop.permute.xlu0 %1408 }
 0x1dc   :  { %v2449_v22 = vpop.f32.mrf.mxu1 }
 0x1dd   :  { %2241 = vst [vmem:[%s3140_s5 + $0x88] sm:$0xff] %v2153_v20   ;;  %v2148_v24 = vpack.c.bf16 %v1509_v21, %v1508_v2  ;;  %v1514_v29 = vmul.f32 %v2449_v22, %v1349_v38  ;;  %v1424_v38 = vpop.permute.xlu1 %1423 }
 0x1de   :  { %v981_v45 = vpop.f32.mrf.mxu1 }
 0x1df   :  { %2240 = vst [vmem:[%s3140_s5 + $0x80] sm:$0xff] %v2148_v24   ;;  %v1512_v37 = vmul.f32 %v1339_v30, %v981_v45  ;;  %v1419_v35 = vpop.permute.xlu0 %1418 }
 0x1e0   :  { %v2450_v26 = vpop.f32.mrf.mxu1 }
 0x1e1   :  { %v1515_v36 = vmul.f32 %v2450_v26, %v1354_v58 }
 0x1e2   :  { %v984_v25 = vpop.f32.mrf.mxu1 }
 0x1e3   :  { %v2163_v40 = vpack.c.bf16 %v1515_v36, %v1514_v29  ;;  %v1513_v23 = vmul.f32 %v3053_v33, %v984_v25  ;;  %v1429_v6 = vpop.permute.xlu0 %1428 }
 0x1e4   :  { %v2453_v41 = vpop.f32.mrf.mxu1 }
 0x1e5   :  { %2243 = vst [vmem:[%s3140_s5 + $0x98] sm:$0xff] %v2163_v40   ;;  %v2158_v43 = vpack.c.bf16 %v1513_v23, %v1512_v37  ;;  %v1518_v31 = vmul.f32 %v2453_v41, %v1369_v11 }
 0x1e6   :  { %v997_v46 = vpop.f32.mrf.mxu1 }
 0x1e7   :  { %2242 = vst [vmem:[%s3140_s5 + $0x90] sm:$0xff] %v2158_v43   ;;  %v1516_v50 = vmul.f32 %v1359_v4, %v997_v46  ;;  %v1434_v4 = vpop.permute.xlu1 %1433  ;;  %v1439_v15 = vpop.permute.xlu0 %1438 }
 0x1e8   :  { %v2454_v32 = vpop.f32.mrf.mxu1 }
 0x1e9   :  { %v1519_v47 = vmul.f32 %v2454_v32, %v1374_v8 }
 0x1ea   :  { %v1000_v30 = vpop.f32.mrf.mxu1 }
 0x1eb   :  { %v2173_v33 = vpack.c.bf16 %v1519_v47, %v1518_v31  ;;  %v1517_v52 = vmul.f32 %v1364_v1, %v1000_v30  ;;  %v1444_v11 = vpop.permute.xlu1 %1443  ;;  %v1449_v21 = vpop.permute.xlu0 %1448 }
 0x1ec   :  { %v2457_v54 = vpop.f32.mrf.mxu1 }
 0x1ed   :  { %2245 = vst [vmem:[%s3140_s5 + $0xa8] sm:$0xff] %v2173_v33   ;;  %v2168_v55 = vpack.c.bf16 %v1517_v52, %v1516_v50  ;;  %v1522_v39 = vmul.f32 %v2457_v54, %v1389_v27 }
 0x1ee   :  { %v1013_v56 = vpop.f32.mrf.mxu1 }
 0x1ef   :  { %2244 = vst [vmem:[%s3140_s5 + $0xa0] sm:$0xff] %v2168_v55   ;;  %v1520_v34 = vmul.f32 %v1379_v5, %v1013_v56  ;;  %v1454_v5 = vpop.permute.xlu1 %1453  ;;  %v1459_v36 = vpop.permute.xlu0 %1458 }
 0x1f0   :  { %v2458_v58 = vpop.f32.mrf.mxu1 }
 0x1f1   :  { %v1523_v59 = vmul.f32 %v2458_v58, %v1394_v28 }
 0x1f2   :  { %v1016_v60 = vpop.f32.mrf.mxu1 }
 0x1f3   :  { %v2183_v62 = vpack.c.bf16 %v1523_v59, %v1522_v39  ;;  %v1521_v63 = vmul.f32 %v1384_v14, %v1016_v60  ;;  %v1464_v27 = vpop.permute.xlu1 %1463  ;;  %v1469_v46 = vpop.permute.xlu0 %1468 }
 0x1f4   :  { %v2461_v0 = vpop.f32.mrf.mxu1 }
 0x1f5   :  { %2247 = vst [vmem:[%s3140_s5 + $0xb8] sm:$0xff] %v2183_v62   ;;  %v2178_v1 = vpack.c.bf16 %v1521_v63, %v1520_v34  ;;  %v1526_v61 = vmul.f32 %v2461_v0, %v1409_v53 }
 0x1f6   :  { %v1029_v3 = vpop.f32.mrf.mxu1 }
 0x1f7   :  { %2246 = vst [vmem:[%s3140_s5 + $0xb0] sm:$0xff] %v2178_v1   ;;  %v1524_v8 = vmul.f32 %v1399_v44, %v1029_v3  ;;  %v1474_v44 = vpop.permute.xlu1 %1473 }
 0x1f8   :  { %v2462_v57 = vpop.f32.mrf.mxu1 }
 0x1f9   :  { %v1527_v51 = vmul.f32 %v2462_v57, %v1414_v48 }
 0x1fa   :  { %v1032_v7 = vpop.f32.mrf.mxu1 }
 0x1fb   :  { %v2193_v49 = vpack.c.bf16 %v1527_v51, %v1526_v61  ;;  %v1525_v9 = vmul.f32 %v1404_v42, %v1032_v7 }
 0x1fc   :  { %v2465_v10 = vpop.f32.mrf.mxu1 }
 0x1fd   :  { %2249 = vst [vmem:[%s3140_s5 + $0xc8] sm:$0xff] %v2193_v49   ;;  %v2188_v12 = vpack.c.bf16 %v1525_v9, %v1524_v8  ;;  %v1530_v14 = vmul.f32 %v2465_v10, %v1429_v6 }
 0x1fe   :  { %v1045_v16 = vpop.f32.mrf.mxu1 }
 0x1ff   :  { %2248 = vst [vmem:[%s3140_s5 + $0xc0] sm:$0xff] %v2188_v12   ;;  %v1528_v19 = vmul.f32 %v1419_v35, %v1045_v16 }
 0x200   :  { %v2466_v13 = vpop.f32.mrf.mxu1 }
 0x201   :  { %v1531_v17 = vmul.f32 %v2466_v13, %v1434_v4 }
 0x202   :  { %v1048_v18 = vpop.f32.mrf.mxu1 }
 0x203   :  { %v2203_v2 = vpack.c.bf16 %v1531_v17, %v1530_v14  ;;  %v1529_v20 = vmul.f32 %v1424_v38, %v1048_v18 }
 0x204   :  { %v2469_v22 = vpop.f32.mrf.mxu1 }
 0x205   :  { %2251 = vst [vmem:[%s3140_s5 + $0xd8] sm:$0xff] %v2203_v2   ;;  %v2198_v24 = vpack.c.bf16 %v1529_v20, %v1528_v19  ;;  %v1534_v26 = vmul.f32 %v2469_v22, %v1449_v21 }
 0x206   :  { %v1061_v45 = vpop.f32.mrf.mxu1 }
 0x207   :  { %2250 = vst [vmem:[%s3140_s5 + $0xd0] sm:$0xff] %v2198_v24   ;;  %v1532_v37 = vmul.f32 %v1439_v15, %v1061_v45 }
 0x208   :  { %v2470_v28 = vpop.f32.mrf.mxu1 }
 0x209   :  { %v1535_v29 = vmul.f32 %v2470_v28, %v1454_v5 }
 0x20a   :  { %v1064_v25 = vpop.f32.mrf.mxu1 }
 0x20b   :  { %v2213_v40 = vpack.c.bf16 %v1535_v29, %v1534_v26  ;;  %v1533_v23 = vmul.f32 %v1444_v11, %v1064_v25 }
 0x20c   :  { %v2473_v41 = vpop.f32.mrf.mxu1 }
 0x20d   :  { %2253 = vst [vmem:[%s3140_s5 + $0xe8] sm:$0xff] %v2213_v40   ;;  %v2208_v42 = vpack.c.bf16 %v1533_v23, %v1532_v37  ;;  %v1538_v31 = vmul.f32 %v2473_v41, %v1469_v46 }
 0x20e   :  { %v1077_v43 = vpop.f32.mrf.mxu1 }
 0x20f   :  { %2252 = vst [vmem:[%s3140_s5 + $0xe0] sm:$0xff] %v2208_v42   ;;  %v1536_v48 = vmul.f32 %v1459_v36, %v1077_v43 }
 0x210   :  { %v2474_v32 = vpop.f32.mrf.mxu1 }
 0x211   :  { %v1539_v47 = vmul.f32 %v2474_v32, %v1474_v44 }
 0x212   :  { %v1080_v30 = vpop.f32.mrf.mxu1 }
 0x213   :  { %v2223_v50 = vpack.c.bf16 %v1539_v47, %v1538_v31  ;;  %v1537_v33 = vmul.f32 %v1464_v27, %v1080_v30 }
 0x215   :  { %2255 = vst [vmem:[%s3140_s5 + $0xf8] sm:$0xff] %v2223_v50   ;;  %v2218_v52 = vpack.c.bf16 %v1537_v33, %v1536_v48 }
 0x217   :  { %2254 = vst [vmem:[%s3140_s5 + $0xf0] sm:$0xff] %v2218_v52  }

// kernel: gnn_forward.3
= control target key start
LH: loop header
LB: loop body
LE: loop exit
PB: predicated region body
PF: predicated region fallthrough
CT: control target
= control target key end

     0   :  { %v3290_v0 = vmov 0   ;;  %vm3292_vm0 = vmmov 0   ;;  %s4489_s1 = inlined_call_operand.vmem [shape: bf16[512,128], index: 1, kind: input, shape index: {}]   ;;  %s4490_s2 = inlined_call_operand.vmem [shape: f32[512,1], index: 2, kind: input, shape index: {}]   ;;  %s4491_s0 = inlined_call_operand.vmem [shape: bf16[512,512], index: 0, kind: input, shape index: {}]   ;;  %s4492_s5 = inlined_call_operand.vmem [shape: f32[8,1], index: 5, kind: input, shape index: {}]   ;;  %s4493_s3 = inlined_call_operand.vmem [shape: f32[1,128], index: 3, kind: input, shape index: {}]   ;;  %s4494_s4 = inlined_call_operand.vmem [shape: bf16[8,512], index: 4, kind: input, shape index: {}]   ;;  %s4495_s6 = inlined_call_operand.vmem [shape: f32[128,128], index: 6, kind: input, shape index: {}]   ;;  %s4496_s7 = inlined_call_operand.vmem [shape: f32[1,128], index: 7, kind: input, shape index: {}]   ;;  %s4497_s8 = inlined_call_operand.vmem [shape: f32[8,128], index: 8, kind: output, shape index: {}]  }
   0x1   :  { %1197 = vmatprep.subr.bf16.mxu0 %v3290_v0  ;;  %1486 = vmatprep.subr.bf16.mxu1 %v3290_v0  ;;  %v3061_v1 = vld [vmem:[%s4489_s1 + $0x38] sm:$0xff]   ;;  %v3063_v3 = vld [vmem:[%s4489_s1 + $0x30] sm:$0xff]   ;;  %v3065_v5 = vld [vmem:[%s4489_s1 + $0x28] sm:$0xff]  }
   0x2   :  { %v3062_v2 = vld [vmem:[%s4489_s1 + $0xb8] sm:$0xff]   ;;  %3059 = vset.pattern.permute.xlu0 %v3290_v0  ;;  %3060 = vset.pattern.permute.xlu1 %v3290_v0  ;;  %v3064_v4 = vld [vmem:[%s4489_s1 + $0xb0] sm:$0xff]   ;;  %v3066_v6 = vld [vmem:[%s4489_s1 + $0xa8] sm:$0xff]  }
   0x3   :  { %1198 = vmatpush1.bf16.msra.mxu0 %v3061_v1  ;;  %1487 = vmatpush1.bf16.msra.mxu1 %v3062_v2  ;;  %v1936_v7 = vld [vmem:[%s4490_s2 + $0xf0] sm:$0xff]  ;;  %v3067_v8 = vld [vmem:[%s4489_s1 + $0x20] sm:$0xff]   ;;  %v1937_v10 = vld [vmem:[%s4490_s2 + $0xf8] sm:$0xff] }
   0x4   :  { %1199 = vmatprep.subr.bf16.mxu0 %v3290_v0  ;;  %1488 = vmatprep.subr.bf16.mxu1 %v3290_v0  ;;  %v1968_v9 = vld [vmem:[%s4490_s2 + $0x1f0] sm:$0xff]  ;;  %v3068_v11 = vld [vmem:[%s4489_s1 + $0xa0] sm:$0xff]   ;;  %v3069_v12 = vld [vmem:[%s4489_s1 + $0x18] sm:$0xff]  }
   0x5   :  { %2186 = vperm.xlu0 %3059, %v1936_v7   ;;  %2346 = vperm.xlu1 %3060, %v1968_v9   ;;  %v1969_v13 = vld [vmem:[%s4490_s2 + $0x1f8] sm:$0xff]  ;;  %v1920_v14 = vld [vmem:[%s4490_s2 + $0x70] sm:$0xff]  ;;  %v3073_v20 = vld [vmem:[%s4489_s1 + $0x8] sm:$0xff]  }
   0x6   :  { %v3070_v15 = vld [vmem:[%s4489_s1 + $0x98] sm:$0xff]   ;;  %v3071_v17 = vld [vmem:[%s4489_s1 + $0x10] sm:$0xff]   ;;  %v1934_v22 = vld [vmem:[%s4490_s2 + $0xe0] sm:$0xff] }
   0x7   :  { %1200 = vmatpush1.bf16.msra.mxu0 %v3063_v3  ;;  %1489 = vmatpush1.bf16.msra.mxu1 %v3064_v4  ;;  %v1921_v16 = vld [vmem:[%s4490_s2 + $0x78] sm:$0xff]  ;;  %v1952_v18 = vld [vmem:[%s4490_s2 + $0x170] sm:$0xff]  ;;  %v3074_v23 = vld [vmem:[%s4489_s1 + $0x88] sm:$0xff]  }
   0x8   :  { %1201 = vmatprep.subr.bf16.mxu0 %v3290_v0  ;;  %1490 = vmatprep.subr.bf16.mxu1 %v3290_v0  ;;  %v3072_v19 = vld [vmem:[%s4489_s1 + $0x90] sm:$0xff]   ;;  %v1953_v21 = vld [vmem:[%s4490_s2 + $0x178] sm:$0xff]  ;;  %v1935_v24 = vld [vmem:[%s4490_s2 + $0xe8] sm:$0xff] }
   0x9   :  { %2191 = vperm.xlu0 %3059, %v1937_v10   ;;  %2351 = vperm.xlu1 %3060, %v1969_v13   ;;  %v3075_v25 = vld [vmem:[%s4489_s1] sm:$0xff]   ;;  %v3077_v28 = vld [vmem:[%s4489_s1 + $0x78] sm:$0xff]   ;;  %v1967_v29 = vld [vmem:[%s4490_s2 + $0x1e8] sm:$0xff] }
   0xa   :  { %v1966_v26 = vld [vmem:[%s4490_s2 + $0x1e0] sm:$0xff]  ;;  %v3078_v31 = vld [vmem:[%s4489_s1 + $0xf8] sm:$0xff]   ;;  %v1919_v32 = vld [vmem:[%s4490_s2 + $0x68] sm:$0xff] }
   0xb   :  { %1202 = vmatpush1.bf16.msra.mxu0 %v3065_v5  ;;  %1491 = vmatpush1.bf16.msra.mxu1 %v3066_v6  ;;  %v3076_v27 = vld [vmem:[%s4489_s1 + $0x80] sm:$0xff]   ;;  %v3079_v33 = vld [vmem:[%s4489_s1 + $0x70] sm:$0xff]   ;;  %v3081_v36 = vld [vmem:[%s4489_s1 + $0x68] sm:$0xff]  }
   0xc   :  { %1203 = vmatprep.subr.bf16.mxu0 %v3290_v0  ;;  %1492 = vmatprep.subr.bf16.mxu1 %v3290_v0  ;;  %v1918_v30 = vld [vmem:[%s4490_s2 + $0x60] sm:$0xff]  ;;  %v3080_v35 = vld [vmem:[%s4489_s1 + $0xf0] sm:$0xff]   ;;  %v1951_v37 = vld [vmem:[%s4490_s2 + $0x168] sm:$0xff] }
   0xd   :  { %2106 = vperm.xlu0 %3059, %v1920_v14   ;;  %2111 = vperm.xlu1 %3060, %v1921_v16   ;;  %v1950_v34 = vld [vmem:[%s4490_s2 + $0x160] sm:$0xff]  ;;  %v1932_v38 = vld [vmem:[%s4490_s2 + $0xd0] sm:$0xff]  ;;  %v3082_v39 = vld [vmem:[%s4489_s1 + $0xe8] sm:$0xff]  }
   0xe   :  { %v3083_v40 = vld [vmem:[%s4489_s1 + $0x60] sm:$0xff]   ;;  %v1933_v41 = vld [vmem:[%s4490_s2 + $0xd8] sm:$0xff]  ;;  %v1964_v43 = vld [vmem:[%s4490_s2 + $0x1d0] sm:$0xff] }
   0xf   :  { %1204 = vmatpush1.bf16.msra.mxu0 %v3067_v8  ;;  %1493 = vmatpush1.bf16.msra.mxu1 %v3068_v11  ;;  %v3095_v42 = vld [vmem:[%s4491_s0 + $0x4] ss:$16 sps:$4 sm:$0xff]   ;;  %v3098_v44 = vld [vmem:[%s4491_s0 + $0xc] ss:$16 sps:$4 sm:$0xff]   ;;  %v3093_v62 = vld [vmem:[%s4491_s0] ss:$16 sps:$4 sm:$0xff]  }
  0x10   :  { %1205 = vmatprep.subr.bf16.mxu0 %v3290_v0  ;;  %1494 = vmatprep.subr.bf16.mxu1 %v3290_v0  ;;  %v3084_v45 = vld [vmem:[%s4489_s1 + $0xe0] sm:$0xff]   ;;  %v1965_v46 = vld [vmem:[%s4490_s2 + $0x1d8] sm:$0xff]  ;;  %v1916_v48 = vld [vmem:[%s4490_s2 + $0x50] sm:$0xff] }
  0x11   :  { %2266 = vperm.xlu0 %3059, %v1952_v18   ;;  %2271 = vperm.xlu1 %3060, %v1953_v21   ;;  %v3085_v47 = vld [vmem:[%s4489_s1 + $0x58] sm:$0xff]   ;;  %v3087_v51 = vld [vmem:[%s4489_s1 + $0x50] sm:$0xff]   ;;  %v3089_v55 = vld [vmem:[%s4489_s1 + $0x48] sm:$0xff]  }
  0x12   :  { %1229 = vmatprep.mubr.bf16.mxu0 %v3095_v42  ;;  %1518 = vmatprep.mubr.bf16.mxu1 %v3098_v44  ;;  %v3086_v49 = vld [vmem:[%s4489_s1 + $0xd8] sm:$0xff]   ;;  %v1948_v52 = vld [vmem:[%s4490_s2 + $0x150] sm:$0xff]  ;;  %v1930_v56 = vld [vmem:[%s4490_s2 + $0xc0] sm:$0xff] }
  0x13   :  { %1206 = vmatpush1.bf16.msra.mxu0 %v3069_v12  ;;  %1495 = vmatpush1.bf16.msra.mxu1 %v3070_v15  ;;  %v1917_v50 = vld [vmem:[%s4490_s2 + $0x58] sm:$0xff]  ;;  %v3088_v53 = vld [vmem:[%s4489_s1 + $0xd0] sm:$0xff]   ;;  %v3090_v57 = vld [vmem:[%s4489_s1 + $0xc8] sm:$0xff]  }
  0x14   :  { %1207 = vmatprep.subr.bf16.mxu0 %v3290_v0  ;;  %1496 = vmatprep.subr.bf16.mxu1 %v3290_v0  ;;  %v1949_v54 = vld [vmem:[%s4490_s2 + $0x158] sm:$0xff]  ;;  %v1931_v58 = vld [vmem:[%s4490_s2 + $0xc8] sm:$0xff]  ;;  %v3091_v59 = vld [vmem:[%s4489_s1 + $0x40] sm:$0xff]  }
  0x15   :  { %2176 = vperm.xlu0 %3059, %v1934_v22   ;;  %2181 = vperm.xlu1 %3060, %v1935_v24   ;;  %v1962_v60 = vld [vmem:[%s4490_s2 + $0x1c0] sm:$0xff]  ;;  %v1963_v63 = vld [vmem:[%s4490_s2 + $0x1c8] sm:$0xff]  ;;  %v1928_v9 = vld [vmem:[%s4490_s2 + $0xb0] sm:$0xff] }
  0x16   :  { %v3092_v61 = vld [vmem:[%s4489_s1 + $0xc0] sm:$0xff]   ;;  %v3096_v1 = vld [vmem:[%s4491_s0 + $0x8] ss:$16 sps:$4 sm:$0xff]   ;;  %v3101_v3 = vld [vmem:[%s4491_s0 + $0x2c] ss:$16 sps:$4 sm:$0xff]  }
  0x17   :  { %1208 = vmatpush1.bf16.msra.mxu0 %v3071_v17  ;;  %1497 = vmatpush1.bf16.msra.mxu1 %v3072_v19  ;;  %v1914_v2 = vld [vmem:[%s4490_s2 + $0x40] sm:$0xff]  ;;  %v1915_v4 = vld [vmem:[%s4490_s2 + $0x48] sm:$0xff]  ;;  %v1929_v12 = vld [vmem:[%s4490_s2 + $0xb8] sm:$0xff] }
  0x18   :  { %1209 = vmatprep.subr.bf16.mxu0 %v3290_v0  ;;  %1498 = vmatprep.subr.bf16.mxu1 %v3290_v0  ;;  %v1946_v5 = vld [vmem:[%s4490_s2 + $0x140] sm:$0xff]  ;;  %v1947_v7 = vld [vmem:[%s4490_s2 + $0x148] sm:$0xff]  ;;  %v1960_v13 = vld [vmem:[%s4490_s2 + $0x1b0] sm:$0xff] }
  0x19   :  { %2336 = vperm.xlu0 %3059, %v1966_v26   ;;  %2341 = vperm.xlu1 %3060, %v1967_v29   ;;  %v3103_v6 = vld [vmem:[%s4491_s0 + $0x20] ss:$16 sps:$4 sm:$0xff]   ;;  %v3104_v8 = vld [vmem:[%s4491_s0 + $0x28] ss:$16 sps:$4 sm:$0xff]   ;;  %v3105_v10 = vld [vmem:[%s4491_s0 + $0x44] ss:$16 sps:$4 sm:$0xff]  }
  0x1a   :  { %v3107_v11 = vld [vmem:[%s4491_s0 + $0x4c] ss:$16 sps:$4 sm:$0xff]   ;;  %v3109_v14 = vld [vmem:[%s4491_s0 + $0x40] ss:$16 sps:$4 sm:$0xff]   ;;  %v3110_v16 = vld [vmem:[%s4491_s0 + $0x48] ss:$16 sps:$4 sm:$0xff]  }
  0x1b   :  { %1210 = vmatpush1.bf16.msra.mxu0 %v3073_v20  ;;  %1499 = vmatpush1.bf16.msra.mxu1 %v3074_v23  ;;  %v1961_v15 = vld [vmem:[%s4490_s2 + $0x1b8] sm:$0xff]  ;;  %v1912_v17 = vld [vmem:[%s4490_s2 + $0x30] sm:$0xff]  ;;  %v1958_v29 = vld [vmem:[%s4490_s2 + $0x1a0] sm:$0xff] }
  0x1c   :  { %1211 = vmatprep.subr.bf16.mxu0 %v3290_v0  ;;  %1500 = vmatprep.subr.bf16.mxu1 %v3290_v0  ;;  %v3111_v18 = vld [vmem:[%s4491_s0 + $0x64] ss:$16 sps:$4 sm:$0xff]   ;;  %v3113_v19 = vld [vmem:[%s4491_s0 + $0x6c] ss:$16 sps:$4 sm:$0xff]   ;;  %v3115_v22 = vld [vmem:[%s4491_s0 + $0x60] ss:$16 sps:$4 sm:$0xff]  }
  0x1d   :  { %2096 = vperm.xlu0 %3059, %v1918_v30   ;;  %2101 = vperm.xlu1 %3060, %v1919_v32   ;;  %v1913_v20 = vld [vmem:[%s4490_s2 + $0x38] sm:$0xff]  ;;  %v1944_v21 = vld [vmem:[%s4490_s2 + $0x130] sm:$0xff]  ;;  %v1959_v32 = vld [vmem:[%s4490_s2 + $0x1a8] sm:$0xff] }
  0x1e   :  { %v3116_v23 = vld [vmem:[%s4491_s0 + $0x68] ss:$16 sps:$4 sm:$0xff]   ;;  %v3117_v26 = vld [vmem:[%s4491_s0 + $0x84] ss:$16 sps:$4 sm:$0xff]   ;;  %v3121_v30 = vld [vmem:[%s4491_s0 + $0x80] ss:$16 sps:$4 sm:$0xff]  }
  0x1f   :  { %1212 = vmatpush1.bf16.msra.mxu0 %v3075_v25  ;;  %1501 = vmatpush1.bf16.msra.mxu1 %v3076_v27  ;;  %v1945_v24 = vld [vmem:[%s4490_s2 + $0x138] sm:$0xff]  ;;  %v1926_v25 = vld [vmem:[%s4490_s2 + $0xa0] sm:$0xff] }
  0x20   :  { %1213 = vmatprep.subr.bf16.mxu0 %v3290_v0  ;;  %1502 = vmatprep.subr.bf16.mxu1 %v3290_v0  ;;  %v3119_v27 = vld [vmem:[%s4491_s0 + $0x8c] ss:$16 sps:$4 sm:$0xff]   ;;  %v3129_v42 = vld [vmem:[%s4491_s0 + $0xc4] ss:$16 sps:$4 sm:$0xff]  }
  0x21   :  { %2256 = vperm.xlu0 %3059, %v1950_v34   ;;  %2261 = vperm.xlu1 %3060, %v1951_v37   ;;  %v3123_v34 = vld [vmem:[%s4491_s0 + $0xa4] ss:$16 sps:$4 sm:$0xff]   ;;  %v1925_v44 = vld [vmem:[%s4490_s2 + $0x98] sm:$0xff] }
  0x22   :  { %v1942_v37 = vld [vmem:[%s4490_s2 + $0x120] sm:$0xff] }
  0x23   :  { %1214 = vmatpush2.bf16.msra.mxu0 %v3077_v28  ;;  %1503 = vmatpush2.bf16.msra.mxu1 %v3078_v31  ;;  %v1927_v28 = vld [vmem:[%s4490_s2 + $0xa8] sm:$0xff] }
  0x24   :  { %1215 = vmatprep.subr.bf16.mxu0 %v3290_v0  ;;  %1504 = vmatprep.subr.bf16.mxu1 %v3290_v0  ;;  %v3122_v31 = vld [vmem:[%s4491_s0 + $0x88] ss:$16 sps:$4 sm:$0xff]  }
  0x25   :  { %2166 = vperm.xlu0 %3059, %v1932_v38   ;;  %2171 = vperm.xlu1 %3060, %v1933_v41   ;;  %v3127_v38 = vld [vmem:[%s4491_s0 + $0xa0] ss:$16 sps:$4 sm:$0xff]  }
  0x26   :  { %v1924_v41 = vld [vmem:[%s4490_s2 + $0x90] sm:$0xff] }
  0x27   :  { %1216 = vmatpush2.bf16.msra.mxu0 %v3079_v33  ;;  %1505 = vmatpush2.bf16.msra.mxu1 %v3080_v35  ;;  %v1910_v33 = vld [vmem:[%s4490_s2 + $0x20] sm:$0xff]  ;;  %v3125_v35 = vld [vmem:[%s4491_s0 + $0xac] ss:$16 sps:$4 sm:$0xff]  }
  0x28   :  { %1217 = vmatprep.subr.bf16.mxu0 %v3290_v0  ;;  %1506 = vmatprep.subr.bf16.mxu1 %v3290_v0 }
  0x29   :  { %2326 = vperm.xlu0 %3059, %v1964_v43   ;;  %2331 = vperm.xlu1 %3060, %v1965_v46   ;;  %v3131_v43 = vld [vmem:[%s4491_s0 + $0xcc] ss:$16 sps:$4 sm:$0xff]   ;;  %v3133_v46 = vld [vmem:[%s4491_s0 + $0xc0] ss:$16 sps:$4 sm:$0xff]  }
  0x2b   :  { %1218 = vmatpush2.bf16.msra.mxu0 %v3081_v36  ;;  %1507 = vmatpush2.bf16.msra.mxu1 %v3082_v39  ;;  %v1911_v36 = vld [vmem:[%s4490_s2 + $0x28] sm:$0xff] }
  0x2c   :  { %1219 = vmatprep.subr.bf16.mxu0 %v3290_v0  ;;  %1508 = vmatprep.subr.bf16.mxu1 %v3290_v0  ;;  %v3128_v39 = vld [vmem:[%s4491_s0 + $0xa8] ss:$16 sps:$4 sm:$0xff]  }
  0x2d   :  { %2086 = vperm.xlu0 %3059, %v1916_v48   ;;  %2091 = vperm.xlu1 %3060, %v1917_v50   ;;  %v1957_v48 = vld [vmem:[%s4490_s2 + $0x198] sm:$0xff]  ;;  %v3135_v50 = vld [vmem:[%s4491_s0 + $0xe4] ss:$16 sps:$4 sm:$0xff]  }
  0x2f   :  { %1220 = vmatpush2.bf16.msra.mxu0 %v3083_v40  ;;  %1509 = vmatpush2.bf16.msra.mxu1 %v3084_v45  ;;  %v1943_v40 = vld [vmem:[%s4490_s2 + $0x128] sm:$0xff]  ;;  %v1956_v45 = vld [vmem:[%s4490_s2 + $0x190] sm:$0xff] }
  0x30   :  { %1221 = vmatprep.subr.bf16.mxu0 %v3290_v0  ;;  %1510 = vmatprep.subr.bf16.mxu1 %v3290_v0 }
  0x31   :  { %2246 = vperm.xlu0 %3059, %v1948_v52   ;;  %2251 = vperm.xlu1 %3060, %v1949_v54   ;;  %v1909_v52 = vld [vmem:[%s4490_s2 + $0x18] sm:$0xff]  ;;  %v3139_v54 = vld [vmem:[%s4491_s0 + $0xe0] ss:$16 sps:$4 sm:$0xff]  }
  0x33   :  { %1222 = vmatpush2.bf16.msra.mxu0 %v3085_v47  ;;  %1511 = vmatpush2.bf16.msra.mxu1 %v3086_v49  ;;  %v3134_v47 = vld [vmem:[%s4491_s0 + $0xc8] ss:$16 sps:$4 sm:$0xff]   ;;  %v1908_v49 = vld [vmem:[%s4490_s2 + $0x10] sm:$0xff] }
  0x34   :  { %1223 = vmatprep.subr.bf16.mxu0 %v3290_v0  ;;  %1512 = vmatprep.subr.bf16.mxu1 %v3290_v0 }
  0x35   :  { %2156 = vperm.xlu0 %3059, %v1930_v56   ;;  %2161 = vperm.xlu1 %3060, %v1931_v58   ;;  %v3140_v56 = vld [vmem:[%s4491_s0 + $0xe8] ss:$16 sps:$4 sm:$0xff]   ;;  %v3141_v58 = vld [vmem:[%s4491_s0 + $0x104] ss:$16 sps:$4 sm:$0xff]  }
  0x37   :  { %1224 = vmatpush2.bf16.msra.mxu0 %v3087_v51  ;;  %1513 = vmatpush2.bf16.msra.mxu1 %v3088_v53  ;;  %v3137_v51 = vld [vmem:[%s4491_s0 + $0xec] ss:$16 sps:$4 sm:$0xff]   ;;  %v1940_v53 = vld [vmem:[%s4490_s2 + $0x110] sm:$0xff] }
  0x38   :  { %1225 = vmatprep.subr.bf16.mxu0 %v3290_v0  ;;  %1514 = vmatprep.subr.bf16.mxu1 %v3290_v0 }
  0x39   :  { %2316 = vperm.xlu0 %3059, %v1962_v60   ;;  %2321 = vperm.xlu1 %3060, %v1963_v63   ;;  %v1923_v60 = vld [vmem:[%s4490_s2 + $0x88] sm:$0xff] }
  0x3a   :  { %v1955_v63 = vld [vmem:[%s4490_s2 + $0x188] sm:$0xff] }
  0x3b   :  { %1226 = vmatpush2.bf16.msra.mxu0 %v3089_v55  ;;  %1515 = vmatpush2.bf16.msra.mxu1 %v3090_v57  ;;  %v1941_v55 = vld [vmem:[%s4490_s2 + $0x118] sm:$0xff]  ;;  %v1922_v57 = vld [vmem:[%s4490_s2 + $0x80] sm:$0xff] }
  0x3c   :  { %1227 = vmatprep.subr.bf16.mxu0 %v3290_v0  ;;  %1516 = vmatprep.subr.bf16.mxu1 %v3290_v0  ;;  %v3099_v0 = vld [vmem:[%s4491_s0 + $0x24] ss:$16 sps:$4 sm:$0xff]  }
  0x3d   :  { %2076 = vperm.xlu0 %3059, %v1914_v2   ;;  %2081 = vperm.xlu1 %3060, %v1915_v4   ;;  %v1906_v2 = vld [vmem:[%s4490_s2] sm:$0xff]  ;;  %v1907_v4 = vld [vmem:[%s4490_s2 + $0x8] sm:$0xff] }
  0x3f   :  { %1228 = vmatpush2.bf16.msra.mxu0 %v3091_v59  ;;  %1517 = vmatpush2.bf16.msra.mxu1 %v3092_v61  ;;  %v3143_v59 = vld [vmem:[%s4491_s0 + $0x10c] ss:$16 sps:$4 sm:$0xff]   ;;  %v1954_v61 = vld [vmem:[%s4490_s2 + $0x180] sm:$0xff] }
  0x41   :  { %2236 = vperm.xlu0 %3059, %v1946_v5   ;;  %2241 = vperm.xlu1 %3060, %v1947_v7   ;;  %v3152_v7 = vld [vmem:[%s4491_s0 + $0x128] ss:$16 sps:$4 sm:$0xff]  }
  0x42   :  { %1230 = vmatmul.mubr.bf16.vlgmr.msra.gmra.mxu0 %v3093_v62  ;;  %1519 = vmatmul.mubr.bf16.vlgmr.msra.gmra.mxu1 %v3096_v1  ;;  %v3145_v62 = vld [vmem:[%s4491_s0 + $0x100] ss:$16 sps:$4 sm:$0xff]   ;;  %v3146_v1 = vld [vmem:[%s4491_s0 + $0x108] ss:$16 sps:$4 sm:$0xff]  }
  0x43   :  { %1237 = vmatprep.mubr.bf16.mxu0 %v3099_v0  ;;  %1526 = vmatprep.mubr.bf16.mxu1 %v3101_v3  ;;  %v3147_v0 = vld [vmem:[%s4491_s0 + $0x124] ss:$16 sps:$4 sm:$0xff]   ;;  %v3149_v3 = vld [vmem:[%s4491_s0 + $0x12c] ss:$16 sps:$4 sm:$0xff]  }
  0x45   :  { %2146 = vperm.xlu0 %3059, %v1928_v9   ;;  %2151 = vperm.xlu1 %3060, %v1929_v12   ;;  %v1938_v12 = vld [vmem:[%s4490_s2 + $0x100] sm:$0xff] }
  0x49   :  { %2306 = vperm.xlu0 %3059, %v1960_v13   ;;  %2311 = vperm.xlu1 %3060, %v1961_v15   ;;  %v1939_v15 = vld [vmem:[%s4490_s2 + $0x108] sm:$0xff] }
  0x4a   :  { %1238 = vmatmul.mubr.bf16.gmra.mxu0 %v3103_v6  ;;  %1527 = vmatmul.mubr.bf16.gmra.mxu1 %v3104_v8  ;;  %v3151_v6 = vld [vmem:[%s4491_s0 + $0x120] ss:$16 sps:$4 sm:$0xff]   ;;  %v3153_v8 = vld [vmem:[%s4491_s0 + $0x144] ss:$16 sps:$4 sm:$0xff]  }
  0x4b   :  { %1245 = vmatprep.mubr.bf16.mxu0 %v3105_v10  ;;  %1534 = vmatprep.mubr.bf16.mxu1 %v3107_v11  ;;  %v3155_v10 = vld [vmem:[%s4491_s0 + $0x14c] ss:$16 sps:$4 sm:$0xff]  }
  0x4d   :  { %2066 = vperm.xlu0 %3059, %v1912_v17   ;;  %2071 = vperm.xlu1 %3060, %v1913_v20   ;;  %v3158_v17 = vld [vmem:[%s4491_s0 + $0x148] ss:$16 sps:$4 sm:$0xff]   ;;  %v3161_v20 = vld [vmem:[%s4491_s0 + $0x16c] ss:$16 sps:$4 sm:$0xff]  }
  0x51   :  { %2226 = vperm.xlu0 %3059, %v1944_v21   ;;  %2231 = vperm.xlu1 %3060, %v1945_v24   ;;  %v3163_v24 = vld [vmem:[%s4491_s0 + $0x160] ss:$16 sps:$4 sm:$0xff]  }
  0x52   :  { %1246 = vmatmul.mubr.bf16.gmra.mxu0 %v3109_v14  ;;  %1535 = vmatmul.mubr.bf16.gmra.mxu1 %v3110_v16  ;;  %v3157_v16 = vld [vmem:[%s4491_s0 + $0x140] ss:$16 sps:$4 sm:$0xff]  }
  0x53   :  { %1253 = vmatprep.mubr.bf16.mxu0 %v3111_v18  ;;  %1542 = vmatprep.mubr.bf16.mxu1 %v3113_v19  ;;  %v3159_v18 = vld [vmem:[%s4491_s0 + $0x164] ss:$16 sps:$4 sm:$0xff]  }
  0x55   :  { %2136 = vperm.xlu0 %3059, %v1926_v25   ;;  %2141 = vperm.xlu1 %3060, %v1927_v28   ;;  %v3164_v25 = vld [vmem:[%s4491_s0 + $0x168] ss:$16 sps:$4 sm:$0xff]   ;;  %v3167_v28 = vld [vmem:[%s4491_s0 + $0x18c] ss:$16 sps:$4 sm:$0xff]  }
  0x59   :  { %2296 = vperm.xlu0 %3059, %v1958_v29   ;;  %2301 = vperm.xlu1 %3060, %v1959_v32   ;;  %v3169_v32 = vld [vmem:[%s4491_s0 + $0x180] ss:$16 sps:$4 sm:$0xff]  }
  0x5a   :  { %1254 = vmatmul.mubr.bf16.gmra.mxu0 %v3115_v22  ;;  %1543 = vmatmul.mubr.bf16.gmra.mxu1 %v3116_v23 }
  0x5b   :  { %1261 = vmatprep.mubr.bf16.mxu0 %v3117_v26  ;;  %1550 = vmatprep.mubr.bf16.mxu1 %v3119_v27  ;;  %v3165_v26 = vld [vmem:[%s4491_s0 + $0x184] ss:$16 sps:$4 sm:$0xff]  }
  0x5d   :  { %2056 = vperm.xlu0 %3059, %v1910_v33   ;;  %2061 = vperm.xlu1 %3060, %v1911_v36   ;;  %v3170_v33 = vld [vmem:[%s4491_s0 + $0x188] ss:$16 sps:$4 sm:$0xff]   ;;  %v3173_v36 = vld [vmem:[%s4491_s0 + $0x1ac] ss:$16 sps:$4 sm:$0xff]  }
  0x61   :  { %2216 = vperm.xlu0 %3059, %v1942_v37   ;;  %2221 = vperm.xlu1 %3060, %v1943_v40   ;;  %v3175_v40 = vld [vmem:[%s4491_s0 + $0x1a0] ss:$16 sps:$4 sm:$0xff]  }
  0x62   :  { %1262 = vmatmul.mubr.bf16.gmra.mxu0 %v3121_v30  ;;  %1551 = vmatmul.mubr.bf16.gmra.mxu1 %v3122_v31 }
  0x63   :  { %1269 = vmatprep.mubr.bf16.mxu0 %v3123_v34  ;;  %1558 = vmatprep.mubr.bf16.mxu1 %v3125_v35  ;;  %v3171_v34 = vld [vmem:[%s4491_s0 + $0x1a4] ss:$16 sps:$4 sm:$0xff]  }
  0x65   :  { %2126 = vperm.xlu0 %3059, %v1924_v41   ;;  %2131 = vperm.xlu1 %3060, %v1925_v44   ;;  %v2687_v41 = vld [vmem:[%s4492_s5] sm:$0xff] }
  0x69   :  { %2286 = vperm.xlu0 %3059, %v1956_v45   ;;  %2291 = vperm.xlu1 %3060, %v1957_v48   ;;  %v3179_v45 = vld [vmem:[%s4491_s0 + $0x1cc] ss:$16 sps:$4 sm:$0xff]  }
  0x6a   :  { %1270 = vmatmul.mubr.bf16.gmra.mxu0 %v3127_v38  ;;  %1559 = vmatmul.mubr.bf16.gmra.mxu1 %v3128_v39 }
  0x6b   :  { %1277 = vmatprep.mubr.bf16.mxu0 %v3129_v42  ;;  %1566 = vmatprep.mubr.bf16.mxu1 %v3131_v43  ;;  %v3176_v42 = vld [vmem:[%s4491_s0 + $0x1a8] ss:$16 sps:$4 sm:$0xff]   ;;  %v3177_v43 = vld [vmem:[%s4491_s0 + $0x1c4] ss:$16 sps:$4 sm:$0xff]  }
  0x6d   :  { %2046 = vperm.xlu0 %3059, %v1908_v49   ;;  %2051 = vperm.xlu1 %3060, %v1909_v52   ;;  %v3181_v49 = vld [vmem:[%s4491_s0 + $0x1c0] ss:$16 sps:$4 sm:$0xff]  }
  0x71   :  { %2206 = vperm.xlu0 %3059, %v1940_v53   ;;  %2211 = vperm.xlu1 %3060, %v1941_v55   ;;  %v3185_v53 = vld [vmem:[%s4491_s0 + $0x1ec] ss:$16 sps:$4 sm:$0xff]  }
  0x72   :  { %1278 = vmatmul.mubr.bf16.gmra.mxu0 %v3133_v46  ;;  %1567 = vmatmul.mubr.bf16.gmra.mxu1 %v3134_v47 }
  0x73   :  { %1285 = vmatprep.mubr.bf16.mxu0 %v3135_v50  ;;  %1574 = vmatprep.mubr.bf16.mxu1 %v3137_v51  ;;  %v3182_v50 = vld [vmem:[%s4491_s0 + $0x1c8] ss:$16 sps:$4 sm:$0xff]   ;;  %v3183_v51 = vld [vmem:[%s4491_s0 + $0x1e4] ss:$16 sps:$4 sm:$0xff]  }
  0x75   :  { %2116 = vperm.xlu0 %3059, %v1922_v57   ;;  %2121 = vperm.xlu1 %3060, %v1923_v60   ;;  %v3187_v57 = vld [vmem:[%s4491_s0 + $0x1e0] ss:$16 sps:$4 sm:$0xff]  }
  0x79   :  { %2276 = vperm.xlu0 %3059, %v1954_v61   ;;  %2281 = vperm.xlu1 %3060, %v1955_v63   ;;  %v3191_v61 = vld [vmem:[%s4491_s0 + $0x20c] ss:$16 sps:$4 sm:$0xff]  }
  0x7a   :  { %1286 = vmatmul.mubr.bf16.gmra.mxu0 %v3139_v54  ;;  %1575 = vmatmul.mubr.bf16.gmra.mxu1 %v3140_v56 }
  0x7b   :  { %1293 = vmatprep.mubr.bf16.mxu0 %v3141_v58  ;;  %1582 = vmatprep.mubr.bf16.mxu1 %v3143_v59  ;;  %v3188_v58 = vld [vmem:[%s4491_s0 + $0x1e8] ss:$16 sps:$4 sm:$0xff]   ;;  %v3189_v59 = vld [vmem:[%s4491_s0 + $0x204] ss:$16 sps:$4 sm:$0xff]  }
  0x7d   :  { %2036 = vperm.xlu0 %3059, %v1906_v2   ;;  %2041 = vperm.xlu1 %3060, %v1907_v4   ;;  %v3193_v2 = vld [vmem:[%s4491_s0 + $0x200] ss:$16 sps:$4 sm:$0xff]  }
  0x80   :  { %v3768_v5 = vpop.permute.xlu0 %2186  ;;  %v3779_v9 = vpop.permute.xlu1 %2346 }
  0x81   :  { %4498 = vst [vmem:[#allocation4_spill] sm:$0xff] %v3779_v9  ;;  %2196 = vperm.xlu0 %3059, %v1938_v12   ;;  %2201 = vperm.xlu1 %3060, %v1939_v15   ;;  %v3199_v12 = vld [vmem:[%s4491_s0 + $0x220] ss:$16 sps:$4 sm:$0xff]   ;;  %v3200_v15 = vld [vmem:[%s4491_s0 + $0x228] ss:$16 sps:$4 sm:$0xff]  }
  0x82   :  { %1294 = vmatmul.mubr.bf16.gmra.mxu0 %v3145_v62  ;;  %1583 = vmatmul.mubr.bf16.gmra.mxu1 %v3146_v1 }
  0x83   :  { %1301 = vmatprep.mubr.bf16.mxu0 %v3147_v0  ;;  %1590 = vmatprep.mubr.bf16.mxu1 %v3149_v3  ;;  %v3194_v0 = vld [vmem:[%s4491_s0 + $0x208] ss:$16 sps:$4 sm:$0xff]   ;;  %v3195_v3 = vld [vmem:[%s4491_s0 + $0x224] ss:$16 sps:$4 sm:$0xff]  }
  0x84   :  { %v3784_v11 = vpop.permute.xlu0 %2191  ;;  %v3789_v13 = vpop.permute.xlu1 %2351 }
  0x85   :  { %4499 = vst [vmem:[#allocation5_spill] sm:$0xff] %v3789_v13  ;;  %2690 = vperm.xlu0 %3059, %v2687_v41  }
  0x88   :  { %v3791_v14 = vpop.permute.xlu0 %2106  ;;  %v3805_v19 = vpop.permute.xlu1 %2111 }
  0x8a   :  { %1302 = vmatmul.mubr.bf16.gmra.mxu0 %v3151_v6  ;;  %1591 = vmatmul.mubr.bf16.gmra.mxu1 %v3152_v7  ;;  %v3197_v6 = vld [vmem:[%s4491_s0 + $0x22c] ss:$16 sps:$4 sm:$0xff]  }
  0x8b   :  { %1309 = vmatprep.mubr.bf16.mxu0 %v3153_v8  ;;  %1598 = vmatprep.mubr.bf16.mxu1 %v3155_v10 }
  0x8c   :  { %v3810_v21 = vpop.permute.xlu0 %2266  ;;  %v3812_v22 = vpop.permute.xlu1 %2271 }
  0x8d   :  { %4500 = vst [vmem:[#allocation6_spill] sm:$0xff] %v3810_v21  ;;  %4501 = vst [vmem:[#allocation7_spill] sm:$0xff] %v3812_v22 }
  0x90   :  { %v3814_v23 = vpop.permute.xlu0 %2176  ;;  %v3825_v27 = vpop.permute.xlu1 %2181 }
  0x92   :  { %1310 = vmatmul.mubr.bf16.gmra.mxu0 %v3157_v16  ;;  %1599 = vmatmul.mubr.bf16.gmra.mxu1 %v3158_v17  ;;  %v3201_v16 = vld [vmem:[%s4491_s0 + $0x244] ss:$16 sps:$4 sm:$0xff]  }
  0x93   :  { %1317 = vmatprep.mubr.bf16.mxu0 %v3159_v18  ;;  %1606 = vmatprep.mubr.bf16.mxu1 %v3161_v20  ;;  %v3203_v18 = vld [vmem:[%s4491_s0 + $0x24c] ss:$16 sps:$4 sm:$0xff]  }
  0x94   :  { %v3830_v29 = vpop.permute.xlu0 %2336  ;;  %v3832_v30 = vpop.permute.xlu1 %2341 }
  0x95   :  { %4502 = vst [vmem:[#allocation8_spill] sm:$0xff] %v3830_v29  ;;  %4503 = vst [vmem:[#allocation9_spill] sm:$0xff] %v3832_v30  ;;  %v4095_v29 = vld [vmem:[%s4493_s3] ss:$0 sm:$0xff] }
  0x98   :  { %v3834_v31 = vpop.permute.xlu0 %2096  ;;  %v3845_v35 = vpop.permute.xlu1 %2101 }
  0x9a   :  { %1318 = vmatmul.mubr.bf16.gmra.mxu0 %v3163_v24  ;;  %1607 = vmatmul.mubr.bf16.gmra.mxu1 %v3164_v25 }
  0x9b   :  { %1325 = vmatprep.mubr.bf16.mxu0 %v3165_v26  ;;  %1614 = vmatprep.mubr.bf16.mxu1 %v3167_v28  ;;  %v3205_v26 = vld [vmem:[%s4491_s0 + $0x240] ss:$16 sps:$4 sm:$0xff]   ;;  %v3206_v28 = vld [vmem:[%s4491_s0 + $0x248] ss:$16 sps:$4 sm:$0xff]  }
  0x9c   :  { %v3850_v37 = vpop.permute.xlu0 %2256  ;;  %v3852_v38 = vpop.permute.xlu1 %2261 }
  0x9d   :  { %4504 = vst [vmem:[#allocation10_spill] sm:$0xff] %v3850_v37  ;;  %4505 = vst [vmem:[#allocation11_spill] sm:$0xff] %v3852_v38 }
  0xa0   :  { %v3854_v39 = vpop.permute.xlu0 %2166  ;;  %v3868_v44 = vpop.permute.xlu1 %2171 }
  0xa2   :  { %1326 = vmatmul.mubr.bf16.gmra.mxu0 %v3169_v32  ;;  %1615 = vmatmul.mubr.bf16.gmra.mxu1 %v3170_v33  ;;  %v3207_v32 = vld [vmem:[%s4491_s0 + $0x264] ss:$16 sps:$4 sm:$0xff]  }
  0xa3   :  { %1333 = vmatprep.mubr.bf16.mxu0 %v3171_v34  ;;  %1622 = vmatprep.mubr.bf16.mxu1 %v3173_v36  ;;  %v3209_v34 = vld [vmem:[%s4491_s0 + $0x26c] ss:$16 sps:$4 sm:$0xff]  }
  0xa4   :  { %v3873_v46 = vpop.permute.xlu0 %2326  ;;  %v3875_v47 = vpop.permute.xlu1 %2331 }
  0xa5   :  { %4506 = vst [vmem:[#allocation12_spill] sm:$0xff] %v3873_v46  ;;  %4507 = vst [vmem:[#allocation13_spill] sm:$0xff] %v3875_v47  ;;  %v3247_v47 = vld [vmem:[%s4491_s0 + $0x320] ss:$16 sps:$4 sm:$0xff]  }
  0xa8   :  { %v3877_v48 = vpop.permute.xlu0 %2086  ;;  %v3888_v52 = vpop.permute.xlu1 %2091 }
  0xaa   :  { %1334 = vmatmul.mubr.bf16.gmra.mxu0 %v3175_v40  ;;  %1623 = vmatmul.mubr.bf16.gmra.mxu1 %v3176_v42  ;;  %v3211_v42 = vld [vmem:[%s4491_s0 + $0x260] ss:$16 sps:$4 sm:$0xff]  }
  0xab   :  { %1341 = vmatprep.mubr.bf16.mxu0 %v3177_v43  ;;  %1630 = vmatprep.mubr.bf16.mxu1 %v3179_v45  ;;  %v3212_v43 = vld [vmem:[%s4491_s0 + $0x268] ss:$16 sps:$4 sm:$0xff]   ;;  %v3213_v45 = vld [vmem:[%s4491_s0 + $0x284] ss:$16 sps:$4 sm:$0xff]  }
  0xac   :  { %v3893_v54 = vpop.permute.xlu0 %2246  ;;  %v3895_v55 = vpop.permute.xlu1 %2251 }
  0xad   :  { %4508 = vst [vmem:[#allocation14_spill] sm:$0xff] %v3895_v55 }
  0xb0   :  { %v3897_v56 = vpop.permute.xlu0 %2156  ;;  %v3908_v60 = vpop.permute.xlu1 %2161 }
  0xb2   :  { %1342 = vmatmul.mubr.bf16.gmra.mxu0 %v3181_v49  ;;  %1631 = vmatmul.mubr.bf16.gmra.mxu1 %v3182_v50  ;;  %v3215_v50 = vld [vmem:[%s4491_s0 + $0x28c] ss:$16 sps:$4 sm:$0xff]  }
  0xb3   :  { %1349 = vmatprep.mubr.bf16.mxu0 %v3183_v51  ;;  %1638 = vmatprep.mubr.bf16.mxu1 %v3185_v53 }
  0xb4   :  { %v3913_v62 = vpop.permute.xlu0 %2316  ;;  %v3915_v63 = vpop.permute.xlu1 %2321 }
  0xb5   :  { %4509 = vst [vmem:[#allocation15_spill] sm:$0xff] %v3913_v62  ;;  %4510 = vst [vmem:[#allocation16_spill] sm:$0xff] %v3915_v63 }
  0xb8   :  { %v3917_v1 = vpop.permute.xlu0 %2076  ;;  %v3928_v4 = vpop.permute.xlu1 %2081 }
  0xba   :  { %1350 = vmatmul.mubr.bf16.gmra.mxu0 %v3187_v57  ;;  %1639 = vmatmul.mubr.bf16.gmra.mxu1 %v3188_v58  ;;  %v3217_v58 = vld [vmem:[%s4491_s0 + $0x280] ss:$16 sps:$4 sm:$0xff]  }
  0xbb   :  { %1357 = vmatprep.mubr.bf16.mxu0 %v3189_v59  ;;  %1646 = vmatprep.mubr.bf16.mxu1 %v3191_v61  ;;  %v3218_v59 = vld [vmem:[%s4491_s0 + $0x288] ss:$16 sps:$4 sm:$0xff]   ;;  %v3219_v61 = vld [vmem:[%s4491_s0 + $0x2a4] ss:$16 sps:$4 sm:$0xff]  }
  0xbc   :  { %v3933_v7 = vpop.permute.xlu0 %2236  ;;  %v3935_v8 = vpop.permute.xlu1 %2241 }
  0xc0   :  { %v3937_v10 = vpop.permute.xlu0 %2146  ;;  %v3948_v17 = vpop.permute.xlu1 %2151 }
  0xc2   :  { %1358 = vmatmul.mubr.bf16.gmra.mxu0 %v3193_v2  ;;  %1647 = vmatmul.mubr.bf16.gmra.mxu1 %v3194_v0  ;;  %v3221_v0 = vld [vmem:[%s4491_s0 + $0x2ac] ss:$16 sps:$4 sm:$0xff]  }
  0xc3   :  { %1365 = vmatprep.mubr.bf16.mxu0 %v3195_v3  ;;  %1654 = vmatprep.mubr.bf16.mxu1 %v3197_v6 }
  0xc4   :  { %v3953_v20 = vpop.permute.xlu0 %2306  ;;  %v3955_v24 = vpop.permute.xlu1 %2311 }
  0xc5   :  { %4511 = vst [vmem:[#allocation17_spill] sm:$0xff] %v3953_v20  ;;  %4512 = vst [vmem:[#allocation18_spill] sm:$0xff] %v3955_v24 }
  0xc8   :  { %v3957_v25 = vpop.permute.xlu0 %2066  ;;  %v3968_v33 = vpop.permute.xlu1 %2071 }
  0xca   :  { %1366 = vmatmul.mubr.bf16.gmra.mxu0 %v3199_v12  ;;  %1655 = vmatmul.mubr.bf16.gmra.mxu1 %v3200_v15  ;;  %v3223_v15 = vld [vmem:[%s4491_s0 + $0x2a0] ss:$16 sps:$4 sm:$0xff]  }
  0xcb   :  { %1373 = vmatprep.mubr.bf16.mxu0 %v3201_v16  ;;  %1662 = vmatprep.mubr.bf16.mxu1 %v3203_v18  ;;  %v3224_v16 = vld [vmem:[%s4491_s0 + $0x2a8] ss:$16 sps:$4 sm:$0xff]   ;;  %v3225_v18 = vld [vmem:[%s4491_s0 + $0x2c4] ss:$16 sps:$4 sm:$0xff]  }
  0xcc   :  { %v3973_v36 = vpop.permute.xlu0 %2226  ;;  %v3975_v40 = vpop.permute.xlu1 %2231 }
  0xd0   :  { %v3977_v41 = vpop.permute.xlu0 %2136  ;;  %v3988_v49 = vpop.permute.xlu1 %2141 }
  0xd2   :  { %1374 = vmatmul.mubr.bf16.gmra.mxu0 %v3205_v26  ;;  %1663 = vmatmul.mubr.bf16.gmra.mxu1 %v3206_v28  ;;  %v3227_v28 = vld [vmem:[%s4491_s0 + $0x2cc] ss:$16 sps:$4 sm:$0xff]  }
  0xd3   :  { %1381 = vmatprep.mubr.bf16.mxu0 %v3207_v32  ;;  %1670 = vmatprep.mubr.bf16.mxu1 %v3209_v34 }
  0xd4   :  { %v3993_v51 = vpop.permute.xlu0 %2296  ;;  %v3995_v53 = vpop.permute.xlu1 %2301 }
  0xd5   :  { %4513 = vst [vmem:[#allocation19_spill] sm:$0xff] %v3993_v51  ;;  %4514 = vst [vmem:[#allocation20_spill] sm:$0xff] %v3995_v53  ;;  %v3242_v51 = vld [vmem:[%s4491_s0 + $0x308] ss:$16 sps:$4 sm:$0xff]   ;;  %v3243_v53 = vld [vmem:[%s4491_s0 + $0x324] ss:$16 sps:$4 sm:$0xff]  }
  0xd8   :  { %v3997_v57 = vpop.permute.xlu0 %2056  ;;  %v4008_v2 = vpop.permute.xlu1 %2061 }
  0xda   :  { %1382 = vmatmul.mubr.bf16.gmra.mxu0 %v3211_v42  ;;  %1671 = vmatmul.mubr.bf16.gmra.mxu1 %v3212_v43  ;;  %v3229_v43 = vld [vmem:[%s4491_s0 + $0x2c0] ss:$16 sps:$4 sm:$0xff]  }
  0xdb   :  { %1389 = vmatprep.mubr.bf16.mxu0 %v3213_v45  ;;  %1678 = vmatprep.mubr.bf16.mxu1 %v3215_v50  ;;  %v3230_v45 = vld [vmem:[%s4491_s0 + $0x2c8] ss:$16 sps:$4 sm:$0xff]   ;;  %v3231_v50 = vld [vmem:[%s4491_s0 + $0x2e4] ss:$16 sps:$4 sm:$0xff]  }
  0xdc   :  { %v4013_v3 = vpop.permute.xlu0 %2216  ;;  %v4015_v6 = vpop.permute.xlu1 %2221 }
  0xe0   :  { %v4017_v12 = vpop.permute.xlu0 %2126  ;;  %v4028_v26 = vpop.permute.xlu1 %2131 }
  0xe2   :  { %1390 = vmatmul.mubr.bf16.gmra.mxu0 %v3217_v58  ;;  %1679 = vmatmul.mubr.bf16.gmra.mxu1 %v3218_v59  ;;  %v3233_v59 = vld [vmem:[%s4491_s0 + $0x2ec] ss:$16 sps:$4 sm:$0xff]  }
  0xe3   :  { %1397 = vmatprep.mubr.bf16.mxu0 %v3219_v61  ;;  %1686 = vmatprep.mubr.bf16.mxu1 %v3221_v0 }
  0xe4   :  { %v4033_v32 = vpop.permute.xlu0 %2286  ;;  %v4035_v34 = vpop.permute.xlu1 %2291 }
  0xe5   :  { %4515 = vst [vmem:[#allocation21_spill] sm:$0xff] %v4033_v32  ;;  %4516 = vst [vmem:[#allocation22_spill] sm:$0xff] %v4035_v34 }
  0xe8   :  { %v4037_v42 = vpop.permute.xlu0 %2046  ;;  %v4048_v58 = vpop.permute.xlu1 %2051 }
  0xea   :  { %1398 = vmatmul.mubr.bf16.gmra.mxu0 %v3223_v15  ;;  %1687 = vmatmul.mubr.bf16.gmra.mxu1 %v3224_v16  ;;  %v3235_v15 = vld [vmem:[%s4491_s0 + $0x2e0] ss:$16 sps:$4 sm:$0xff]   ;;  %v3236_v16 = vld [vmem:[%s4491_s0 + $0x2e8] ss:$16 sps:$4 sm:$0xff]  }
  0xeb   :  { %1405 = vmatprep.mubr.bf16.mxu0 %v3225_v18  ;;  %1694 = vmatprep.mubr.bf16.mxu1 %v3227_v28  ;;  %v3237_v28 = vld [vmem:[%s4491_s0 + $0x304] ss:$16 sps:$4 sm:$0xff]  }
  0xec   :  { %v4053_v61 = vpop.permute.xlu0 %2206  ;;  %v4055_v0 = vpop.permute.xlu1 %2211 }
  0xf0   :  { %v4063_v18 = vpop.permute.xlu0 %2116 }
  0xf2   :  { %1406 = vmatmul.mubr.bf16.gmra.mxu0 %v3229_v43  ;;  %1695 = vmatmul.mubr.bf16.gmra.mxu1 %v3230_v45  ;;  %v3239_v43 = vld [vmem:[%s4491_s0 + $0x30c] ss:$16 sps:$4 sm:$0xff]   ;;  %v4071_v45 = vpop.permute.xlu1 %2121 }
  0xf3   :  { %1413 = vmatprep.mubr.bf16.mxu0 %v3231_v50  ;;  %1702 = vmatprep.mubr.bf16.mxu1 %v3233_v59  ;;  %v3241_v59 = vld [vmem:[%s4491_s0 + $0x300] ss:$16 sps:$4 sm:$0xff]  }
  0xf4   :  { %v4073_v50 = vpop.permute.xlu0 %2276 }
  0xf5   :  { %4517 = vst [vmem:[#allocation23_spill] sm:$0xff] %v4073_v50 }
  0xf8   :  { %v2037_v20 = vpop.permute.xlu0 %2036 }
  0xfa   :  { %1414 = vmatmul.mubr.bf16.gmra.mxu0 %v3235_v15  ;;  %1703 = vmatmul.mubr.bf16.gmra.mxu1 %v3236_v16  ;;  %v3245_v15 = vld [vmem:[%s4491_s0 + $0x32c] ss:$16 sps:$4 sm:$0xff]   ;;  %v4087_v16 = vpop.permute.xlu1 %2281 }
  0xfb   :  { %1421 = vmatprep.mubr.bf16.mxu0 %v3237_v28  ;;  %1710 = vmatprep.mubr.bf16.mxu1 %v3239_v43  ;;  %4518 = vst [vmem:[#allocation24_spill] sm:$0xff] %v4087_v16 }
  0xfe   :  { %v2042_v9 = vpop.permute.xlu1 %2041 }
 0x102   :  { %v1231_v28 = vpop.f32.mrf.mxu0  ;;  %1422 = vmatmul.mubr.bf16.gmra.mxu0 %v3241_v59  ;;  %v1520_v43 = vpop.f32.mrf.mxu1  ;;  %1711 = vmatmul.mubr.bf16.gmra.mxu1 %v3242_v51  ;;  %v3248_v51 = vld [vmem:[%s4491_s0 + $0x328] ss:$16 sps:$4 sm:$0xff]  }
 0x103   :  { %1429 = vmatprep.mubr.bf16.mxu0 %v3243_v53  ;;  %v1521_v24 = vadd.f32 %v1520_v43, %v1231_v28  ;;  %1718 = vmatprep.mubr.bf16.mxu1 %v3245_v15 }
 0x104   :  { %v1233_v62 = vpop.f32.mrf.mxu0  ;;  %v1522_v63 = vpop.f32.mrf.mxu1 }
 0x105   :  { %v2354_v46 = vmul.f32 %v2037_v20, %v1521_v24  ;;  %v3249_v62 = vld [vmem:[%s4491_s0 + $0x344] ss:$16 sps:$4 sm:$0xff]   ;;  %v3251_v24 = vld [vmem:[%s4491_s0 + $0x34c] ss:$16 sps:$4 sm:$0xff]  }
 0x106   :  { %v1234_v13 = vpop.f32.mrf.mxu0  ;;  %v1523_v59 = vpop.f32.mrf.mxu1 }
 0x107   :  { %v1524_v63 = vadd.f32 %v1523_v59, %v1234_v13  ;;  %v2425_v15 = vadd.f32 %v4095_v29, %v2354_v46 }
 0x108   :  { %v1236_v20 = vpop.f32.mrf.mxu0  ;;  %v1525_v53 = vpop.f32.mrf.mxu1 }
 0x109   :  { %v2355_v28 = vmul.f32 %v2042_v9, %v1524_v63  ;;  %v2489_v59 = vmax.f32 %v2425_v15, 0.0  ;;  %v3253_v9 = vld [vmem:[%s4491_s0 + $0x340] ss:$16 sps:$4 sm:$0xff]  }
 0x10a   :  { %v1239_v43 = vpop.f32.mrf.mxu0  ;;  %1430 = vmatmul.mubr.bf16.gmra.mxu0 %v3247_v47  ;;  %v1528_v30 = vpop.f32.mrf.mxu1  ;;  %1719 = vmatmul.mubr.bf16.gmra.mxu1 %v3248_v51  ;;  %v3254_v47 = vld [vmem:[%s4491_s0 + $0x348] ss:$16 sps:$4 sm:$0xff]  }
 0x10b   :  { %1437 = vmatprep.mubr.bf16.mxu0 %v3249_v62  ;;  %v2426_v34 = vadd.f32 %v4095_v29, %v2355_v28  ;;  %v1529_v32 = vadd.f32 %v1528_v30, %v1239_v43  ;;  %1726 = vmatprep.mubr.bf16.mxu1 %v3251_v24  ;;  %v3255_v30 = vld [vmem:[%s4491_s0 + $0x364] ss:$16 sps:$4 sm:$0xff]  }
 0x10c   :  { %v1241_v16 = vpop.f32.mrf.mxu0  ;;  %v1530_v13 = vpop.f32.mrf.mxu1 }
 0x10d   :  { %v2490_v20 = vmax.f32 %v2426_v34, 0.0  ;;  %v2356_v50 = vmul.f32 %v4037_v42, %v1529_v32  ;;  %v3257_v32 = vld [vmem:[%s4491_s0 + $0x36c] ss:$16 sps:$4 sm:$0xff]  }
 0x10e   :  { %v1242_v22 = vpop.f32.mrf.mxu0  ;;  %v1531_v46 = vpop.f32.mrf.mxu1 }
 0x10f   :  { %v4118_v16 = vpack.c.bf16 %v2490_v20, %v2489_v59  ;;  %v1532_v51 = vadd.f32 %v1531_v46, %v1242_v22  ;;  %v2427_v62 = vadd.f32 %v4095_v29, %v2356_v50 }
 0x110   :  { %v1244_v34 = vpop.f32.mrf.mxu0  ;;  %v1533_v42 = vpop.f32.mrf.mxu1 }
 0x111   :  { %v2357_v63 = vmul.f32 %v4048_v58, %v1532_v51  ;;  %v2491_v13 = vmax.f32 %v2427_v62, 0.0  ;;  %v3259_v58 = vld [vmem:[%s4491_s0 + $0x360] ss:$16 sps:$4 sm:$0xff]  }
 0x112   :  { %v1247_v24 = vpop.f32.mrf.mxu0  ;;  %1438 = vmatmul.mubr.bf16.gmra.mxu0 %v3253_v9  ;;  %v1536_v53 = vpop.f32.mrf.mxu1  ;;  %1727 = vmatmul.mubr.bf16.gmra.mxu1 %v3254_v47  ;;  %v3260_v9 = vld [vmem:[%s4491_s0 + $0x368] ss:$16 sps:$4 sm:$0xff]   ;;  %v3263_v47 = vld [vmem:[%s4491_s0 + $0x384] ss:$16 sps:$4 sm:$0xff]  }
 0x113   :  { %1445 = vmatprep.mubr.bf16.mxu0 %v3255_v30  ;;  %v2428_v15 = vadd.f32 %v4095_v29, %v2357_v63  ;;  %v1537_v28 = vadd.f32 %v1536_v53, %v1247_v24  ;;  %1734 = vmatprep.mubr.bf16.mxu1 %v3257_v32 }
 0x114   :  { %v1249_v43 = vpop.f32.mrf.mxu0  ;;  %v1538_v22 = vpop.f32.mrf.mxu1 }
 0x115   :  { %v2492_v59 = vmax.f32 %v2428_v15, 0.0  ;;  %v2358_v20 = vmul.f32 %v3997_v57, %v1537_v28  ;;  %v3266_v57 = vld [vmem:[%s4491_s0 + $0x38c] ss:$16 sps:$4 sm:$0xff]  }
 0x116   :  { %v1250_v46 = vpop.f32.mrf.mxu0  ;;  %v1539_v50 = vpop.f32.mrf.mxu1 }
 0x117   :  { %v4136_v30 = vpack.c.bf16 %v2492_v59, %v2491_v13  ;;  %v1540_v51 = vadd.f32 %v1539_v50, %v1250_v46  ;;  %v2429_v42 = vadd.f32 %v4095_v29, %v2358_v20  ;;  %v3269_v50 = vld [vmem:[%s4491_s0 + $0x3a4] ss:$16 sps:$4 sm:$0xff]  }
 0x118   :  { %v1252_v34 = vpop.f32.mrf.mxu0  ;;  %v1541_v32 = vpop.f32.mrf.mxu1 }
 0x119   :  { %v2359_v62 = vmul.f32 %v4008_v2, %v1540_v51  ;;  %v2493_v22 = vmax.f32 %v2429_v42, 0.0  ;;  %v3261_v2 = vld [vmem:[%s4491_s0 + $0x380] ss:$16 sps:$4 sm:$0xff]  }
 0x11a   :  { %v1255_v63 = vpop.f32.mrf.mxu0  ;;  %1446 = vmatmul.mubr.bf16.gmra.mxu0 %v3259_v58  ;;  %v1544_v24 = vpop.f32.mrf.mxu1  ;;  %1735 = vmatmul.mubr.bf16.gmra.mxu1 %v3260_v9  ;;  %v3264_v58 = vld [vmem:[%s4491_s0 + $0x388] ss:$16 sps:$4 sm:$0xff]  }
 0x11b   :  { %1453 = vmatprep.mubr.bf16.mxu0 %v3263_v47  ;;  %v2430_v53 = vadd.f32 %v4095_v29, %v2359_v62  ;;  %v1545_v15 = vadd.f32 %v1544_v24, %v1255_v63  ;;  %1742 = vmatprep.mubr.bf16.mxu1 %v3266_v57 }
 0x11c   :  { %v1257_v28 = vpop.f32.mrf.mxu0  ;;  %v1546_v43 = vpop.f32.mrf.mxu1 }
 0x11d   :  { %v2494_v13 = vmax.f32 %v2430_v53, 0.0  ;;  %v2360_v59 = vmul.f32 %v3957_v25, %v1545_v15  ;;  %v3272_v25 = vld [vmem:[%s4491_s0 + $0x3ac] ss:$16 sps:$4 sm:$0xff]  }
 0x11e   :  { %v1258_v46 = vpop.f32.mrf.mxu0  ;;  %v1547_v20 = vpop.f32.mrf.mxu1 }
 0x11f   :  { %v4154_v9 = vpack.c.bf16 %v2494_v13, %v2493_v22  ;;  %v1548_v47 = vadd.f32 %v1547_v20, %v1258_v46  ;;  %v2431_v57 = vadd.f32 %v4095_v29, %v2360_v59  ;;  %v3270_v46 = vld [vmem:[%s4491_s0 + $0x3a8] ss:$16 sps:$4 sm:$0xff]  }
 0x120   :  { %v1260_v51 = vpop.f32.mrf.mxu0  ;;  %v1549_v34 = vpop.f32.mrf.mxu1 }
 0x121   :  { %v2361_v32 = vmul.f32 %v3968_v33, %v1548_v47  ;;  %v2495_v28 = vmax.f32 %v2431_v57, 0.0  ;;  %v3267_v33 = vld [vmem:[%s4491_s0 + $0x3a0] ss:$16 sps:$4 sm:$0xff]  }
 0x122   :  { %v1263_v42 = vpop.f32.mrf.mxu0  ;;  %1454 = vmatmul.mubr.bf16.gmra.mxu0 %v3261_v2  ;;  %v1552_v62 = vpop.f32.mrf.mxu1  ;;  %1743 = vmatmul.mubr.bf16.gmra.mxu1 %v3264_v58  ;;  %v3275_v2 = vld [vmem:[%s4491_s0 + $0x3c4] ss:$16 sps:$4 sm:$0xff]  }
 0x123   :  { %1461 = vmatprep.mubr.bf16.mxu0 %v3269_v50  ;;  %v2432_v63 = vadd.f32 %v4095_v29, %v2361_v32  ;;  %v1553_v24 = vadd.f32 %v1552_v62, %v1263_v42  ;;  %1750 = vmatprep.mubr.bf16.mxu1 %v3272_v25 }
 0x124   :  { %v1265_v53 = vpop.f32.mrf.mxu0  ;;  %v1554_v15 = vpop.f32.mrf.mxu1 }
 0x125   :  { %v2496_v43 = vmax.f32 %v2432_v63, 0.0  ;;  %v2362_v22 = vmul.f32 %v3917_v1, %v1553_v24  ;;  %v3278_v1 = vld [vmem:[%s4491_s0 + $0x3cc] ss:$16 sps:$4 sm:$0xff]  }
 0x126   :  { %v1266_v13 = vpop.f32.mrf.mxu0  ;;  %v1555_v59 = vpop.f32.mrf.mxu1 }
 0x127   :  { %v4172_v20 = vpack.c.bf16 %v2496_v43, %v2495_v28  ;;  %v1556_v58 = vadd.f32 %v1555_v59, %v1266_v13  ;;  %v2433_v51 = vadd.f32 %v4095_v29, %v2362_v22  ;;  %v3276_v22 = vld [vmem:[%s4491_s0 + $0x3c8] ss:$16 sps:$4 sm:$0xff]   ;;  %v3281_v13 = vld [vmem:[%s4491_s0 + $0x3e4] ss:$16 sps:$4 sm:$0xff]  }
 0x128   :  { %v1268_v50 = vpop.f32.mrf.mxu0  ;;  %v1557_v47 = vpop.f32.mrf.mxu1 }
 0x129   :  { %v2363_v25 = vmul.f32 %v3928_v4, %v1556_v58  ;;  %v2497_v24 = vmax.f32 %v2433_v51, 0.0  ;;  %v3273_v4 = vld [vmem:[%s4491_s0 + $0x3c0] ss:$16 sps:$4 sm:$0xff]  }
 0x12a   :  { %v1271_v34 = vpop.f32.mrf.mxu0  ;;  %1462 = vmatmul.mubr.bf16.gmra.mxu0 %v3267_v33  ;;  %v1560_v57 = vpop.f32.mrf.mxu1  ;;  %1751 = vmatmul.mubr.bf16.gmra.mxu1 %v3270_v46 }
 0x12b   :  { %1469 = vmatprep.mubr.bf16.mxu0 %v3275_v2  ;;  %v2434_v32 = vadd.f32 %v4095_v29, %v2363_v25  ;;  %v1561_v42 = vadd.f32 %v1560_v57, %v1271_v34  ;;  %1758 = vmatprep.mubr.bf16.mxu1 %v3278_v1 }
 0x12c   :  { %v1273_v62 = vpop.f32.mrf.mxu0  ;;  %v1562_v63 = vpop.f32.mrf.mxu1 }
 0x12d   :  { %v2498_v53 = vmax.f32 %v2434_v32, 0.0  ;;  %v2364_v15 = vmul.f32 %v3877_v48, %v1561_v42  ;;  %v3284_v48 = vld [vmem:[%s4491_s0 + $0x3ec] ss:$16 sps:$4 sm:$0xff]  }
 0x12e   :  { %v1274_v28 = vpop.f32.mrf.mxu0  ;;  %v1563_v43 = vpop.f32.mrf.mxu1 }
 0x12f   :  { %v4190_v33 = vpack.c.bf16 %v2498_v53, %v2497_v24  ;;  %v1564_v59 = vadd.f32 %v1563_v43, %v1274_v28  ;;  %v2435_v58 = vadd.f32 %v4095_v29, %v2364_v15  ;;  %v3282_v53 = vld [vmem:[%s4491_s0 + $0x3e8] ss:$16 sps:$4 sm:$0xff]  }
 0x130   :  { %v1276_v46 = vpop.f32.mrf.mxu0  ;;  %v1565_v2 = vpop.f32.mrf.mxu1 }
 0x131   :  { %v2365_v50 = vmul.f32 %v3888_v52, %v1564_v59  ;;  %v2499_v32 = vmax.f32 %v2435_v58, 0.0  ;;  %v3279_v52 = vld [vmem:[%s4491_s0 + $0x3e0] ss:$16 sps:$4 sm:$0xff]  }
 0x132   :  { %v1279_v1 = vpop.f32.mrf.mxu0  ;;  %1470 = vmatmul.mubr.bf16.gmra.mxu0 %v3273_v4  ;;  %v1568_v47 = vpop.f32.mrf.mxu1  ;;  %1759 = vmatmul.mubr.bf16.gmra.mxu1 %v3276_v22 }
 0x133   :  { %1477 = vmatprep.mubr.bf16.mxu0 %v3281_v13  ;;  %v2436_v51 = vadd.f32 %v4095_v29, %v2365_v50  ;;  %v1569_v25 = vadd.f32 %v1568_v47, %v1279_v1  ;;  %1766 = vmatprep.mubr.bf16.mxu1 %v3284_v48 }
 0x134   :  { %v1281_v34 = vpop.f32.mrf.mxu0  ;;  %v1570_v57 = vpop.f32.mrf.mxu1 }
 0x135   :  { %v2500_v42 = vmax.f32 %v2436_v51, 0.0  ;;  %v2366_v62 = vmul.f32 %v3834_v31, %v1569_v25 }
 0x136   :  { %v1282_v63 = vpop.f32.mrf.mxu0  ;;  %v1571_v24 = vpop.f32.mrf.mxu1 }
 0x137   :  { %v4205_v15 = vpack.c.bf16 %v2500_v42, %v2499_v32  ;;  %v1572_v28 = vadd.f32 %v1571_v24, %v1282_v63  ;;  %v2437_v22 = vadd.f32 %v4095_v29, %v2366_v62 }
 0x138   :  { %v1284_v4 = vpop.f32.mrf.mxu0  ;;  %v1573_v43 = vpop.f32.mrf.mxu1 }
 0x139   :  { %v2367_v13 = vmul.f32 %v3845_v35, %v1572_v28  ;;  %v2501_v50 = vmax.f32 %v2437_v22, 0.0 }
 0x13a   :  { %v1287_v31 = vpop.f32.mrf.mxu0  ;;  %1478 = vmatmul.mubr.bf16.gmra.mxu0 %v3279_v52  ;;  %v1576_v59 = vpop.f32.mrf.mxu1  ;;  %1767 = vmatmul.mubr.bf16.gmra.mxu1 %v3282_v53 }
 0x13b   :  { %v2438_v46 = vadd.f32 %v4095_v29, %v2367_v13  ;;  %v1577_v48 = vadd.f32 %v1576_v59, %v1287_v31 }
 0x13c   :  { %v1289_v2 = vpop.f32.mrf.mxu0  ;;  %v1578_v58 = vpop.f32.mrf.mxu1 }
 0x13d   :  { %v2502_v1 = vmax.f32 %v2438_v46, 0.0  ;;  %v2368_v47 = vmul.f32 %v3791_v14, %v1577_v48 }
 0x13e   :  { %v1290_v51 = vpop.f32.mrf.mxu0  ;;  %v1579_v25 = vpop.f32.mrf.mxu1 }
 0x13f   :  { %v4211_v34 = vpack.c.bf16 %v2502_v1, %v2501_v50  ;;  %v1580_v57 = vadd.f32 %v1579_v25, %v1290_v51  ;;  %v2439_v42 = vadd.f32 %v4095_v29, %v2368_v47 }
 0x140   :  { %v1292_v32 = vpop.f32.mrf.mxu0  ;;  %v1581_v35 = vpop.f32.mrf.mxu1 }
 0x141   :  { %v2369_v62 = vmul.f32 %v3805_v19, %v1580_v57  ;;  %v2503_v43 = vmax.f32 %v2439_v42, 0.0 }
 0x142   :  { %v1295_v63 = vpop.f32.mrf.mxu0  ;;  %v1584_v52 = vpop.f32.mrf.mxu1 }
 0x143   :  { %v2440_v24 = vadd.f32 %v4095_v29, %v2369_v62  ;;  %v1585_v53 = vadd.f32 %v1584_v52, %v1295_v63 }
 0x144   :  { %v1297_v28 = vpop.f32.mrf.mxu0  ;;  %v1586_v4 = vpop.f32.mrf.mxu1 }
 0x145   :  { %v2504_v14 = vmax.f32 %v2440_v24, 0.0  ;;  %v2370_v22 = vmul.f32 %v4063_v18, %v1585_v53 }
 0x146   :  { %v1298_v13 = vpop.f32.mrf.mxu0  ;;  %v1587_v31 = vpop.f32.mrf.mxu1 }
 0x147   :  { %v4217_v59 = vpack.c.bf16 %v2504_v14, %v2503_v43  ;;  %v1588_v46 = vadd.f32 %v1587_v31, %v1298_v13  ;;  %v2441_v19 = vadd.f32 %v4095_v29, %v2370_v22 }
 0x148   :  { %v1300_v48 = vpop.f32.mrf.mxu0  ;;  %v1589_v2 = vpop.f32.mrf.mxu1 }
 0x149   :  { %v2371_v58 = vmul.f32 %v4071_v45, %v1588_v46  ;;  %v2505_v32 = vmax.f32 %v2441_v19, 0.0 }
 0x14a   :  { %v1303_v50 = vpop.f32.mrf.mxu0  ;;  %v1592_v1 = vpop.f32.mrf.mxu1 }
 0x14b   :  { %v2442_v47 = vadd.f32 %v4095_v29, %v2371_v58  ;;  %v1593_v51 = vadd.f32 %v1592_v1, %v1303_v50 }
 0x14c   :  { %v1305_v25 = vpop.f32.mrf.mxu0  ;;  %v1594_v57 = vpop.f32.mrf.mxu1 }
 0x14d   :  { %v2506_v18 = vmax.f32 %v2442_v47, 0.0  ;;  %v2372_v35 = vmul.f32 %v4017_v12, %v1593_v51 }
 0x14e   :  { %v1306_v42 = vpop.f32.mrf.mxu0  ;;  %v1595_v62 = vpop.f32.mrf.mxu1 }
 0x14f   :  { %v1596_v63 = vadd.f32 %v1595_v62, %v1306_v42  ;;  %v4223_v24 = vpack.c.bf16 %v2506_v18, %v2505_v32  ;;  %v2443_v45 = vadd.f32 %v4095_v29, %v2372_v35 }
 0x150   :  { %v1308_v52 = vpop.f32.mrf.mxu0  ;;  %v1597_v53 = vpop.f32.mrf.mxu1 }
 0x151   :  { %v2373_v28 = vmul.f32 %v4028_v26, %v1596_v63  ;;  %v2507_v12 = vmax.f32 %v2443_v45, 0.0 }
 0x152   :  { %v4227_v4 = vpop.f32.mrf.mxu0  ;;  %v4229_v43 = vpop.f32.mrf.mxu1 }
 0x153   :  { %v2444_v14 = vadd.f32 %v4095_v29, %v2373_v28 }
 0x154   :  { %v1313_v22 = vpop.f32.mrf.mxu0  ;;  %v1602_v13 = vpop.f32.mrf.mxu1 }
 0x155   :  { %v2508_v31 = vmax.f32 %v2444_v14, 0.0 }
 0x156   :  { %v4232_v46 = vpop.f32.mrf.mxu0  ;;  %v4234_v48 = vpop.f32.mrf.mxu1 }
 0x157   :  { %v4236_v19 = vpack.c.bf16 %v2508_v31, %v2507_v12 }
 0x158   :  { %v1316_v2 = vpop.f32.mrf.mxu0  ;;  %v1605_v58 = vpop.f32.mrf.mxu1 }
 0x15a   :  { %v4238_v50 = vpop.f32.mrf.mxu0  ;;  %v4240_v26 = vpop.f32.mrf.mxu1 }
 0x15c   :  { %v1321_v1 = vpop.f32.mrf.mxu0  ;;  %v1610_v47 = vpop.f32.mrf.mxu1 }
 0x15e   :  { %v4242_v51 = vpop.f32.mrf.mxu0  ;;  %v4244_v25 = vpop.f32.mrf.mxu1 }
 0x160   :  { %v1324_v57 = vpop.f32.mrf.mxu0  ;;  %v1613_v32 = vpop.f32.mrf.mxu1 }
 0x162   :  { %v1327_v18 = vpop.f32.mrf.mxu0  ;;  %v1616_v35 = vpop.f32.mrf.mxu1 }
 0x164   :  { %v1329_v42 = vpop.f32.mrf.mxu0  ;;  %v1618_v62 = vpop.f32.mrf.mxu1 }
 0x166   :  { %v1330_v63 = vpop.f32.mrf.mxu0  ;;  %v1619_v52 = vpop.f32.mrf.mxu1 }
 0x168   :  { %v1332_v53 = vpop.f32.mrf.mxu0  ;;  %v1621_v45 = vpop.f32.mrf.mxu1 }
 0x16a   :  { %v1335_v28 = vpop.f32.mrf.mxu0  ;;  %v1624_v14 = vpop.f32.mrf.mxu1 }
 0x16b   :  { %v1625_v22 = vadd.f32 %v1624_v14, %v1335_v28 }
 0x16c   :  { %v1337_v13 = vpop.f32.mrf.mxu0  ;;  %v1626_v12 = vpop.f32.mrf.mxu1 }
 0x16d   :  { %v2380_v31 = vmul.f32 %v3854_v39, %v1625_v22 }
 0x16e   :  { %v1338_v2 = vpop.f32.mrf.mxu0  ;;  %v1627_v58 = vpop.f32.mrf.mxu1 }
 0x16f   :  { %v1628_v1 = vadd.f32 %v1627_v58, %v1338_v2  ;;  %v2451_v32 = vadd.f32 %v4095_v29, %v2380_v31 }
 0x170   :  { %v1340_v47 = vpop.f32.mrf.mxu0  ;;  %v1629_v57 = vpop.f32.mrf.mxu1 }
 0x171   :  { %v2381_v42 = vmul.f32 %v3868_v44, %v1628_v1  ;;  %v2515_v28 = vmax.f32 %v2451_v32, 0.0 }
 0x172   :  { %v1343_v62 = vpop.f32.mrf.mxu0  ;;  %v1632_v21 = vpop.f32.mrf.mxu1 }
 0x173   :  { %v2452_v53 = vadd.f32 %v4095_v29, %v2381_v42  ;;  %v1633_v31 = vadd.f32 %v1632_v21, %v1343_v62 }
 0x174   :  { %v1345_v45 = vpop.f32.mrf.mxu0  ;;  %v1634_v38 = vpop.f32.mrf.mxu1 }
 0x175   :  { %v2516_v14 = vmax.f32 %v2452_v53, 0.0  ;;  %v2382_v53 = vmul.f32 %v3814_v23, %v1633_v31 }
 0x176   :  { %v1346_v13 = vpop.f32.mrf.mxu0  ;;  %v1635_v12 = vpop.f32.mrf.mxu1 }
 0x177   :  { %v4250_v22 = vpack.c.bf16 %v2516_v14, %v2515_v28  ;;  %v1636_v58 = vadd.f32 %v1635_v12, %v1346_v13  ;;  %v1620_v28 = vadd.f32 %v1619_v52, %v1330_v63  ;;  %v1612_v63 = vadd.f32 %v4244_v25, %v4242_v51 }
 0x178   :  { %v1348_v39 = vpop.f32.mrf.mxu0  ;;  %v1637_v2 = vpop.f32.mrf.mxu1 }
 0x179   :  { %v2383_v55 = vmul.f32 %v3825_v27, %v1636_v58  ;;  %v1617_v27 = vadd.f32 %v1616_v35, %v1327_v18  ;;  %v2379_v52 = vmul.f32 %v3908_v60, %v1620_v28  ;;  %v1609_v18 = vadd.f32 %v4240_v26, %v4238_v50 }
 0x17a   :  { %v1351_v47 = vpop.f32.mrf.mxu0  ;;  %v1640_v57 = vpop.f32.mrf.mxu1  ;;  %v1604_v60 = vadd.f32 %v4234_v48, %v4232_v46  ;;  %v2377_v51 = vmul.f32 %v3948_v17, %v1612_v63 }
 0x17b   :  { %v1641_v37 = vadd.f32 %v1640_v57, %v1351_v47  ;;  %v2454_v13 = vadd.f32 %v4095_v29, %v2383_v55  ;;  %v2197_v47 = vpop.permute.xlu0 %2196  ;;  %v2450_v28 = vadd.f32 %v4095_v29, %v2379_v52 }
 0x17c   :  { %v1353_v44 = vpop.f32.mrf.mxu0  ;;  %v1642_v1 = vpop.f32.mrf.mxu1 }
 0x17d   :  { %v2384_v42 = vmul.f32 %v3768_v5, %v1641_v37  ;;  %v2453_v5 = vadd.f32 %v4095_v29, %v2382_v53  ;;  %v2518_v57 = vmax.f32 %v2454_v13, 0.0 }
 0x17e   :  { %v1354_v38 = vpop.f32.mrf.mxu0  ;;  %v1643_v32 = vpop.f32.mrf.mxu1 }
 0x17f   :  { %v1644_v45 = vadd.f32 %v1643_v32, %v1354_v38  ;;  %v2455_v12 = vadd.f32 %v4095_v29, %v2384_v42  ;;  %v2202_v42 = vpop.permute.xlu1 %2201  ;;  %v2378_v38 = vmul.f32 %v3897_v56, %v1617_v27  ;;  %v2517_v32 = vmax.f32 %v2453_v5, 0.0 }
 0x180   :  { %v1356_v39 = vpop.f32.mrf.mxu0  ;;  %v1645_v14 = vpop.f32.mrf.mxu1  ;;  %v1601_v56 = vadd.f32 %v4229_v43, %v4227_v4  ;;  %v2514_v5 = vmax.f32 %v2450_v28, 0.0 }
 0x181   :  { %v2385_v21 = vmul.f32 %v3784_v11, %v1644_v45  ;;  %v2519_v31 = vmax.f32 %v2455_v12, 0.0  ;;  %v2570_v26 = vpack.c.bf16 %v2518_v57, %v2517_v32  ;;  %v2449_v46 = vadd.f32 %v4095_v29, %v2378_v38 }
 0x182   :  { %v1359_v62 = vpop.f32.mrf.mxu0  ;;  %v1648_v2 = vpop.f32.mrf.mxu1 }
 0x183   :  { %v2456_v37 = vadd.f32 %v4095_v29, %v2385_v21  ;;  %v1649_v58 = vadd.f32 %v1648_v2, %v1359_v62  ;;  %v2376_v21 = vmul.f32 %v3937_v10, %v1609_v18  ;;  %v2375_v2 = vmul.f32 %v3988_v49, %v1604_v60 }
 0x184   :  { %v1361_v23 = vpop.f32.mrf.mxu0  ;;  %v1650_v55 = vpop.f32.mrf.mxu1  ;;  %v2374_v10 = vmul.f32 %v3977_v41, %v1601_v56  ;;  %v2513_v63 = vmax.f32 %v2449_v46, 0.0 }
 0x185   :  { %v2520_v44 = vmax.f32 %v2456_v37, 0.0  ;;  %v2386_v11 = vmul.f32 %v2197_v47, %v1649_v58  ;;  %v2448_v47 = vadd.f32 %v4095_v29, %v2377_v51  ;;  %v2447_v23 = vadd.f32 %v4095_v29, %v2376_v21 }
 0x186   :  { %v1362_v1 = vpop.f32.mrf.mxu0  ;;  %v1651_v35 = vpop.f32.mrf.mxu1  ;;  %v2446_v57 = vadd.f32 %v4095_v29, %v2375_v2  ;;  %v2445_v18 = vadd.f32 %v4095_v29, %v2374_v10 }
 0x187   :  { %v1652_v53 = vadd.f32 %v1651_v35, %v1362_v1  ;;  %v2571_v39 = vpack.c.bf16 %v2520_v44, %v2519_v31  ;;  %v2457_v14 = vadd.f32 %v4095_v29, %v2386_v11  ;;  %v2512_v44 = vmax.f32 %v2448_v47, 0.0 }
 0x188   :  { %v1364_v45 = vpop.f32.mrf.mxu0  ;;  %v1653_v25 = vpop.f32.mrf.mxu1  ;;  %v2568_v1 = vpack.c.bf16 %v2514_v5, %v2513_v63  ;;  %v2511_v35 = vmax.f32 %v2447_v23, 0.0  ;;  %v2510_v32 = vmax.f32 %v2446_v57, 0.0 }
 0x189   :  { %v2387_v13 = vmul.f32 %v2202_v42, %v1652_v53  ;;  %2960 = vmatprep.subr.bf16.mxu0 %v2571_v39  ;;  %v2521_v37 = vmax.f32 %v2457_v14, 0.0 }
 0x18a   :  { %v1367_v50 = vpop.f32.mrf.mxu0  ;;  %v1656_v12 = vpop.f32.mrf.mxu1  ;;  %2961 = vmatpush3.bf16.msra.mxu0 %v4217_v59  ;;  %v2567_v51 = vpack.c.bf16 %v2512_v44, %v2511_v35 }
 0x18b   :  { %v2458_v17 = vadd.f32 %v4095_v29, %v2387_v13  ;;  %v1657_v48 = vadd.f32 %v1656_v12, %v1367_v50  ;;  %2962 = vmatprep.subr.bf16.mxu0 %v2570_v26 }
 0x18c   :  { %v1369_v62 = vpop.f32.mrf.mxu0  ;;  %v1658_v27 = vpop.f32.mrf.mxu1 }
 0x18d   :  { %v2522_v4 = vmax.f32 %v2458_v17, 0.0  ;;  %v2388_v43 = vmul.f32 %v4053_v61, %v1657_v48 }
 0x18e   :  { %v1370_v59 = vpop.f32.mrf.mxu0  ;;  %v1659_v58 = vpop.f32.mrf.mxu1  ;;  %2963 = vmatpush3.bf16.msra.mxu0 %v4211_v34 }
 0x18f   :  { %v4283_v52 = vpack.c.bf16 %v2522_v4, %v2521_v37  ;;  %v1660_v49 = vadd.f32 %v1659_v58, %v1370_v59  ;;  %2964 = vmatprep.subr.bf16.mxu0 %v4250_v22  ;;  %v2459_v61 = vadd.f32 %v4095_v29, %v2388_v43  ;;  %v2554_v4 = vld [vmem:[%s4494_s4] sm:$0xff] }
 0x190   :  { %v1372_v55 = vpop.f32.mrf.mxu0  ;;  %v1661_v31 = vpop.f32.mrf.mxu1  ;;  %v2956_v59 = vcombine.high %v2554_v4, %v2554_v4 }
 0x191   :  { %v2389_v41 = vmul.f32 %v4055_v0, %v1660_v49  ;;  %v2523_v45 = vmax.f32 %v2459_v61, 0.0  ;;  %v2955_v61 = vcombine.low %v2554_v4, %v2554_v4 }
 0x192   :  { %v1375_v11 = vpop.f32.mrf.mxu0  ;;  %v1664_v34 = vpop.f32.mrf.mxu1  ;;  %2965 = vmatpush3.bf16.msra.mxu0 %v4205_v15  ;;  %v2509_v15 = vmax.f32 %v2445_v18, 0.0  ;;  %2634 = vmatprep.mubr.bf16.mxu0 %v2956_v59 }
 0x193   :  { %v2460_v42 = vadd.f32 %v4095_v29, %v2389_v41  ;;  %v1665_v22 = vadd.f32 %v1664_v34, %v1375_v11  ;;  %2966 = vmatprep.subr.bf16.mxu0 %v2568_v1 }
 0x194   :  { %v1377_v38 = vpop.f32.mrf.mxu0  ;;  %v1666_v53 = vpop.f32.mrf.mxu1  ;;  %v2566_v21 = vpack.c.bf16 %v2510_v32, %v2509_v15 }
 0x195   :  { %v2524_v39 = vmax.f32 %v2460_v42, 0.0  ;;  %v2390_v60 = vmul.f32 %v4013_v3, %v1665_v22  ;;  %v3291_v22 = vmov 0.0   ;;  %v2708_v38 = vld [vmem:[%s4495_s6 + $0x70] sm:$0xff] }
 0x196   :  { %v1378_v0 = vpop.f32.mrf.mxu0  ;;  %v1667_v25 = vpop.f32.mrf.mxu1  ;;  %2967 = vmatpush3.bf16.msra.mxu0 %v4190_v33 }
 0x197   :  { %v4294_v28 = vpack.c.bf16 %v2524_v39, %v2523_v45  ;;  %v1668_v14 = vadd.f32 %v1667_v25, %v1378_v0  ;;  %2968 = vmatprep.subr.bf16.mxu0 %v2567_v51  ;;  %v2461_v26 = vadd.f32 %v4095_v29, %v2390_v60  ;;  %v2707_v39 = vld [vmem:[%s4495_s6 + $0x68] sm:$0xff] }
 0x198   :  { %v1380_v13 = vpop.f32.mrf.mxu0  ;;  %v1669_v50 = vpop.f32.mrf.mxu1 }
 0x199   :  { %v2391_v56 = vmul.f32 %v4015_v6, %v1668_v14  ;;  %v2525_v62 = vmax.f32 %v2461_v26, 0.0  ;;  %v2706_v14 = vld [vmem:[%s4495_s6 + $0x60] sm:$0xff] }
 0x19a   :  { %v1383_v12 = vpop.f32.mrf.mxu0  ;;  %v1672_v46 = vpop.f32.mrf.mxu1  ;;  %2969 = vmatpush3.bf16.msra.mxu0 %v4172_v20 }
 0x19b   :  { %v2462_v3 = vadd.f32 %v4095_v29, %v2391_v56  ;;  %v1673_v17 = vadd.f32 %v1672_v46, %v1383_v12  ;;  %2970 = vmatprep.subr.bf16.mxu0 %v2566_v21  ;;  %v4519_v21 = vld [vmem:[#allocation14_spill] sm:$0xff] }
 0x19c   :  { %v1385_v33 = vpop.f32.mrf.mxu0  ;;  %v1674_v48 = vpop.f32.mrf.mxu1 }
 0x19d   :  { %v2526_v2 = vmax.f32 %v2462_v3, 0.0  ;;  %v2392_v47 = vmul.f32 %v3973_v36, %v1673_v17  ;;  %v2704_v33 = vld [vmem:[%s4495_s6 + $0x50] sm:$0xff] }
 0x19e   :  { %v1386_v27 = vpop.f32.mrf.mxu0  ;;  %v1675_v5 = vpop.f32.mrf.mxu1  ;;  %2971 = vmatpush3.bf16.msra.mxu0 %v4154_v9 }
 0x19f   :  { %v4302_v6 = vpack.c.bf16 %v2526_v2, %v2525_v62  ;;  %v1676_v37 = vadd.f32 %v1675_v5, %v1386_v27  ;;  %2972 = vmatprep.subr.bf16.mxu0 %v4236_v19  ;;  %v2463_v10 = vadd.f32 %v4095_v29, %v2392_v47  ;;  %v2703_v27 = vld [vmem:[%s4495_s6 + $0x48] sm:$0xff] }
 0x1a0   :  { %v1388_v20 = vpop.f32.mrf.mxu0  ;;  %v1677_v43 = vpop.f32.mrf.mxu1 }
 0x1a1   :  { %v2393_v36 = vmul.f32 %v3975_v40, %v1676_v37  ;;  %v2527_v55 = vmax.f32 %v2463_v10, 0.0  ;;  %v4317_v40 = vld [vmem:[%s4494_s4 + $0x8] sm:$0xff]  ;;  %v4520_v20 = vld [vmem:[#allocation10_spill] sm:$0xff]  ;;  %v2702_v10 = vld [vmem:[%s4495_s6 + $0x40] sm:$0xff] }
 0x1a2   :  { %v1391_v58 = vpop.f32.mrf.mxu0  ;;  %v1680_v23 = vpop.f32.mrf.mxu1  ;;  %2973 = vmatpush3.bf16.msra.mxu0 %v4136_v30  ;;  %v2958_v41 = vcombine.high %v4317_v40, %v4317_v40 }
 0x1a3   :  { %v2464_v9 = vadd.f32 %v4095_v29, %v2393_v36  ;;  %v1681_v63 = vadd.f32 %v1680_v23, %v1391_v58  ;;  %2974 = vmatprep.subr.bf16.mxu0 %v4223_v24 }
 0x1a4   :  { %v1393_v19 = vpop.f32.mrf.mxu0  ;;  %v1682_v49 = vpop.f32.mrf.mxu1  ;;  %2674 = vmatprep.mubr.bf16.mxu1 %v2958_v41 }
 0x1a5   :  { %v2528_v57 = vmax.f32 %v2464_v9, 0.0  ;;  %v2394_v31 = vmul.f32 %v3933_v7, %v1681_v63  ;;  %v2701_v63 = vld [vmem:[%s4495_s6 + $0x38] sm:$0xff] }
 0x1a6   :  { %v1394_v44 = vpop.f32.mrf.mxu0  ;;  %v1683_v30 = vpop.f32.mrf.mxu1  ;;  %2975 = vmatpush3.bf16.msra.mxu0 %v4118_v16  ;;  %v2709_v16 = vld [vmem:[%s4495_s6 + $0x78] sm:$0xff] }
 0x1a7   :  { %v4322_v24 = vpack.c.bf16 %v2528_v57, %v2527_v55  ;;  %v1684_v11 = vadd.f32 %v1683_v30, %v1394_v44  ;;  %v2465_v7 = vadd.f32 %v4095_v29, %v2394_v31  ;;  %3021 = vmatprep.subr.mxu0 %v3291_v22  ;;  %v4521_v49 = vld [vmem:[#allocation11_spill] sm:$0xff]  ;;  %v2700_v44 = vld [vmem:[%s4495_s6 + $0x30] sm:$0xff] }
 0x1a8   :  { %v1396_v1 = vpop.f32.mrf.mxu0  ;;  %v1685_v34 = vpop.f32.mrf.mxu1 }
 0x1a9   :  { %v2395_v18 = vmul.f32 %v3935_v8, %v1684_v11  ;;  %2635 = vmatmul.mubr.bf16.vlgmr.msra.gmra.mxu0 %v2955_v61  ;;  %v2529_v60 = vmax.f32 %v2465_v7, 0.0  ;;  %v2699_v1 = vld [vmem:[%s4495_s6 + $0x28] sm:$0xff] }
 0x1aa   :  { %v1399_v35 = vpop.f32.mrf.mxu0  ;;  %v1688_v42 = vpop.f32.mrf.mxu1  ;;  %3022 = vmatpush3.msra.mxu0 %v2709_v16  ;;  %3053 = vmatprep.mubr.msk.f32.mxu0 %vm3292_vm0, %v3291_v22 }
 0x1ab   :  { %v2466_v32 = vadd.f32 %v4095_v29, %v2395_v18  ;;  %v1689_v53 = vadd.f32 %v1688_v42, %v1399_v35  ;;  %3023 = vmatprep.subr.mxu0 %v3291_v22  ;;  %v4522_v18 = vld [vmem:[#allocation6_spill] sm:$0xff] }
 0x1ac   :  { %v1401_v45 = vpop.f32.mrf.mxu0  ;;  %v1690_v8 = vpop.f32.mrf.mxu1  ;;  %3024 = vmatpush3.msra.mxu0 %v2708_v38 }
 0x1ad   :  { %v2530_v0 = vmax.f32 %v2466_v32, 0.0  ;;  %v2396_v51 = vmul.f32 %v3893_v54, %v1689_v53  ;;  %3025 = vmatprep.subr.mxu0 %v3291_v22  ;;  %v2705_v54 = vld [vmem:[%s4495_s6 + $0x58] sm:$0xff] }
 0x1ae   :  { %v1402_v25 = vpop.f32.mrf.mxu0  ;;  %v1691_v15 = vpop.f32.mrf.mxu1  ;;  %3026 = vmatpush3.msra.mxu0 %v2707_v39  ;;  %v4523_v39 = vld [vmem:[#allocation7_spill] sm:$0xff] }
 0x1af   :  { %v4343_v13 = vpack.c.bf16 %v2530_v0, %v2529_v60  ;;  %v1692_v50 = vadd.f32 %v1691_v15, %v1402_v25  ;;  %3027 = vmatprep.subr.mxu0 %v3291_v22  ;;  %v2467_v12 = vadd.f32 %v4095_v29, %v2396_v51  ;;  %v4392_v25 = vld [vmem:[%s4493_s3] ss:$0 sm:$0xff] }
 0x1b0   :  { %v1404_v26 = vpop.f32.mrf.mxu0  ;;  %v1693_v56 = vpop.f32.mrf.mxu1  ;;  %3028 = vmatpush3.msra.mxu0 %v2706_v14 }
 0x1b1   :  { %v2397_v46 = vmul.f32 %v4519_v21, %v1692_v50  ;;  %3029 = vmatprep.subr.mxu0 %v3291_v22  ;;  %v2531_v5 = vmax.f32 %v2467_v12, 0.0  ;;  %v4524_v12 = vld [vmem:[#allocation23_spill] sm:$0xff] }
 0x1b2   :  { %v1407_v3 = vpop.f32.mrf.mxu0  ;;  %v1696_v17 = vpop.f32.mrf.mxu1  ;;  %3030 = vmatpush3.msra.mxu0 %v2705_v54 }
 0x1b3   :  { %v2468_v48 = vadd.f32 %v4095_v29, %v2397_v46  ;;  %v1697_v62 = vadd.f32 %v1696_v17, %v1407_v3  ;;  %3031 = vmatprep.subr.mxu0 %v3291_v22 }
 0x1b4   :  { %v1409_v2 = vpop.f32.mrf.mxu0  ;;  %v1698_v47 = vpop.f32.mrf.mxu1  ;;  %3032 = vmatpush3.msra.mxu0 %v2704_v33 }
 0x1b5   :  { %v2532_v37 = vmax.f32 %v2468_v48, 0.0  ;;  %v2398_v4 = vmul.f32 %v4520_v20, %v1697_v62  ;;  %3033 = vmatprep.subr.mxu0 %v3291_v22  ;;  %v4525_v2 = vld [vmem:[#allocation24_spill] sm:$0xff] }
 0x1b6   :  { %v1410_v43 = vpop.f32.mrf.mxu0  ;;  %v1699_v59 = vpop.f32.mrf.mxu1  ;;  %3034 = vmatpush3.msra.mxu0 %v2703_v27 }
 0x1b7   :  { %v4365_v36 = vpack.c.bf16 %v2532_v37, %v2531_v5  ;;  %v1700_v58 = vadd.f32 %v1699_v59, %v1410_v43  ;;  %3035 = vmatprep.subr.mxu0 %v3291_v22  ;;  %v2469_v19 = vadd.f32 %v4095_v29, %v2398_v4 }
 0x1b8   :  { %v1412_v23 = vpop.f32.mrf.mxu0  ;;  %v1701_v9 = vpop.f32.mrf.mxu1  ;;  %3036 = vmatpush3.msra.mxu0 %v2702_v10 }
 0x1b9   :  { %v2399_v55 = vmul.f32 %v4521_v49, %v1700_v58  ;;  %3037 = vmatprep.subr.mxu0 %v3291_v22  ;;  %v2533_v34 = vmax.f32 %v2469_v19, 0.0  ;;  %v4526_v58 = vld [vmem:[#allocation21_spill] sm:$0xff] }
 0x1ba   :  { %v1415_v57 = vpop.f32.mrf.mxu0  ;;  %v1704_v31 = vpop.f32.mrf.mxu1  ;;  %3038 = vmatpush3.msra.mxu0 %v2701_v63 }
 0x1bb   :  { %v2470_v61 = vadd.f32 %v4095_v29, %v2399_v55  ;;  %v1705_v30 = vadd.f32 %v1704_v31, %v1415_v57  ;;  %3039 = vmatprep.subr.mxu0 %v3291_v22 }
 0x1bc   :  { %v1417_v41 = vpop.f32.mrf.mxu0  ;;  %v1706_v11 = vpop.f32.mrf.mxu1  ;;  %3040 = vmatpush3.msra.mxu0 %v2700_v44  ;;  %v4527_v44 = vld [vmem:[#allocation22_spill] sm:$0xff] }
 0x1bd   :  { %v2534_v7 = vmax.f32 %v2470_v61, 0.0  ;;  %v2400_v35 = vmul.f32 %v4522_v18, %v1705_v30  ;;  %3041 = vmatprep.subr.mxu0 %v3291_v22 }
 0x1be   :  { %v1418_v42 = vpop.f32.mrf.mxu0  ;;  %v1707_v16 = vpop.f32.mrf.mxu1  ;;  %3042 = vmatpush3.msra.mxu0 %v2699_v1 }
 0x1bf   :  { %v4384_v38 = vpack.c.bf16 %v2534_v7, %v2533_v34  ;;  %v1708_v32 = vadd.f32 %v1707_v16, %v1418_v42  ;;  %3043 = vmatprep.subr.mxu0 %v3291_v22  ;;  %v2471_v8 = vadd.f32 %v4095_v29, %v2400_v35 }
 0x1c0   :  { %v1420_v53 = vpop.f32.mrf.mxu0  ;;  %v1709_v45 = vpop.f32.mrf.mxu1 }
 0x1c1   :  { %v2401_v60 = vmul.f32 %v4523_v39, %v1708_v32  ;;  %v2535_v56 = vmax.f32 %v2471_v8, 0.0 }
 0x1c2   :  { %v1423_v0 = vpop.f32.mrf.mxu0  ;;  %v1712_v51 = vpop.f32.mrf.mxu1 }
 0x1c3   :  { %v2472_v15 = vadd.f32 %v4392_v25, %v2401_v60  ;;  %v1713_v14 = vadd.f32 %v1712_v51, %v1423_v0 }
 0x1c4   :  { %v1425_v50 = vpop.f32.mrf.mxu0  ;;  %v1714_v26 = vpop.f32.mrf.mxu1 }
 0x1c5   :  { %v2536_v54 = vmax.f32 %v2472_v15, 0.0  ;;  %v2402_v21 = vmul.f32 %v4524_v12, %v1713_v14 }
 0x1c6   :  { %v1426_v46 = vpop.f32.mrf.mxu0  ;;  %v1715_v29 = vpop.f32.mrf.mxu1 }
 0x1c7   :  { %v4396_v3 = vpack.c.bf16 %v2536_v54, %v2535_v56  ;;  %v1716_v17 = vadd.f32 %v1715_v29, %v1426_v46  ;;  %v2473_v62 = vadd.f32 %v4392_v25, %v2402_v21 }
 0x1c8   :  { %v1428_v33 = vpop.f32.mrf.mxu0  ;;  %v1717_v48 = vpop.f32.mrf.mxu1 }
 0x1c9   :  { %v2403_v47 = vmul.f32 %v4525_v2, %v1716_v17  ;;  %v2537_v59 = vmax.f32 %v2473_v62, 0.0 }
 0x1ca   :  { %v1431_v27 = vpop.f32.mrf.mxu0  ;;  %v1720_v5 = vpop.f32.mrf.mxu1 }
 0x1cb   :  { %v2474_v37 = vadd.f32 %v4392_v25, %v2403_v47  ;;  %v1721_v20 = vadd.f32 %v1720_v5, %v1431_v27 }
 0x1cc   :  { %v1433_v4 = vpop.f32.mrf.mxu0  ;;  %v1722_v43 = vpop.f32.mrf.mxu1 }
 0x1cd   :  { %v2538_v10 = vmax.f32 %v2474_v37, 0.0  ;;  %v2404_v23 = vmul.f32 %v4526_v58, %v1721_v20 }
 0x1ce   :  { %v1434_v9 = vpop.f32.mrf.mxu0  ;;  %v1723_v63 = vpop.f32.mrf.mxu1 }
 0x1cf   :  { %v1724_v19 = vadd.f32 %v1723_v63, %v1434_v9  ;;  %v4402_v55 = vpack.c.bf16 %v2538_v10, %v2537_v59  ;;  %v2475_v31 = vadd.f32 %v4392_v25, %v2404_v23 }
 0x1d0   :  { %v1436_v49 = vpop.f32.mrf.mxu0  ;;  %v1725_v57 = vpop.f32.mrf.mxu1 }
 0x1d1   :  { %v2405_v61 = vmul.f32 %v4527_v44, %v1724_v19  ;;  %v2539_v7 = vmax.f32 %v2475_v31, 0.0 }
 0x1d2   :  { %v4406_v30 = vpop.f32.mrf.mxu0  ;;  %v4408_v41 = vpop.f32.mrf.mxu1 }
 0x1d3   :  { %v2476_v11 = vadd.f32 %v4392_v25, %v2405_v61 }
 0x1d4   :  { %v1441_v1 = vpop.f32.mrf.mxu0  ;;  %v1730_v34 = vpop.f32.mrf.mxu1 }
 0x1d5   :  { %v2540_v18 = vmax.f32 %v2476_v11, 0.0  ;;  %v4528_v11 = vld [vmem:[#allocation9_spill] sm:$0xff]  ;;  %v4529_v34 = vld [vmem:[#allocation4_spill] sm:$0xff] }
 0x1d6   :  { %v4411_v35 = vpop.f32.mrf.mxu0  ;;  %v4413_v42 = vpop.f32.mrf.mxu1 }
 0x1d7   :  { %v4415_v32 = vpack.c.bf16 %v2540_v18, %v2539_v7 }
 0x1d8   :  { %v1444_v16 = vpop.f32.mrf.mxu0  ;;  %v1733_v53 = vpop.f32.mrf.mxu1 }
 0x1da   :  { %v4417_v45 = vpop.f32.mrf.mxu0  ;;  %v4419_v8 = vpop.f32.mrf.mxu1 }
 0x1dc   :  { %v1449_v39 = vpop.f32.mrf.mxu0  ;;  %v1738_v60 = vpop.f32.mrf.mxu1 }
 0x1dd   :  { %v4530_v39 = vld [vmem:[#allocation8_spill] sm:$0xff] }
 0x1de   :  { %v1450_v0 = vpop.f32.mrf.mxu0  ;;  %v1739_v51 = vpop.f32.mrf.mxu1 }
 0x1e0   :  { %v1452_v15 = vpop.f32.mrf.mxu0  ;;  %v1741_v14 = vpop.f32.mrf.mxu1 }
 0x1e2   :  { %v1455_v50 = vpop.f32.mrf.mxu0  ;;  %v1744_v26 = vpop.f32.mrf.mxu1 }
 0x1e4   :  { %v1457_v56 = vpop.f32.mrf.mxu0  ;;  %v1746_v54 = vpop.f32.mrf.mxu1 }
 0x1e6   :  { %v1458_v12 = vpop.f32.mrf.mxu0  ;;  %v1747_v21 = vpop.f32.mrf.mxu1 }
 0x1e7   :  { %v1748_v56 = vadd.f32 %v1747_v21, %v1458_v12 }
 0x1e8   :  { %v1460_v46 = vpop.f32.mrf.mxu0  ;;  %v1749_v29 = vpop.f32.mrf.mxu1 }
 0x1e9   :  { %v4531_v46 = vld [vmem:[#allocation13_spill] sm:$0xff] }
 0x1ea   :  { %v1463_v17 = vpop.f32.mrf.mxu0  ;;  %v1752_v33 = vpop.f32.mrf.mxu1 }
 0x1eb   :  { %v1753_v53 = vadd.f32 %v1752_v33, %v1463_v17  ;;  %v1740_v33 = vadd.f32 %v1739_v51, %v1450_v0  ;;  %v4536_v0 = vld [vmem:[#allocation18_spill] sm:$0xff] }
 0x1ec   :  { %v1465_v48 = vpop.f32.mrf.mxu0  ;;  %v1754_v62 = vpop.f32.mrf.mxu1 }
 0x1ed   :  { %v2409_v51 = vmul.f32 %v4536_v0, %v1740_v33 }
 0x1ee   :  { %v1466_v2 = vpop.f32.mrf.mxu0  ;;  %v1755_v47 = vpop.f32.mrf.mxu1 }
 0x1ef   :  { %v1756_v61 = vadd.f32 %v1755_v47, %v1466_v2  ;;  %v4532_v2 = vld [vmem:[#allocation5_spill] sm:$0xff] }
 0x1f0   :  { %v1468_v27 = vpop.f32.mrf.mxu0  ;;  %v1757_v5 = vpop.f32.mrf.mxu1 }
 0x1f1   :  { %v2413_v29 = vmul.f32 %v4531_v46, %v1756_v61  ;;  %v1745_v27 = vadd.f32 %v1744_v26, %v1455_v50  ;;  %v4533_v5 = vld [vmem:[#allocation12_spill] sm:$0xff] }
 0x1f2   :  { %v1471_v37 = vpop.f32.mrf.mxu0  ;;  %v1760_v20 = vpop.f32.mrf.mxu1  ;;  %v2694_v46 = vld [vmem:[%s4495_s6] sm:$0xff] }
 0x1f3   :  { %v1761_v49 = vadd.f32 %v1760_v20, %v1471_v37  ;;  %v2412_v37 = vmul.f32 %v4533_v5, %v1753_v53  ;;  %v2484_v12 = vadd.f32 %v4392_v25, %v2413_v29 }
 0x1f4   :  { %v1473_v4 = vpop.f32.mrf.mxu0  ;;  %v1762_v43 = vpop.f32.mrf.mxu1 }
 0x1f5   :  { %v2414_v60 = vmul.f32 %v4530_v39, %v1761_v49  ;;  %v4534_v4 = vld [vmem:[#allocation16_spill] sm:$0xff]  ;;  %v2483_v50 = vadd.f32 %v4392_v25, %v2412_v37 }
 0x1f6   :  { %v1474_v59 = vpop.f32.mrf.mxu0  ;;  %v1763_v10 = vpop.f32.mrf.mxu1  ;;  %v2411_v43 = vmul.f32 %v4534_v4, %v1748_v56 }
 0x1f7   :  { %v1764_v9 = vadd.f32 %v1763_v10, %v1474_v59  ;;  %v2485_v20 = vadd.f32 %v4392_v25, %v2414_v60 }
 0x1f8   :  { %v1476_v58 = vpop.f32.mrf.mxu0  ;;  %v1765_v23 = vpop.f32.mrf.mxu1  ;;  %v2482_v49 = vadd.f32 %v4392_v25, %v2411_v43 }
 0x1f9   :  { %v2415_v1 = vmul.f32 %v4528_v11, %v1764_v9  ;;  %v1737_v58 = vadd.f32 %v4419_v8, %v4417_v45  ;;  %v4535_v23 = vld [vmem:[#allocation15_spill] sm:$0xff]  ;;  %v2549_v26 = vmax.f32 %v2485_v20, 0.0  ;;  %v1729_v45 = vadd.f32 %v4408_v41, %v4406_v30  ;;  %v4537_v8 = vld [vmem:[#allocation17_spill] sm:$0xff]  ;;  %v2959_v20 = vld [vmem:[%s4496_s7] ss:$0 sm:$0xff] }
 0x1fa   :  { %v1479_v63 = vpop.f32.mrf.mxu0  ;;  %v1768_v19 = vpop.f32.mrf.mxu1  ;;  %v2410_v9 = vmul.f32 %v4535_v23, %v1745_v27  ;;  %v2547_v11 = vmax.f32 %v2483_v50, 0.0 }
 0x1fb   :  { %v1769_v57 = vadd.f32 %v1768_v19, %v1479_v63  ;;  %v2486_v48 = vadd.f32 %v4392_v25, %v2415_v1  ;;  %v1732_v19 = vadd.f32 %v4413_v42, %v4411_v35  ;;  %v4538_v1 = vld [vmem:[#allocation20_spill] sm:$0xff]  ;;  %v2480_v42 = vadd.f32 %v4392_v25, %v2409_v51  ;;  %v2691_v27 = vpop.permute.xlu0 %2690 }
 0x1fc   :  { %v1481_v31 = vpop.f32.mrf.mxu0  ;;  %v1770_v44 = vpop.f32.mrf.mxu1  ;;  %v2481_v61 = vadd.f32 %v4392_v25, %v2410_v9 }
 0x1fd   :  { %v2416_v7 = vmul.f32 %v4529_v34, %v1769_v57  ;;  %v2550_v21 = vmax.f32 %v2486_v48, 0.0  ;;  %v2548_v57 = vmax.f32 %v2484_v12, 0.0  ;;  %v2408_v44 = vmul.f32 %v4537_v8, %v1737_v58 }
 0x1fe   :  { %v1482_v18 = vpop.f32.mrf.mxu0  ;;  %v1771_v16 = vpop.f32.mrf.mxu1  ;;  %v2407_v35 = vmul.f32 %v4538_v1, %v1732_v19  ;;  %v2546_v34 = vmax.f32 %v2482_v49, 0.0  ;;  %v2545_v53 = vmax.f32 %v2481_v61, 0.0  ;;  %v2544_v41 = vmax.f32 %v2480_v42, 0.0 }
 0x1ff   :  { %v1772_v15 = vadd.f32 %v1771_v16, %v1482_v18  ;;  %v2487_v62 = vadd.f32 %v4392_v25, %v2416_v7  ;;  %v2586_v31 = vpack.c.bf16 %v2550_v21, %v2549_v26  ;;  %v2585_v7 = vpack.c.bf16 %v2548_v57, %v2547_v11  ;;  %v4539_v18 = vld [vmem:[#allocation19_spill] sm:$0xff] }
 0x200   :  { %v1484_v14 = vpop.f32.mrf.mxu0  ;;  %v1773_v54 = vpop.f32.mrf.mxu1  ;;  %v2406_v16 = vmul.f32 %v4539_v18, %v1729_v45  ;;  %v2478_v30 = vadd.f32 %v4392_v25, %v2407_v35  ;;  %v2584_v39 = vpack.c.bf16 %v2546_v34, %v2545_v53 }
 0x201   :  { %v2417_v47 = vmul.f32 %v4532_v2, %v1772_v15  ;;  %v2551_v59 = vmax.f32 %v2487_v62, 0.0 }
 0x202   :  { %v2477_v60 = vadd.f32 %v4392_v25, %v2406_v16  ;;  %v2542_v14 = vmax.f32 %v2478_v30, 0.0 }
 0x203   :  { %v2488_v17 = vadd.f32 %v4392_v25, %v2417_v47 }
 0x205   :  { %v2552_v10 = vmax.f32 %v2488_v17, 0.0 }
 0x207   :  { %v2587_v63 = vpack.c.bf16 %v2552_v10, %v2551_v59 }
 0x209   :  { %2982 = vmatprep.subr.bf16.mxu1 %v2587_v63 }
 0x20a   :  { %2983 = vmatpush3.bf16.msra.mxu1 %v4396_v3  ;;  %v2479_v3 = vadd.f32 %v4392_v25, %v2408_v44 }
 0x20b   :  { %2984 = vmatprep.subr.bf16.mxu1 %v2586_v31 }
 0x20c   :  { %v2543_v15 = vmax.f32 %v2479_v3, 0.0 }
 0x20e   :  { %2985 = vmatpush3.bf16.msra.mxu1 %v4384_v38  ;;  %v2583_v56 = vpack.c.bf16 %v2544_v41, %v2543_v15  ;;  %v2541_v38 = vmax.f32 %v2477_v60, 0.0 }
 0x20f   :  { %2986 = vmatprep.subr.bf16.mxu1 %v2585_v7 }
 0x210   :  { %v2582_v54 = vpack.c.bf16 %v2542_v14, %v2541_v38 }
 0x212   :  { %2987 = vmatpush3.bf16.msra.mxu1 %v4365_v36  ;;  %v2957_v36 = vcombine.low %v4317_v40, %v4317_v40 }
 0x213   :  { %2988 = vmatprep.subr.bf16.mxu1 %v2584_v39 }
 0x216   :  { %2989 = vmatpush3.bf16.msra.mxu1 %v4343_v13  ;;  %v2698_v13 = vld [vmem:[%s4495_s6 + $0x20] sm:$0xff] }
 0x217   :  { %2990 = vmatprep.subr.bf16.mxu1 %v2583_v56  ;;  %3044 = vmatpush3.msra.mxu0 %v2698_v13 }
 0x218   :  { %3045 = vmatprep.subr.mxu0 %v3291_v22 }
 0x21a   :  { %2991 = vmatpush3.bf16.msra.mxu1 %v4322_v24 }
 0x21b   :  { %2992 = vmatprep.subr.bf16.mxu1 %v2582_v54 }
 0x21e   :  { %2993 = vmatpush3.bf16.msra.mxu1 %v4302_v6 }
 0x21f   :  { %2994 = vmatprep.subr.bf16.mxu1 %v4415_v32 }
 0x222   :  { %2995 = vmatpush3.bf16.msra.mxu1 %v4294_v28  ;;  %v2697_v28 = vld [vmem:[%s4495_s6 + $0x18] sm:$0xff] }
 0x223   :  { %2996 = vmatprep.subr.bf16.mxu1 %v4402_v55  ;;  %3046 = vmatpush3.msra.mxu0 %v2697_v28  ;;  %v2695_v55 = vld [vmem:[%s4495_s6 + $0x8] sm:$0xff] }
 0x224   :  { %3047 = vmatprep.subr.mxu0 %v3291_v22 }
 0x226   :  { %2997 = vmatpush3.bf16.msra.mxu1 %v4283_v52  ;;  %v2696_v52 = vld [vmem:[%s4495_s6 + $0x10] sm:$0xff] }
 0x227   :  { %3048 = vmatpush3.msra.mxu0 %v2696_v52 }
 0x228   :  { %3049 = vmatprep.subr.mxu0 %v3291_v22 }
 0x229   :  { %2675 = vmatmul.mubr.bf16.vlgmr.msra.gmra.mxu1 %v2957_v36  ;;  %3050 = vmatpush3.msra.mxu0 %v2695_v55 }
 0x22a   :  { %3051 = vmatprep.subr.mxu0 %v3291_v22 }
 0x22b   :  { %3052 = vmatpush3.msra.mxu0 %v2694_v46 }
 0x269   :  { %v2976_v24 = vpop.f32.mrf.mxu0 }
 0x26b   :  { %v2977_v6 = vpop.f32.mrf.mxu0 }
 0x26c   :  { %v2978_v25 = vadd.f32 %v2977_v6, %v2976_v24 }
 0x26d   :  { %v2979_v40 = vpop.f32.mrf.mxu0 }
 0x26f   :  { %v2980_v32 = vpop.f32.mrf.mxu0 }
 0x2e9   :  { %v2998_v29 = vpop.f32.mrf.mxu1 }
 0x2eb   :  { %v2999_v48 = vpop.f32.mrf.mxu1 }
 0x2ec   :  { %v3000_v62 = vadd.f32 %v2999_v48, %v2998_v29 }
 0x2ed   :  { %v3001_v2 = vpop.f32.mrf.mxu1 }
 0x2ee   :  { %v2677_v47 = vadd.f32 %v3000_v62, %v2978_v25 }
 0x2ef   :  { %v3002_v5 = vpop.f32.mrf.mxu1 }
 0x2f0   :  { %v2693_v37 = vmul.f32 %v2691_v27, %v2677_v47 }
 0x2f2   :  { %3054 = vmatmul.mubr.f32.vlgmr.msra.gmra.mxu0 %v2693_v37 }
 0x3b2   :  { %v2783_v17 = vpop.f32.mrf.mxu0 }
 0x3b3   :  { %v2784_v33 = vadd.f32 %v2959_v20, %v2783_v17 }
 0x3b4   :  { %v3055_v4 = vpop.f32.mrf.mxu0 }
 0x3b5   :  { %2787 = vst [vmem:[%s4497_s8] sm:$0xff] %v2784_v33 }

</bundles_post_ra>
